<compile_context>
chip_gen: v7x
topology: tpu7x:2x2x1
jax: 0.10.0
libtpu: 0.0.40
codegen_flags: <defaults>
</compile_context>

<pallas_src>
import numpy as np
import jax
import jax.numpy as jnp
from jax.experimental import pallas as pl
from jax.experimental.pallas import tpu as pltpu

BN_EPS = 1e-5
K = 5
STRIDE = 2
C1, C2, C3 = 16, 32, 32
HID = 256


def conv_out(size, k=K, s=STRIDE):
    return (size - (k - 1) - 1) // s + 1


def _pad128(n):
    return ((n + 127) // 128) * 128


# --------------------------------------------------------------------------
# Fused kernel
# --------------------------------------------------------------------------
def _make_kernel(B, OH1, OW1, OH2, OW2, OH3, OW3, P1, P2):
    n_even1 = (OH1 + 1) // 2          # conv1 activation rows are parity-grouped
    n1 = float(B * OH1 * OW1)
    n2 = float(B * OH2 * OW2)
    n3 = float(B * OH3 * OW3)

    def bn_relu(pre, rmat, egmat, bwide, count):
        """Train-mode BatchNorm + ReLU on a lane-dense (rows, P) f32 block.

        rmat  (P, C): sums real (ow, c) columns per channel (zero rows for pad)
        egmat (C, P): gamma-scaled expand back to columns (zero cols for pad)
        bwide (1, P): beta expanded to columns (zero for pad)
        """
        colsum = jnp.sum(pre, axis=0, keepdims=True)
        colsq = jnp.sum(pre * pre, axis=0, keepdims=True)
        stats = jnp.dot(jnp.concatenate([colsum, colsq], axis=0), rmat,
                        preferred_element_type=jnp.float32)            # (2, C)
        mean = stats[0:1, :] * (1.0 / count)
        var = jnp.maximum(stats[1:2, :] * (1.0 / count) - mean * mean, 0.0)
        inv = jax.lax.rsqrt(var + BN_EPS)                               # (1, C)
        sw = jnp.dot(jnp.concatenate([inv, mean * inv], axis=0), egmat,
                     preferred_element_type=jnp.float32)                # (2, P)
        # = gamma*(pre-mean)*rsqrt(var+eps) + beta ; padded lanes end up exactly 0
        return jnp.maximum(pre * sw[0:1, :] + (bwide - sw[1:2, :]), 0.0)

    def kernel(lhs1_ref, m1_ref, m2_ref, m3_ref,
               r1_ref, eg1_ref, bw1_ref,
               r2_ref, eg2_ref, bw2_ref,
               r3_ref, eg3_ref, bw3_ref,
               wcomb_ref, bcomb_ref, h0_ref, c0_ref, acts_ref, wl_ref, bl_ref,
               v_ref, h1_ref, c1_ref,
               a1_ref, a2_ref):
        # ---- conv1: single dot over the wrapper-prepared, parity-grouped im2row lhs
        pre1 = jnp.dot(lhs1_ref[...], m1_ref[...],
                       preferred_element_type=jnp.float32)       # (OH1*B, P1)
        act1 = bn_relu(pre1, r1_ref[...], eg1_ref[...], bw1_ref[...], n1)
        a1_ref[...] = act1.astype(jnp.bfloat16)                  # one lane-dense store

        # ---- conv2: 5 contiguous (no stride) row slices, one aligned lane concat,
        #             one dot for all batches.
        pieces = []
        for kh in range(K):
            start = ((kh % 2) * n_even1 + kh // 2) * B           # static
            pieces.append(a1_ref[pl.ds(start, OH2 * B), :])      # (OH2*B, P1)
        lhs2 = jnp.concatenate(pieces, axis=-1)                  # (OH2*B, K*P1)
        pre2 = jnp.dot(lhs2, m2_ref[...],
                       preferred_element_type=jnp.float32)       # (OH2*B, P2)
        act2 = bn_relu(pre2, r2_ref[...], eg2_ref[...], bw2_ref[...], n2)
        a2_ref[...] = act2.astype(jnp.bfloat16)                  # rows ordered (oh2, b)

        # ---- conv3: full-flatten matmul — one lhs row per batch (all conv2 rows laid
        #             along lanes), output IS the flattened 128-wide feature row.
        rows = []
        for b in range(B):
            rb = [a2_ref[pl.ds(oh * B + b, 1), :] for oh in range(OH2)]
            rows.append(jnp.concatenate(rb, axis=-1))            # (1, OH2*P2)
        lhs3 = jnp.concatenate(rows, axis=0)                     # (B, OH2*P2)
        pre3 = jnp.dot(lhs3, m3_ref[...],
                       preferred_element_type=jnp.float32)       # (B, OH3*OW3*C3)
        feat = bn_relu(pre3, r3_ref[...], eg3_ref[...], bw3_ref[...], n3)

        # ---- LSTM cell: merged ih+hh matmul on a 128-aligned concat.
        z = jnp.concatenate([h0_ref[...].astype(jnp.bfloat16),
                             feat.astype(jnp.bfloat16),
                             acts_ref[...].astype(jnp.bfloat16)], axis=-1)
        gates = jnp.dot(z, wcomb_ref[...],
                        preferred_element_type=jnp.float32) + bcomb_ref[...]
        i = jax.nn.sigmoid(gates[:, 0:HID])
        f = jax.nn.sigmoid(gates[:, HID:2 * HID])
        g = jnp.tanh(gates[:, 2 * HID:3 * HID])
        o = jax.nn.sigmoid(gates[:, 3 * HID:4 * HID])
        c1 = f * c0_ref[...] + i * g
        h1 = o * jnp.tanh(c1)
        c1_ref[...] = c1
        h1_ref[...] = h1
        # Linear(256 -> 1) as a lane reduction (avoids an N=1 MXU pass)
        v_ref[...] = jnp.sum(h1 * wl_ref[...], axis=-1, keepdims=True) + bl_ref[...]

    return kernel


# --------------------------------------------------------------------------
# Parameters (PyTorch layout) + one-time host-side preparation
# --------------------------------------------------------------------------
def init_params(key, obs_h, obs_w, n_actions, hidden=HID):
    convw = conv_out(conv_out(conv_out(obs_w)))
    convh = conv_out(conv_out(conv_out(obs_h)))
    lin_in = convw * convh * 32 + n_actions
    ks = jax.random.split(key, 10)

    def nrm(k, shape, scale=0.05):
        return scale * jax.random.normal(k, shape, dtype=jnp.float32)

    return {
        "conv1_w": nrm(ks[0], (16, 1, 5, 5)),  "conv1_b": nrm(ks[1], (16,)),
        "bn1_g": jnp.ones((16,), jnp.float32), "bn1_b": jnp.zeros((16,), jnp.float32),
        "conv2_w": nrm(ks[2], (32, 16, 5, 5)), "conv2_b": nrm(ks[3], (32,)),
        "bn2_g": jnp.ones((32,), jnp.float32), "bn2_b": jnp.zeros((32,), jnp.float32),
        "conv3_w": nrm(ks[4], (32, 32, 5, 5)), "conv3_b": nrm(ks[5], (32,)),
        "bn3_g": jnp.ones((32,), jnp.float32), "bn3_b": jnp.zeros((32,), jnp.float32),
        # PyTorch LSTM gate order: i, f, g, o
        "lstm_w_ih": nrm(ks[6], (4 * hidden, lin_in)),
        "lstm_w_hh": nrm(ks[7], (4 * hidden, hidden)),
        "lstm_b_ih": jnp.zeros((4 * hidden,), jnp.float32),
        "lstm_b_hh": jnp.zeros((4 * hidden,), jnp.float32),
        "lin2_w": nrm(ks[8], (1, hidden)), "lin2_b": nrm(ks[9], (1,)),
    }


def prepare_params(params, obs_h, obs_w, n_actions):
    """One-time host-side transform of PyTorch-layout params into kernel form."""
    OW1, OH1 = conv_out(obs_w), conv_out(obs_h)
    OW2, OH2 = conv_out(OW1), conv_out(OH1)
    OW3, OH3 = conv_out(OW2), conv_out(OH2)
    P1 = _pad128(OW1 * C1)                 # 288 -> 384
    P2 = _pad128(OW2 * C2)                 # 224 -> 256
    P3 = OH3 * OW3 * C3                    # 128: flattened feature row width

    def np_(a):
        return np.asarray(a, dtype=np.float32)

    w1, w2, w3 = np_(params["conv1_w"]), np_(params["conv2_w"]), np_(params["conv3_w"])

    # conv1: lhs cols = kh*W + w (wrapper-built), out cols = ow1*C1 + c  (padded)
    m1 = np.zeros((K * obs_w, P1), np.float32)
    for kh in range(K):
        for kw in range(K):
            for ow in range(OW1):
                m1[kh * obs_w + STRIDE * ow + kw, ow * C1:(ow + 1) * C1] = w1[:, 0, kh, kw]

    # conv2: lhs cols = kh*P1 + ow1*C1 + c1, out cols = ow2*C2 + c2  (padded)
    m2 = np.zeros((K * P1, P2), np.float32)
    for kh in range(K):
        for kw in range(K):
            for ow2 in range(OW2):
                ow1 = STRIDE * ow2 + kw
                m2[kh * P1 + ow1 * C1: kh * P1 + (ow1 + 1) * C1,
                   ow2 * C2:(ow2 + 1) * C2] = w2[:, :, kh, kw].T

    # conv3 (full-flatten): lhs cols = oh2*P2 + ow2*C2 + c2,
    #                       out cols = (oh3*OW3 + ow3)*C3 + c3
    m3 = np.zeros((OH2 * P2, P3), np.float32)
    for kh in range(K):
        for kw in range(K):
            for oh3 in range(OH3):
                for ow3 in range(OW3):
                    oh2 = STRIDE * oh3 + kh
                    ow2 = STRIDE * ow3 + kw
                    m3[oh2 * P2 + ow2 * C2: oh2 * P2 + (ow2 + 1) * C2,
                       (oh3 * OW3 + ow3) * C3:(oh3 * OW3 + ow3 + 1) * C3] = w3[:, :, kh, kw].T

    def bn_maps(gamma, beta, n_groups, c, p):
        r = np.zeros((p, c), np.float32)
        eg = np.zeros((c, p), np.float32)
        bw = np.zeros((1, p), np.float32)
        eye = np.eye(c, dtype=np.float32)
        dg = np.diag(np_(gamma)).astype(np.float32)
        for grp in range(n_groups):
            r[grp * c:(grp + 1) * c, :] = eye
            eg[:, grp * c:(grp + 1) * c] = dg
            bw[0, grp * c:(grp + 1) * c] = np_(beta)
        return r, eg, bw

    r1, eg1, bw1 = bn_maps(params["bn1_g"], params["bn1_b"], OW1, C1, P1)
    r2, eg2, bw2 = bn_maps(params["bn2_g"], params["bn2_b"], OW2, C2, P2)
    r3, eg3, bw3 = bn_maps(params["bn3_g"], params["bn3_b"], OH3 * OW3, C3, P3)

    # Merged LSTM weight; rows ordered like the kernel's z = [h0 | conv(oh3,ow3,c) | actions].
    w_ih, w_hh = np_(params["lstm_w_ih"]), np_(params["lstm_w_hh"])
    conv_feat = OH3 * OW3 * C3
    perm = np.zeros((conv_feat,), np.int64)
    for oh3 in range(OH3):
        for ow3 in range(OW3):
            for c in range(C3):
                perm[(oh3 * OW3 + ow3) * C3 + c] = c * (OH3 * OW3) + oh3 * OW3 + ow3
    w_ihT = w_ih.T                                               # (conv_feat + n_act, 4H)
    wcomb = np.concatenate([w_hh.T, w_ihT[perm], w_ihT[conv_feat:]], axis=0)
    bcomb = (np_(params["lstm_b_ih"]) + np_(params["lstm_b_hh"])).reshape(1, -1)

    bf16 = jnp.bfloat16
    # NOTE: conv biases intentionally dropped — train-mode BatchNorm subtracts the batch
    # mean, which cancels any per-channel constant added before it.
    return {
        "m1": jnp.asarray(m1, bf16), "m2": jnp.asarray(m2, bf16), "m3": jnp.asarray(m3, bf16),
        "r1": jnp.asarray(r1), "eg1": jnp.asarray(eg1), "bw1": jnp.asarray(bw1),
        "r2": jnp.asarray(r2), "eg2": jnp.asarray(eg2), "bw2": jnp.asarray(bw2),
        "r3": jnp.asarray(r3), "eg3": jnp.asarray(eg3), "bw3": jnp.asarray(bw3),
        "wcomb": jnp.asarray(wcomb, bf16),
        "bcomb": jnp.asarray(bcomb),
        "wl": jnp.asarray(np_(params["lin2_w"]).reshape(1, HID)),
        "bl": jnp.asarray(np_(params["lin2_b"]).reshape(1, 1)),
    }


# --------------------------------------------------------------------------
# Forward wrapper (single pallas_call)
# --------------------------------------------------------------------------
def value_model_forward(prep, x, actions, hidden):
    if x.ndim == 4:                      # (B,1,H,W) -> (B,H,W)
        x = x[:, 0]
    B, H_img, W_img = x.shape
    OW1, OH1 = conv_out(W_img), conv_out(H_img)
    OW2, OH2 = conv_out(OW1), conv_out(OH1)
    OW3, OH3 = conv_out(OW2), conv_out(OH2)
    P1 = _pad128(OW1 * C1)
    P2 = _pad128(OW2 * C2)
    if actions.ndim == 3:
        actions = actions[:, 0, :]
    h0 = hidden[0][0]                    # (B, HID)
    c0 = hidden[1][0]

    # Wrapper-side layout plumbing: build conv1's im2row lhs with rows parity-grouped
    # (even oh1 first, then odd; batch-minor), cols = kh*W + w.  Pure layout — no math.
    n_even1 = (OH1 + 1) // 2
    oh_order = np.concatenate([np.arange(0, OH1, 2), np.arange(1, OH1, 2)])
    slabs = [x[:, 2 * oh_order + kh, :] for kh in range(K)]      # each (B, OH1, W)
    lhs1 = jnp.concatenate(slabs, axis=-1)                       # (B, OH1, K*W)
    lhs1 = jnp.transpose(lhs1, (1, 0, 2)).reshape(OH1 * B, K * W_img).astype(jnp.bfloat16)

    kernel = _make_kernel(B, OH1, OW1, OH2, OW2, OH3, OW3, P1, P2)
    vmem = pl.BlockSpec(memory_space=pltpu.MemorySpace.VMEM)

    v, h1, c1 = pl.pallas_call(
        kernel,
        out_shape=(jax.ShapeDtypeStruct((B, 1), jnp.float32),
                   jax.ShapeDtypeStruct((B, HID), jnp.float32),
                   jax.ShapeDtypeStruct((B, HID), jnp.float32)),
        in_specs=[vmem] * 20,
        out_specs=(vmem, vmem, vmem),
        scratch_shapes=[
            pltpu.VMEM((OH1 * B, P1), jnp.bfloat16),   # conv1 activations (parity-grouped)
            pltpu.VMEM((OH2 * B, P2), jnp.bfloat16),   # conv2 activations ((oh2,b) rows)
        ],
    )(lhs1,
      prep["m1"], prep["m2"], prep["m3"],
      prep["r1"], prep["eg1"], prep["bw1"],
      prep["r2"], prep["eg2"], prep["bw2"],
      prep["r3"], prep["eg3"], prep["bw3"],
      prep["wcomb"], prep["bcomb"], h0, c0, actions,
      prep["wl"], prep["bl"])

    out = v[:, None, :]                  # (B, 1, 1) like PyTorch
    return out, [h1[None, :, :], c1[None, :, :]]


# --------------------------------------------------------------------------
if __name__ == "__main__":
    key = jax.random.PRNGKey(0)
    B, OBS_H, OBS_W, N_ACT = 2, 40, 40, 4

    kx, ka, khd, kcd, kp = jax.random.split(key, 5)
    x = jax.random.normal(kx, (B, OBS_H, OBS_W), dtype=jnp.float32)
    actions = jax.random.normal(ka, (B, N_ACT), dtype=jnp.float32)
    h0 = jax.random.normal(khd, (1, B, HID), dtype=jnp.float32)
    c0 = jax.random.normal(kcd, (1, B, HID), dtype=jnp.float32)

    params = init_params(kp, OBS_H, OBS_W, N_ACT)
    prep = prepare_params(params, OBS_H, OBS_W, N_ACT)

    fwd = jax.jit(value_model_forward)
    out, (new_h, new_c) = fwd(prep, x, actions, [h0, c0])
    jax.block_until_ready((out, new_h, new_c))

    assert out.shape == (B, 1, 1)
    assert new_h.shape == (1, B, HID) and new_c.shape == (1, B, HID)
    assert bool(jnp.all(jnp.isfinite(out)))
    print("KERNEL_OK")
</pallas_src>

<mosaic_0001>
module attributes {stable_mosaic.version = 11 : i64} {
  func.func @kernel(%arg0: memref<36x200xbf16, #tpu.memory_space<vmem>>, %arg1: memref<200x384xbf16, #tpu.memory_space<vmem>>, %arg2: memref<1920x256xbf16, #tpu.memory_space<vmem>>, %arg3: memref<1792x128xbf16, #tpu.memory_space<vmem>>, %arg4: memref<384x16xf32, #tpu.memory_space<vmem>>, %arg5: memref<16x384xf32, #tpu.memory_space<vmem>>, %arg6: memref<1x384xf32, #tpu.memory_space<vmem>>, %arg7: memref<256x32xf32, #tpu.memory_space<vmem>>, %arg8: memref<32x256xf32, #tpu.memory_space<vmem>>, %arg9: memref<1x256xf32, #tpu.memory_space<vmem>>, %arg10: memref<128x32xf32, #tpu.memory_space<vmem>>, %arg11: memref<32x128xf32, #tpu.memory_space<vmem>>, %arg12: memref<1x128xf32, #tpu.memory_space<vmem>>, %arg13: memref<388x1024xbf16, #tpu.memory_space<vmem>>, %arg14: memref<1x1024xf32, #tpu.memory_space<vmem>>, %arg15: memref<2x256xf32, #tpu.memory_space<vmem>>, %arg16: memref<2x256xf32, #tpu.memory_space<vmem>>, %arg17: memref<2x4xf32, #tpu.memory_space<vmem>>, %arg18: memref<1x256xf32, #tpu.memory_space<vmem>>, %arg19: memref<1x1xf32, #tpu.memory_space<vmem>>, %arg20: memref<2x1xf32, #tpu.memory_space<vmem>>, %arg21: memref<2x256xf32, #tpu.memory_space<vmem>>, %arg22: memref<2x256xf32, #tpu.memory_space<vmem>>, %arg23: memref<36x384xbf16, #tpu.memory_space<vmem>>, %arg24: memref<14x256xbf16, #tpu.memory_space<vmem>>) attributes {dimension_semantics = [], scalar_prefetch = 0 : i64, scratch_operands = 2 : i64, tpu.core_type = #tpu.core_type<tc>} {
    %c0 = arith.constant 0 : index
    %c0_0 = arith.constant 0 : index
    %0 = vector.load %arg0[%c0, %c0_0] : memref<36x200xbf16, #tpu.memory_space<vmem>>, vector<36x200xbf16>
    %c0_1 = arith.constant 0 : index
    %c0_2 = arith.constant 0 : index
    %1 = vector.load %arg1[%c0_1, %c0_2] : memref<200x384xbf16, #tpu.memory_space<vmem>>, vector<200x384xbf16>
    %cst = arith.constant dense<0.000000e+00> : vector<36x384xf32>
    %2 = tpu.matmul %0, %1, %cst {dimension_numbers = #tpu.dot_dimension_numbers<[1], [0], [0], [1], [0, 0, 1, 1], [], []>} : vector<36x200xbf16>, vector<200x384xbf16>, vector<36x384xf32> -> vector<36x384xf32>
    %c0_3 = arith.constant 0 : index
    %c0_4 = arith.constant 0 : index
    %3 = vector.load %arg4[%c0_3, %c0_4] : memref<384x16xf32, #tpu.memory_space<vmem>>, vector<384x16xf32>
    %c0_5 = arith.constant 0 : index
    %c0_6 = arith.constant 0 : index
    %4 = vector.load %arg5[%c0_5, %c0_6] : memref<16x384xf32, #tpu.memory_space<vmem>>, vector<16x384xf32>
    %c0_7 = arith.constant 0 : index
    %c0_8 = arith.constant 0 : index
    %5 = vector.load %arg6[%c0_7, %c0_8] : memref<1x384xf32, #tpu.memory_space<vmem>>, vector<1x384xf32>
    %cst_9 = arith.constant dense<0.000000e+00> : vector<384xf32>
    %6 = vector.multi_reduction <add>, %2, %cst_9 [0] : vector<36x384xf32> to vector<384xf32>
    %7 = vector.shape_cast %6 : vector<384xf32> to vector<1x384xf32>
    %8 = arith.mulf %2, %2 : vector<36x384xf32>
    %cst_10 = arith.constant dense<0.000000e+00> : vector<384xf32>
    %9 = vector.multi_reduction <add>, %8, %cst_10 [0] : vector<36x384xf32> to vector<384xf32>
    %10 = vector.shape_cast %9 : vector<384xf32> to vector<1x384xf32>
    %11 = tpu.concatenate %7, %10 in 0 : vector<1x384xf32>, vector<1x384xf32> -> vector<2x384xf32>
    %cst_11 = arith.constant dense<0.000000e+00> : vector<2x16xf32>
    %12 = tpu.matmul %11, %3, %cst_11 {dimension_numbers = #tpu.dot_dimension_numbers<[1], [0], [0], [1], [0, 0, 1, 1], [], []>} : vector<2x384xf32>, vector<384x16xf32>, vector<2x16xf32> -> vector<2x16xf32>
    %13 = vector.extract_strided_slice %12 {offsets = [0, 0], sizes = [1, 16], strides = [1, 1]} : vector<2x16xf32> to vector<1x16xf32>
    %cst_12 = arith.constant 0.00154320989 : f32
    %14 = vector.broadcast %cst_12 : f32 to vector<1x16xf32>
    %15 = arith.mulf %13, %14 : vector<1x16xf32>
    %16 = vector.extract_strided_slice %12 {offsets = [1, 0], sizes = [1, 16], strides = [1, 1]} : vector<2x16xf32> to vector<1x16xf32>
    %cst_13 = arith.constant 0.00154320989 : f32
    %17 = vector.broadcast %cst_13 : f32 to vector<1x16xf32>
    %18 = arith.mulf %16, %17 : vector<1x16xf32>
    %19 = arith.mulf %15, %15 : vector<1x16xf32>
    %20 = arith.subf %18, %19 : vector<1x16xf32>
    %cst_14 = arith.constant 0.000000e+00 : f32
    %21 = vector.broadcast %cst_14 : f32 to vector<1x16xf32>
    %22 = arith.maximumf %20, %21 : vector<1x16xf32>
    %cst_15 = arith.constant 9.99999974E-6 : f32
    %23 = vector.broadcast %cst_15 : f32 to vector<1x16xf32>
    %24 = arith.addf %22, %23 : vector<1x16xf32>
    %25 = math.rsqrt %24 : vector<1x16xf32>
    %26 = arith.mulf %15, %25 : vector<1x16xf32>
    %27 = tpu.concatenate %25, %26 in 0 : vector<1x16xf32>, vector<1x16xf32> -> vector<2x16xf32>
    %cst_16 = arith.constant dense<0.000000e+00> : vector<2x384xf32>
    %28 = tpu.matmul %27, %4, %cst_16 {dimension_numbers = #tpu.dot_dimension_numbers<[1], [0], [0], [1], [0, 0, 1, 1], [], []>} : vector<2x16xf32>, vector<16x384xf32>, vector<2x384xf32> -> vector<2x384xf32>
    %29 = vector.extract_strided_slice %28 {offsets = [0, 0], sizes = [1, 384], strides = [1, 1]} : vector<2x384xf32> to vector<1x384xf32>
    %30 = vector.broadcast %29 : vector<1x384xf32> to vector<36x384xf32>
    %31 = arith.mulf %2, %30 : vector<36x384xf32>
    %32 = vector.extract_strided_slice %28 {offsets = [1, 0], sizes = [1, 384], strides = [1, 1]} : vector<2x384xf32> to vector<1x384xf32>
    %33 = arith.subf %5, %32 : vector<1x384xf32>
    %34 = vector.broadcast %33 : vector<1x384xf32> to vector<36x384xf32>
    %35 = arith.addf %31, %34 : vector<36x384xf32>
    %cst_17 = arith.constant 0.000000e+00 : f32
    %36 = vector.broadcast %cst_17 : f32 to vector<36x384xf32>
    %37 = arith.maximumf %35, %36 : vector<36x384xf32>
    %38 = arith.truncf %37 : vector<36x384xf32> to vector<36x384xbf16>
    %c0_18 = arith.constant 0 : index
    %c0_19 = arith.constant 0 : index
    %39 = vector.load %arg23[%c0_18, %c0_19] : memref<36x384xbf16, #tpu.memory_space<vmem>>, vector<36x384xbf16>
    tpu.vector_store %arg23[%c0_18, %c0_19], %38 {strides = array<i32>} : memref<36x384xbf16, #tpu.memory_space<vmem>>, vector<36x384xbf16>,
    %c0_20 = arith.constant 0 : index
    %c0_21 = arith.constant 0 : index
    %40 = vector.load %arg23[%c0_20, %c0_21] : memref<36x384xbf16, #tpu.memory_space<vmem>>, vector<14x384xbf16>
    %c18 = arith.constant 18 : index
    %c0_22 = arith.constant 0 : index
    %41 = vector.load %arg23[%c18, %c0_22] : memref<36x384xbf16, #tpu.memory_space<vmem>>, vector<14x384xbf16>
    %c2 = arith.constant 2 : index
    %c0_23 = arith.constant 0 : index
    %42 = vector.load %arg23[%c2, %c0_23] : memref<36x384xbf16, #tpu.memory_space<vmem>>, vector<14x384xbf16>
    %c20 = arith.constant 20 : index
    %c0_24 = arith.constant 0 : index
    %43 = vector.load %arg23[%c20, %c0_24] : memref<36x384xbf16, #tpu.memory_space<vmem>>, vector<14x384xbf16>
    %c4 = arith.constant 4 : index
    %c0_25 = arith.constant 0 : index
    %44 = vector.load %arg23[%c4, %c0_25] : memref<36x384xbf16, #tpu.memory_space<vmem>>, vector<14x384xbf16>
    %45 = tpu.concatenate %40, %41, %42, %43, %44 in 1 : vector<14x384xbf16>, vector<14x384xbf16>, vector<14x384xbf16>, vector<14x384xbf16>, vector<14x384xbf16> -> vector<14x1920xbf16>
    %c0_26 = arith.constant 0 : index
    %c0_27 = arith.constant 0 : index
    %46 = vector.load %arg2[%c0_26, %c0_27] : memref<1920x256xbf16, #tpu.memory_space<vmem>>, vector<1920x256xbf16>
    %cst_28 = arith.constant dense<0.000000e+00> : vector<14x256xf32>
    %47 = tpu.matmul %45, %46, %cst_28 {dimension_numbers = #tpu.dot_dimension_numbers<[1], [0], [0], [1], [0, 0, 1, 1], [], []>} : vector<14x1920xbf16>, vector<1920x256xbf16>, vector<14x256xf32> -> vector<14x256xf32>
    %c0_29 = arith.constant 0 : index
    %c0_30 = arith.constant 0 : index
    %48 = vector.load %arg7[%c0_29, %c0_30] : memref<256x32xf32, #tpu.memory_space<vmem>>, vector<256x32xf32>
    %c0_31 = arith.constant 0 : index
    %c0_32 = arith.constant 0 : index
    %49 = vector.load %arg8[%c0_31, %c0_32] : memref<32x256xf32, #tpu.memory_space<vmem>>, vector<32x256xf32>
    %c0_33 = arith.constant 0 : index
    %c0_34 = arith.constant 0 : index
    %50 = vector.load %arg9[%c0_33, %c0_34] : memref<1x256xf32, #tpu.memory_space<vmem>>, vector<1x256xf32>
    %cst_35 = arith.constant dense<0.000000e+00> : vector<256xf32>
    %51 = vector.multi_reduction <add>, %47, %cst_35 [0] : vector<14x256xf32> to vector<256xf32>
    %52 = vector.shape_cast %51 : vector<256xf32> to vector<1x256xf32>
    %53 = arith.mulf %47, %47 : vector<14x256xf32>
    %cst_36 = arith.constant dense<0.000000e+00> : vector<256xf32>
    %54 = vector.multi_reduction <add>, %53, %cst_36 [0] : vector<14x256xf32> to vector<256xf32>
    %55 = vector.shape_cast %54 : vector<256xf32> to vector<1x256xf32>
    %56 = tpu.concatenate %52, %55 in 0 : vector<1x256xf32>, vector<1x256xf32> -> vector<2x256xf32>
    %cst_37 = arith.constant dense<0.000000e+00> : vector<2x32xf32>
    %57 = tpu.matmul %56, %48, %cst_37 {dimension_numbers = #tpu.dot_dimension_numbers<[1], [0], [0], [1], [0, 0, 1, 1], [], []>} : vector<2x256xf32>, vector<256x32xf32>, vector<2x32xf32> -> vector<2x32xf32>
    %58 = vector.extract_strided_slice %57 {offsets = [0, 0], sizes = [1, 32], strides = [1, 1]} : vector<2x32xf32> to vector<1x32xf32>
    %cst_38 = arith.constant 0.0102040814 : f32
    %59 = vector.broadcast %cst_38 : f32 to vector<1x32xf32>
    %60 = arith.mulf %58, %59 : vector<1x32xf32>
    %61 = vector.extract_strided_slice %57 {offsets = [1, 0], sizes = [1, 32], strides = [1, 1]} : vector<2x32xf32> to vector<1x32xf32>
    %cst_39 = arith.constant 0.0102040814 : f32
    %62 = vector.broadcast %cst_39 : f32 to vector<1x32xf32>
    %63 = arith.mulf %61, %62 : vector<1x32xf32>
    %64 = arith.mulf %60, %60 : vector<1x32xf32>
    %65 = arith.subf %63, %64 : vector<1x32xf32>
    %cst_40 = arith.constant 0.000000e+00 : f32
    %66 = vector.broadcast %cst_40 : f32 to vector<1x32xf32>
    %67 = arith.maximumf %65, %66 : vector<1x32xf32>
    %cst_41 = arith.constant 9.99999974E-6 : f32
    %68 = vector.broadcast %cst_41 : f32 to vector<1x32xf32>
    %69 = arith.addf %67, %68 : vector<1x32xf32>
    %70 = math.rsqrt %69 : vector<1x32xf32>
    %71 = arith.mulf %60, %70 : vector<1x32xf32>
    %72 = tpu.concatenate %70, %71 in 0 : vector<1x32xf32>, vector<1x32xf32> -> vector<2x32xf32>
    %cst_42 = arith.constant dense<0.000000e+00> : vector<2x256xf32>
    %73 = tpu.matmul %72, %49, %cst_42 {dimension_numbers = #tpu.dot_dimension_numbers<[1], [0], [0], [1], [0, 0, 1, 1], [], []>} : vector<2x32xf32>, vector<32x256xf32>, vector<2x256xf32> -> vector<2x256xf32>
    %74 = vector.extract_strided_slice %73 {offsets = [0, 0], sizes = [1, 256], strides = [1, 1]} : vector<2x256xf32> to vector<1x256xf32>
    %75 = vector.broadcast %74 : vector<1x256xf32> to vector<14x256xf32>
    %76 = arith.mulf %47, %75 : vector<14x256xf32>
    %77 = vector.extract_strided_slice %73 {offsets = [1, 0], sizes = [1, 256], strides = [1, 1]} : vector<2x256xf32> to vector<1x256xf32>
    %78 = arith.subf %50, %77 : vector<1x256xf32>
    %79 = vector.broadcast %78 : vector<1x256xf32> to vector<14x256xf32>
    %80 = arith.addf %76, %79 : vector<14x256xf32>
    %cst_43 = arith.constant 0.000000e+00 : f32
    %81 = vector.broadcast %cst_43 : f32 to vector<14x256xf32>
    %82 = arith.maximumf %80, %81 : vector<14x256xf32>
    %83 = arith.truncf %82 : vector<14x256xf32> to vector<14x256xbf16>
    %c0_44 = arith.constant 0 : index
    %c0_45 = arith.constant 0 : index
    %84 = vector.load %arg24[%c0_44, %c0_45] : memref<14x256xbf16, #tpu.memory_space<vmem>>, vector<14x256xbf16>
    tpu.vector_store %arg24[%c0_44, %c0_45], %83 {strides = array<i32>} : memref<14x256xbf16, #tpu.memory_space<vmem>>, vector<14x256xbf16>,
    %c0_46 = arith.constant 0 : index
    %c0_47 = arith.constant 0 : index
    %85 = vector.load %arg24[%c0_46, %c0_47] : memref<14x256xbf16, #tpu.memory_space<vmem>>, vector<1x256xbf16>
    %c2_48 = arith.constant 2 : index
    %c0_49 = arith.constant 0 : index
    %86 = vector.load %arg24[%c2_48, %c0_49] : memref<14x256xbf16, #tpu.memory_space<vmem>>, vector<1x256xbf16>
    %c4_50 = arith.constant 4 : index
    %c0_51 = arith.constant 0 : index
    %87 = vector.load %arg24[%c4_50, %c0_51] : memref<14x256xbf16, #tpu.memory_space<vmem>>, vector<1x256xbf16>
    %c6 = arith.constant 6 : index
    %c0_52 = arith.constant 0 : index
    %88 = vector.load %arg24[%c6, %c0_52] : memref<14x256xbf16, #tpu.memory_space<vmem>>, vector<1x256xbf16>
    %c8 = arith.constant 8 : index
    %c0_53 = arith.constant 0 : index
    %89 = vector.load %arg24[%c8, %c0_53] : memref<14x256xbf16, #tpu.memory_space<vmem>>, vector<1x256xbf16>
    %c10 = arith.constant 10 : index
    %c0_54 = arith.constant 0 : index
    %90 = vector.load %arg24[%c10, %c0_54] : memref<14x256xbf16, #tpu.memory_space<vmem>>, vector<1x256xbf16>
    %c12 = arith.constant 12 : index
    %c0_55 = arith.constant 0 : index
    %91 = vector.load %arg24[%c12, %c0_55] : memref<14x256xbf16, #tpu.memory_space<vmem>>, vector<1x256xbf16>
    %92 = tpu.concatenate %85, %86, %87, %88, %89, %90, %91 in 1 : vector<1x256xbf16>, vector<1x256xbf16>, vector<1x256xbf16>, vector<1x256xbf16>, vector<1x256xbf16>, vector<1x256xbf16>, vector<1x256xbf16> -> vector<1x1792xbf16>
    %c1 = arith.constant 1 : index
    %c0_56 = arith.constant 0 : index
    %93 = vector.load %arg24[%c1, %c0_56] : memref<14x256xbf16, #tpu.memory_space<vmem>>, vector<1x256xbf16>
    %c3 = arith.constant 3 : index
    %c0_57 = arith.constant 0 : index
    %94 = vector.load %arg24[%c3, %c0_57] : memref<14x256xbf16, #tpu.memory_space<vmem>>, vector<1x256xbf16>
    %c5 = arith.constant 5 : index
    %c0_58 = arith.constant 0 : index
    %95 = vector.load %arg24[%c5, %c0_58] : memref<14x256xbf16, #tpu.memory_space<vmem>>, vector<1x256xbf16>
    %c7 = arith.constant 7 : index
    %c0_59 = arith.constant 0 : index
    %96 = vector.load %arg24[%c7, %c0_59] : memref<14x256xbf16, #tpu.memory_space<vmem>>, vector<1x256xbf16>
    %c9 = arith.constant 9 : index
    %c0_60 = arith.constant 0 : index
    %97 = vector.load %arg24[%c9, %c0_60] : memref<14x256xbf16, #tpu.memory_space<vmem>>, vector<1x256xbf16>
    %c11 = arith.constant 11 : index
    %c0_61 = arith.constant 0 : index
    %98 = vector.load %arg24[%c11, %c0_61] : memref<14x256xbf16, #tpu.memory_space<vmem>>, vector<1x256xbf16>
    %c13 = arith.constant 13 : index
    %c0_62 = arith.constant 0 : index
    %99 = vector.load %arg24[%c13, %c0_62] : memref<14x256xbf16, #tpu.memory_space<vmem>>, vector<1x256xbf16>
    %100 = tpu.concatenate %93, %94, %95, %96, %97, %98, %99 in 1 : vector<1x256xbf16>, vector<1x256xbf16>, vector<1x256xbf16>, vector<1x256xbf16>, vector<1x256xbf16>, vector<1x256xbf16>, vector<1x256xbf16> -> vector<1x1792xbf16>
    %101 = tpu.concatenate %92, %100 in 0 : vector<1x1792xbf16>, vector<1x1792xbf16> -> vector<2x1792xbf16>
    %c0_63 = arith.constant 0 : index
    %c0_64 = arith.constant 0 : index
    %102 = vector.load %arg3[%c0_63, %c0_64] : memref<1792x128xbf16, #tpu.memory_space<vmem>>, vector<1792x128xbf16>
    %cst_65 = arith.constant dense<0.000000e+00> : vector<2x128xf32>
    %103 = tpu.matmul %101, %102, %cst_65 {dimension_numbers = #tpu.dot_dimension_numbers<[1], [0], [0], [1], [0, 0, 1, 1], [], []>} : vector<2x1792xbf16>, vector<1792x128xbf16>, vector<2x128xf32> -> vector<2x128xf32>
    %c0_66 = arith.constant 0 : index
    %c0_67 = arith.constant 0 : index
    %104 = vector.load %arg10[%c0_66, %c0_67] : memref<128x32xf32, #tpu.memory_space<vmem>>, vector<128x32xf32>
    %c0_68 = arith.constant 0 : index
    %c0_69 = arith.constant 0 : index
    %105 = vector.load %arg11[%c0_68, %c0_69] : memref<32x128xf32, #tpu.memory_space<vmem>>, vector<32x128xf32>
    %c0_70 = arith.constant 0 : index
    %c0_71 = arith.constant 0 : index
    %106 = vector.load %arg12[%c0_70, %c0_71] : memref<1x128xf32, #tpu.memory_space<vmem>>, vector<1x128xf32>
    %cst_72 = arith.constant dense<0.000000e+00> : vector<128xf32>
    %107 = vector.multi_reduction <add>, %103, %cst_72 [0] : vector<2x128xf32> to vector<128xf32>
    %108 = vector.shape_cast %107 : vector<128xf32> to vector<1x128xf32>
    %109 = arith.mulf %103, %103 : vector<2x128xf32>
    %cst_73 = arith.constant dense<0.000000e+00> : vector<128xf32>
    %110 = vector.multi_reduction <add>, %109, %cst_73 [0] : vector<2x128xf32> to vector<128xf32>
    %111 = vector.shape_cast %110 : vector<128xf32> to vector<1x128xf32>
    %112 = tpu.concatenate %108, %111 in 0 : vector<1x128xf32>, vector<1x128xf32> -> vector<2x128xf32>
    %cst_74 = arith.constant dense<0.000000e+00> : vector<2x32xf32>
    %113 = tpu.matmul %112, %104, %cst_74 {dimension_numbers = #tpu.dot_dimension_numbers<[1], [0], [0], [1], [0, 0, 1, 1], [], []>} : vector<2x128xf32>, vector<128x32xf32>, vector<2x32xf32> -> vector<2x32xf32>
    %114 = vector.extract_strided_slice %113 {offsets = [0, 0], sizes = [1, 32], strides = [1, 1]} : vector<2x32xf32> to vector<1x32xf32>
    %cst_75 = arith.constant 1.250000e-01 : f32
    %115 = vector.broadcast %cst_75 : f32 to vector<1x32xf32>
    %116 = arith.mulf %114, %115 : vector<1x32xf32>
    %117 = vector.extract_strided_slice %113 {offsets = [1, 0], sizes = [1, 32], strides = [1, 1]} : vector<2x32xf32> to vector<1x32xf32>
    %cst_76 = arith.constant 1.250000e-01 : f32
    %118 = vector.broadcast %cst_76 : f32 to vector<1x32xf32>
    %119 = arith.mulf %117, %118 : vector<1x32xf32>
    %120 = arith.mulf %116, %116 : vector<1x32xf32>
    %121 = arith.subf %119, %120 : vector<1x32xf32>
    %cst_77 = arith.constant 0.000000e+00 : f32
    %122 = vector.broadcast %cst_77 : f32 to vector<1x32xf32>
    %123 = arith.maximumf %121, %122 : vector<1x32xf32>
    %cst_78 = arith.constant 9.99999974E-6 : f32
    %124 = vector.broadcast %cst_78 : f32 to vector<1x32xf32>
    %125 = arith.addf %123, %124 : vector<1x32xf32>
    %126 = math.rsqrt %125 : vector<1x32xf32>
    %127 = arith.mulf %116, %126 : vector<1x32xf32>
    %128 = tpu.concatenate %126, %127 in 0 : vector<1x32xf32>, vector<1x32xf32> -> vector<2x32xf32>
    %cst_79 = arith.constant dense<0.000000e+00> : vector<2x128xf32>
    %129 = tpu.matmul %128, %105, %cst_79 {dimension_numbers = #tpu.dot_dimension_numbers<[1], [0], [0], [1], [0, 0, 1, 1], [], []>} : vector<2x32xf32>, vector<32x128xf32>, vector<2x128xf32> -> vector<2x128xf32>
    %130 = vector.extract_strided_slice %129 {offsets = [0, 0], sizes = [1, 128], strides = [1, 1]} : vector<2x128xf32> to vector<1x128xf32>
    %131 = vector.broadcast %130 : vector<1x128xf32> to vector<2x128xf32>
    %132 = arith.mulf %103, %131 : vector<2x128xf32>
    %133 = vector.extract_strided_slice %129 {offsets = [1, 0], sizes = [1, 128], strides = [1, 1]} : vector<2x128xf32> to vector<1x128xf32>
    %134 = arith.subf %106, %133 : vector<1x128xf32>
    %135 = vector.broadcast %134 : vector<1x128xf32> to vector<2x128xf32>
    %136 = arith.addf %132, %135 : vector<2x128xf32>
    %cst_80 = arith.constant 0.000000e+00 : f32
    %137 = vector.broadcast %cst_80 : f32 to vector<2x128xf32>
    %138 = arith.maximumf %136, %137 : vector<2x128xf32>
    %c0_81 = arith.constant 0 : index
    %c0_82 = arith.constant 0 : index
    %139 = vector.load %arg15[%c0_81, %c0_82] : memref<2x256xf32, #tpu.memory_space<vmem>>, vector<2x256xf32>
    %140 = arith.truncf %139 : vector<2x256xf32> to vector<2x256xbf16>
    %141 = arith.truncf %138 : vector<2x128xf32> to vector<2x128xbf16>
    %c0_83 = arith.constant 0 : index
    %c0_84 = arith.constant 0 : index
    %142 = vector.load %arg17[%c0_83, %c0_84] : memref<2x4xf32, #tpu.memory_space<vmem>>, vector<2x4xf32>
    %143 = arith.truncf %142 : vector<2x4xf32> to vector<2x4xbf16>
    %144 = tpu.concatenate %140, %141, %143 in 1 : vector<2x256xbf16>, vector<2x128xbf16>, vector<2x4xbf16> -> vector<2x388xbf16>
    %c0_85 = arith.constant 0 : index
    %c0_86 = arith.constant 0 : index
    %145 = vector.load %arg13[%c0_85, %c0_86] : memref<388x1024xbf16, #tpu.memory_space<vmem>>, vector<388x1024xbf16>
    %cst_87 = arith.constant dense<0.000000e+00> : vector<2x1024xf32>
    %146 = tpu.matmul %144, %145, %cst_87 {dimension_numbers = #tpu.dot_dimension_numbers<[1], [0], [0], [1], [0, 0, 1, 1], [], []>} : vector<2x388xbf16>, vector<388x1024xbf16>, vector<2x1024xf32> -> vector<2x1024xf32>
    %c0_88 = arith.constant 0 : index
    %c0_89 = arith.constant 0 : index
    %147 = vector.load %arg14[%c0_88, %c0_89] : memref<1x1024xf32, #tpu.memory_space<vmem>>, vector<1x1024xf32>
    %148 = vector.broadcast %147 : vector<1x1024xf32> to vector<2x1024xf32>
    %149 = arith.addf %146, %148 : vector<2x1024xf32>
    %150 = vector.extract_strided_slice %149 {offsets = [0, 0], sizes = [2, 256], strides = [1, 1]} : vector<2x1024xf32> to vector<2x256xf32>
    %151 = arith.negf %150 : vector<2x256xf32>
    %152 = math.exp %151 : vector<2x256xf32>
    %cst_90 = arith.constant 1.000000e+00 : f32
    %153 = vector.broadcast %cst_90 : f32 to vector<2x256xf32>
    %154 = arith.addf %153, %152 : vector<2x256xf32>
    %155 = arith.divf %153, %154 : vector<2x256xf32>
    %156 = vector.extract_strided_slice %149 {offsets = [0, 256], sizes = [2, 256], strides = [1, 1]} : vector<2x1024xf32> to vector<2x256xf32>
    %157 = arith.negf %156 : vector<2x256xf32>
    %158 = math.exp %157 : vector<2x256xf32>
    %cst_91 = arith.constant 1.000000e+00 : f32
    %159 = vector.broadcast %cst_91 : f32 to vector<2x256xf32>
    %160 = arith.addf %159, %158 : vector<2x256xf32>
    %161 = arith.divf %159, %160 : vector<2x256xf32>
    %162 = vector.extract_strided_slice %149 {offsets = [0, 512], sizes = [2, 256], strides = [1, 1]} : vector<2x1024xf32> to vector<2x256xf32>
    %163 = math.tanh %162 : vector<2x256xf32>
    %164 = vector.extract_strided_slice %149 {offsets = [0, 768], sizes = [2, 256], strides = [1, 1]} : vector<2x1024xf32> to vector<2x256xf32>
    %165 = arith.negf %164 : vector<2x256xf32>
    %166 = math.exp %165 : vector<2x256xf32>
    %cst_92 = arith.constant 1.000000e+00 : f32
    %167 = vector.broadcast %cst_92 : f32 to vector<2x256xf32>
    %168 = arith.addf %167, %166 : vector<2x256xf32>
    %169 = arith.divf %167, %168 : vector<2x256xf32>
    %c0_93 = arith.constant 0 : index
    %c0_94 = arith.constant 0 : index
    %170 = vector.load %arg16[%c0_93, %c0_94] : memref<2x256xf32, #tpu.memory_space<vmem>>, vector<2x256xf32>
    %171 = arith.mulf %161, %170 : vector<2x256xf32>
    %172 = arith.mulf %155, %163 : vector<2x256xf32>
    %173 = arith.addf %171, %172 : vector<2x256xf32>
    %174 = math.tanh %173 : vector<2x256xf32>
    %175 = arith.mulf %169, %174 : vector<2x256xf32>
    %c0_95 = arith.constant 0 : index
    %c0_96 = arith.constant 0 : index
    %176 = vector.load %arg22[%c0_95, %c0_96] : memref<2x256xf32, #tpu.memory_space<vmem>>, vector<2x256xf32>
    tpu.vector_store %arg22[%c0_95, %c0_96], %173 {strides = array<i32>} : memref<2x256xf32, #tpu.memory_space<vmem>>, vector<2x256xf32>,
    %c0_97 = arith.constant 0 : index
    %c0_98 = arith.constant 0 : index
    %177 = vector.load %arg21[%c0_97, %c0_98] : memref<2x256xf32, #tpu.memory_space<vmem>>, vector<2x256xf32>
    tpu.vector_store %arg21[%c0_97, %c0_98], %175 {strides = array<i32>} : memref<2x256xf32, #tpu.memory_space<vmem>>, vector<2x256xf32>,
    %c0_99 = arith.constant 0 : index
    %c0_100 = arith.constant 0 : index
    %178 = vector.load %arg18[%c0_99, %c0_100] : memref<1x256xf32, #tpu.memory_space<vmem>>, vector<1x256xf32>
    %179 = vector.broadcast %178 : vector<1x256xf32> to vector<2x256xf32>
    %180 = arith.mulf %175, %179 : vector<2x256xf32>
    %cst_101 = arith.constant dense<0.000000e+00> : vector<2xf32>
    %181 = vector.multi_reduction <add>, %180, %cst_101 [1] : vector<2x256xf32> to vector<2xf32>
    %182 = vector.shape_cast %181 : vector<2xf32> to vector<2x1xf32>
    %c0_102 = arith.constant 0 : index
    %c0_103 = arith.constant 0 : index
    %183 = vector.load %arg19[%c0_102, %c0_103] : memref<1x1xf32, #tpu.memory_space<vmem>>, vector<1x1xf32>
    %184 = vector.broadcast %183 : vector<1x1xf32> to vector<2x1xf32>
    %185 = arith.addf %182, %184 : vector<2x1xf32>
    %c0_104 = arith.constant 0 : index
    %c0_105 = arith.constant 0 : index
    %186 = vector.load %arg20[%c0_104, %c0_105] : memref<2x1xf32, #tpu.memory_space<vmem>>, vector<2x1xf32>
    tpu.vector_store %arg20[%c0_104, %c0_105], %185 {strides = array<i32>} : memref<2x1xf32, #tpu.memory_space<vmem>>, vector<2x1xf32>,
    return
  }
}

</mosaic_0001>

<bundles_post_ra>
// kernel: value_model_forward.1
= control target key start
LH: loop header
LB: loop body
LE: loop exit
PB: predicated region body
PF: predicated region fallthrough
CT: control target
= control target key end

     0   :  { %s10352_s0 = inlined_call_operand.vmem [shape: bf16[36,200], index: 0, kind: input, shape index: {}]   ;;  %s10353_s1 = inlined_call_operand.hbm [shape: bf16[200,384], index: 1, kind: input, shape index: {}]   ;;  %s10354_s2 = inlined_call_operand.hbm [shape: bf16[1920,256], index: 2, kind: input, shape index: {}]   ;;  %s10355_s3 = inlined_call_operand.hbm [shape: bf16[1792,128], index: 3, kind: input, shape index: {}]   ;;  %s10356_s4 = inlined_call_operand.vmem [shape: f32[384,16], index: 4, kind: input, shape index: {}]   ;;  %s10357_s5 = inlined_call_operand.hbm [shape: f32[16,384], index: 5, kind: input, shape index: {}]   ;;  %s10358_s6 = inlined_call_operand.vmem [shape: f32[1,384], index: 6, kind: input, shape index: {}]   ;;  %s10359_s7 = inlined_call_operand.vmem [shape: f32[256,32], index: 7, kind: input, shape index: {}]   ;;  %s10360_s8 = inlined_call_operand.hbm [shape: f32[32,256], index: 8, kind: input, shape index: {}]   ;;  %s10361_s9 = inlined_call_operand.hbm [shape: f32[1,256], index: 9, kind: input, shape index: {}]   ;;  %s10362_s10 = inlined_call_operand.vmem [shape: f32[128,32], index: 10, kind: input, shape index: {}]   ;;  %s10363_s11 = inlined_call_operand.vmem [shape: f32[32,128], index: 11, kind: input, shape index: {}]   ;;  %s10364_s12 = inlined_call_operand.hbm [shape: f32[1,128], index: 12, kind: input, shape index: {}]   ;;  %s10365_s13 = inlined_call_operand.vmem [shape: bf16[388,1024], index: 13, kind: input, shape index: {}]   ;;  %s10366_s14 = inlined_call_operand.hbm [shape: f32[1,1024], index: 14, kind: input, shape index: {}]   ;;  %s10367_s15 = inlined_call_operand.vmem [shape: f32[2,256], index: 15, kind: input, shape index: {}]   ;;  %s10368_s16 = inlined_call_operand.vmem [shape: f32[2,256], index: 16, kind: input, shape index: {}]   ;;  %s10369_s17 = inlined_call_operand.hbm [shape: f32[2,4], index: 17, kind: input, shape index: {}]   ;;  %s10370_s18 = inlined_call_operand.hbm [shape: f32[1,256], index: 18, kind: input, shape index: {}]   ;;  %s10371_s19 = inlined_call_operand.<no memory space> [shape: f32[1,1], index: 19, kind: input, shape index: {}]   ;;  %s10372_s20 = inlined_call_operand.vmem [shape: f32[2,1], index: 20, kind: output, shape index: {0}]   ;;  %s10373_s21 = inlined_call_operand.hbm [shape: f32[2,256], index: 21, kind: output, shape index: {1}]   ;;  %s10374_s22 = inlined_call_operand.hbm [shape: f32[2,256], index: 22, kind: output, shape index: {2}]  }
   0x1   :  { %10381 = sst [smem:[#allocation33_spill]] %s10352_s0  ;;  %v28_v0 = vstv %s10371_s19 }
   0x2   :  { %10382 = sst [smem:[#allocation34_spill]] %s10353_s1  ;;  %29 = vst [vmem:[#allocation4] sm:$0x1] %v28_v0 }
   0x3   :  { %10383 = sst [smem:[#allocation35_spill]] %s10354_s2 }
   0x4   :  { %10384 = sst [smem:[#allocation36_spill]] %s10355_s3 }
   0x5   :  { %10385 = sst [smem:[#allocation37_spill]] %s10356_s4 }
   0x6   :  { %10386 = sst [smem:[#allocation38_spill]] %s10357_s5 }
   0x7   :  { %10387 = sst [smem:[#allocation39_spill]] %s10358_s6 }
   0x8   :  { %10388 = sst [smem:[#allocation40_spill]] %s10372_s20 }
   0x9   :  { %30 = vsyncpa [#allocation6], 0 }
   0xa   :  { %31 = vsyncpa [#allocation9], 0 }
   0xb   :  { %32 = vsyncpa [#allocation12], 0 }
   0xc   :  { %33 = vsyncpa [#allocation15], 0 }
   0xd   :  { %34 = vsyncpa [#allocation18], 0 }
   0xe   :  { %35 = vsyncpa [#allocation21], 0 }
   0xf   :  { %36 = vsyncpa [#allocation7], 0 }
  0x10   :  { %37 = vsyncpa [#allocation24], 0  ;;  %s8790_s29 = smov [#allocation8]   ;;  %s10389_s23 = sld [smem:[#allocation35_spill]] }
  0x11   :  { %s57_s30 = sshll.u32 %s8790_s29, 4  ;;  %s58_s30 = int_to_ptr.vmem [resolvable:$true] %s57_s30 }
  0x16   :  { %s8510_s1 = scalar_lea.hbm %s10389_s23, 30720 }
  0x17   :  { %p8511_p0 = scmp.ne.s32.totalorder %s10389_s23, %s8510_s1  ;;  %p8514_p1 = scmp.lt.u32.totalorder %s8510_s1, %s10389_s23 }
  0x19   :  { %p8516_p2 = pnand %p8514_p1, %p8511_p0 }
  0x1b   :  { %8519 = shalt.err (!%p8516_p2)
}
  0x1c   :  { %s8520_s25 = scalar_lea.vmem %s58_s30, 30720  ;;  %p8525_p4 = scmp.lt.s32.totalorder %s58_s30, %s58_s30 }
  0x1d   :  { %p8521_p3 = scmp.ne.s32.totalorder %s58_s30, %s8520_s25  ;;  %p8526_p5 = scmp.lt.s32.totalorder %s8520_s25, %s8520_s25 }
  0x1f   :  { %p8527_p6 = por %p8526_p5, %p8525_p4 }
  0x21   :  { %p8528_p7 = pnand %p8527_p6, %p8521_p3 }
  0x23   :  { %8531 = shalt.err (!%p8528_p7)
}
  0x24   :  { %s8791_s26 = smov 128   ;;  %s8792_s2 = smov 8  }
  0x25   :  { %63 = dma.hbm_to_vmem [thread:$0]  %s10389_s23, 30720, %s58_s30, [#allocation9], %s8791_s26, %s8791_s26, %s8792_s2  }
  0x26   :  { %s8793_s28 = smov [#allocation11]   ;;  %s10390_s1 = sld [smem:[#allocation38_spill]] }
  0x27   :  { %s83_s29 = sshll.u32 %s8793_s28, 4  ;;  %s84_s29 = int_to_ptr.vmem [resolvable:$true] %s83_s29 }
  0x2c   :  { %s8532_s5 = scalar_lea.hbm %s10390_s1, 768 }
  0x2d   :  { %p8533_p8 = scmp.ne.s32.totalorder %s10390_s1, %s8532_s5  ;;  %p8536_p9 = scmp.lt.u32.totalorder %s8532_s5, %s10390_s1 }
  0x2f   :  { %p8538_p10 = pnand %p8536_p9, %p8533_p8 }
  0x31   :  { %8541 = shalt.err (!%p8538_p10)
}
  0x32   :  { %s8542_s20 = scalar_lea.vmem %s84_s29, 768  ;;  %p8547_p12 = scmp.lt.s32.totalorder %s84_s29, %s84_s29 }
  0x33   :  { %p8543_p11 = scmp.ne.s32.totalorder %s84_s29, %s8542_s20  ;;  %p8548_p13 = scmp.lt.s32.totalorder %s8542_s20, %s8542_s20 }
  0x35   :  { %p8549_p0 = por %p8548_p13, %p8547_p12 }
  0x37   :  { %p8550_p1 = pnand %p8549_p0, %p8543_p11 }
  0x39   :  { %8553 = shalt.err (!%p8550_p1)
}
  0x3a   :  { %s8794_s30 = smov 384   ;;  %s8795_s23 = smov 24  }
  0x3b   :  { %89 = dma.hbm_to_vmem [thread:$0]  %s10390_s1, 768, %s84_s29, [#allocation12], %s8794_s30, %s8794_s30, %s8795_s23  }
  0x3c   :  { %s8796_s27 = smov [#allocation14]   ;;  %s8797_s28 = smov [#allocation17]  }
  0x3d   :  { %s112_s3 = sshll.u32 %s8796_s27, 4  ;;  %s138_s4 = sshll.u32 %s8797_s28, 4  ;;  %s113_s3 = int_to_ptr.vmem [resolvable:$true] %s112_s3  ;;  %s139_s4 = int_to_ptr.vmem [resolvable:$true] %s138_s4 }
  0x3e   :  { %s8554_s24 = scalar_lea.hbm %s10361_s9, 32 }
  0x3f   :  { %p8555_p2 = scmp.ne.s32.totalorder %s10361_s9, %s8554_s24  ;;  %p8558_p3 = scmp.lt.u32.totalorder %s8554_s24, %s10361_s9 }
  0x41   :  { %p8560_p4 = pnand %p8558_p3, %p8555_p2 }
  0x43   :  { %8563 = shalt.err (!%p8560_p4)
}
  0x44   :  { %s8564_s29 = scalar_lea.vmem %s113_s3, 32  ;;  %p8569_p6 = scmp.lt.s32.totalorder %s113_s3, %s113_s3 }
  0x45   :  { %p8565_p5 = scmp.ne.s32.totalorder %s113_s3, %s8564_s29  ;;  %p8570_p7 = scmp.lt.s32.totalorder %s8564_s29, %s8564_s29 }
  0x47   :  { %p8571_p8 = por %p8570_p7, %p8569_p6 }
  0x49   :  { %p8572_p9 = pnand %p8571_p8, %p8565_p5 }
  0x4b   :  { %8575 = shalt.err (!%p8572_p9)
}
  0x4c   :  { %115 = dma.hbm_to_vmem [thread:$0]  %s10361_s9, 32, %s113_s3, [#allocation15]  }
  0x4d   :  { %s8576_s2 = scalar_lea.hbm %s10366_s14, 128 }
  0x4e   :  { %p8577_p10 = scmp.ne.s32.totalorder %s10366_s14, %s8576_s2  ;;  %p8580_p11 = scmp.lt.u32.totalorder %s8576_s2, %s10366_s14 }
  0x50   :  { %p8582_p12 = pnand %p8580_p11, %p8577_p10 }
  0x52   :  { %8585 = shalt.err (!%p8582_p12)
}
  0x53   :  { %s8586_s24 = scalar_lea.vmem %s139_s4, 128  ;;  %p8591_p0 = scmp.lt.s32.totalorder %s139_s4, %s139_s4 }
  0x54   :  { %p8587_p13 = scmp.ne.s32.totalorder %s139_s4, %s8586_s24  ;;  %p8592_p1 = scmp.lt.s32.totalorder %s8586_s24, %s8586_s24 }
  0x56   :  { %p8593_p2 = por %p8592_p1, %p8591_p0 }
  0x58   :  { %p8594_p3 = pnand %p8593_p2, %p8587_p13 }
  0x5a   :  { %8597 = shalt.err (!%p8594_p3)
}
  0x5b   :  { %141 = dma.hbm_to_vmem [thread:$0]  %s10366_s14, 128, %s139_s4, [#allocation18]  }
  0x5c   :  { %s8798_s20 = smov [#allocation5]   ;;  %s10391_s29 = sld [smem:[#allocation34_spill]] }
  0x5d   :  { %s45_s19 = sshll.u32 %s8798_s20, 4  ;;  %s46_s19 = int_to_ptr.vmem [resolvable:$true] %s45_s19 }
  0x62   :  { %s8598_s1 = scalar_lea.hbm %s10391_s29, 4800 }
  0x63   :  { %p8599_p4 = scmp.ne.s32.totalorder %s10391_s29, %s8598_s1  ;;  %p8602_p5 = scmp.lt.u32.totalorder %s8598_s1, %s10391_s29 }
  0x65   :  { %p8604_p6 = pnand %p8602_p5, %p8599_p4 }
  0x67   :  { %8607 = shalt.err (!%p8604_p6)
}
  0x68   :  { %s8608_s27 = scalar_lea.vmem %s46_s19, 4800  ;;  %p8613_p8 = scmp.lt.s32.totalorder %s46_s19, %s46_s19 }
  0x69   :  { %p8609_p7 = scmp.ne.s32.totalorder %s46_s19, %s8608_s27  ;;  %p8614_p9 = scmp.lt.s32.totalorder %s8608_s27, %s8608_s27 }
  0x6b   :  { %p8615_p10 = por %p8614_p9, %p8613_p8 }
  0x6d   :  { %p8616_p11 = pnand %p8615_p10, %p8609_p7 }
  0x6f   :  { %8619 = shalt.err (!%p8616_p11)
}
  0x70   :  { %s8799_s14 = smov 192   ;;  %s8800_s4 = smov 12  }
  0x71   :  { %51 = dma.hbm_to_vmem [thread:$0]  %s10391_s29, 4800, %s46_s19, [#allocation6], %s8799_s14, %s8799_s14, %s8800_s4  }
  0x72   :  { %s8801_s5 = smov [#allocation10]   ;;  %s10392_s20 = sld [smem:[#allocation36_spill]] }
  0x73   :  { %s69_s24 = sshll.u32 %s8801_s5, 4  ;;  %s70_s24 = int_to_ptr.vmem [resolvable:$true] %s69_s24 }
  0x78   :  { %s8620_s6 = scalar_lea.hbm %s10392_s20, 14336 }
  0x79   :  { %p8621_p12 = scmp.ne.s32.totalorder %s10392_s20, %s8620_s6  ;;  %p8624_p13 = scmp.lt.u32.totalorder %s8620_s6, %s10392_s20 }
  0x7b   :  { %p8626_p0 = pnand %p8624_p13, %p8621_p12 }
  0x7d   :  { %8629 = shalt.err (!%p8626_p0)
}
  0x7e   :  { %s8630_s26 = scalar_lea.vmem %s70_s24, 14336  ;;  %p8635_p2 = scmp.lt.s32.totalorder %s70_s24, %s70_s24 }
  0x7f   :  { %p8631_p1 = scmp.ne.s32.totalorder %s70_s24, %s8630_s26  ;;  %p8636_p3 = scmp.lt.s32.totalorder %s8630_s26, %s8630_s26 }
  0x81   :  { %p8637_p4 = por %p8636_p3, %p8635_p2 }
  0x83   :  { %p8638_p5 = pnand %p8637_p4, %p8631_p1 }
  0x85   :  { %8641 = shalt.err (!%p8638_p5)
}
  0x86   :  { %s8802_s19 = smov 64   ;;  %s8803_s29 = smov 4  }
  0x87   :  { %75 = dma.hbm_to_vmem [thread:$0]  %s10392_s20, 14336, %s70_s24, [#allocation9], %s8802_s19, %s8802_s19, %s8803_s29  }
  0x88   :  { %s8804_s14 = smov [#allocation13]   ;;  %s8642_s5 = scalar_lea.hbm %s10360_s8, 1024 }
  0x89   :  { %s99_s4 = sshll.u32 %s8804_s14, 4  ;;  %p8643_p6 = scmp.ne.s32.totalorder %s10360_s8, %s8642_s5  ;;  %s100_s4 = int_to_ptr.vmem [resolvable:$true] %s99_s4 }
  0x8a   :  { %p8646_p7 = scmp.lt.u32.totalorder %s8642_s5, %s10360_s8 }
  0x8c   :  { %p8648_p8 = pnand %p8646_p7, %p8643_p6 }
  0x8e   :  { %8651 = shalt.err (!%p8648_p8)
}
  0x8f   :  { %s8652_s1 = scalar_lea.vmem %s100_s4, 1024  ;;  %p8657_p10 = scmp.lt.s32.totalorder %s100_s4, %s100_s4 }
  0x90   :  { %p8653_p9 = scmp.ne.s32.totalorder %s100_s4, %s8652_s1  ;;  %p8658_p11 = scmp.lt.s32.totalorder %s8652_s1, %s8652_s1 }
  0x92   :  { %p8659_p12 = por %p8658_p11, %p8657_p10 }
  0x94   :  { %p8660_p13 = pnand %p8659_p12, %p8653_p9 }
  0x96   :  { %8663 = shalt.err (!%p8660_p13)
}
  0x97   :  { %s8805_s24 = smov 256   ;;  %s8806_s20 = smov 16  }
  0x98   :  { %105 = dma.hbm_to_vmem [thread:$0]  %s10360_s8, 1024, %s100_s4, [#allocation12], %s8805_s24, %s8805_s24, %s8806_s20  }
  0x99   :  { %s8807_s26 = smov [#allocation16]   ;;  %s8808_s29 = smov [#allocation19]  }
  0x9a   :  { %s126_s19 = sshll.u32 %s8807_s26, 4  ;;  %s152_s2 = sshll.u32 %s8808_s29, 4  ;;  %s127_s19 = int_to_ptr.vmem [resolvable:$true] %s126_s19  ;;  %s153_s2 = int_to_ptr.vmem [resolvable:$true] %s152_s2 }
  0x9b   :  { %s8664_s28 = scalar_lea.hbm %s10364_s12, 16 }
  0x9c   :  { %p8665_p0 = scmp.ne.s32.totalorder %s10364_s12, %s8664_s28  ;;  %p8668_p1 = scmp.lt.u32.totalorder %s8664_s28, %s10364_s12 }
  0x9e   :  { %p8670_p2 = pnand %p8668_p1, %p8665_p0 }
  0xa0   :  { %8673 = shalt.err (!%p8670_p2)
}
  0xa1   :  { %s8674_s8 = scalar_lea.vmem %s127_s19, 16  ;;  %s8678_s4 = scalar_lea.vmem %s127_s19, 32 }
  0xa2   :  { %p8675_p3 = scmp.ne.s32.totalorder %s127_s19, %s8674_s8  ;;  %p8679_p4 = scmp.lt.s32.totalorder %s127_s19, %s127_s19 }
  0xa3   :  { %p8680_p5 = scmp.lt.s32.totalorder %s8678_s4, %s8674_s8 }
  0xa5   :  { %p8681_p6 = por %p8680_p5, %p8679_p4 }
  0xa7   :  { %p8682_p7 = pnand %p8681_p6, %p8675_p3 }
  0xa9   :  { %8685 = shalt.err (!%p8682_p7)
}
  0xaa   :  { %129 = dma.hbm_to_vmem [thread:$0]  %s10364_s12, 16, %s127_s19, [#allocation15]  }
  0xab   :  { %s8686_s20 = scalar_lea.hbm %s10369_s17, 32 }
  0xac   :  { %p8687_p8 = scmp.ne.s32.totalorder %s10369_s17, %s8686_s20  ;;  %p8690_p9 = scmp.lt.u32.totalorder %s8686_s20, %s10369_s17 }
  0xae   :  { %p8692_p10 = pnand %p8690_p9, %p8687_p8 }
  0xb0   :  { %8695 = shalt.err (!%p8692_p10)
}
  0xb1   :  { %s8696_s27 = scalar_lea.vmem %s153_s2, 32  ;;  %p8701_p12 = scmp.lt.s32.totalorder %s153_s2, %s153_s2 }
  0xb2   :  { %p8697_p11 = scmp.ne.s32.totalorder %s153_s2, %s8696_s27  ;;  %p8702_p13 = scmp.lt.s32.totalorder %s8696_s27, %s8696_s27 }
  0xb4   :  { %p8703_p0 = por %p8702_p13, %p8701_p12 }
  0xb6   :  { %p8704_p1 = pnand %p8703_p0, %p8697_p11 }
  0xb8   :  { %8707 = shalt.err (!%p8704_p1)
}
  0xb9   :  { %155 = dma.hbm_to_vmem [thread:$0]  %s10369_s17, 32, %s153_s2, [#allocation18]  }
  0xba   :  { %s8809_s14 = smov [#allocation20]   ;;  %s8708_s9 = scalar_lea.hbm %s10370_s18, 32 }
  0xbb   :  { %s162_s28 = sshll.u32 %s8809_s14, 4  ;;  %p8709_p2 = scmp.ne.s32.totalorder %s10370_s18, %s8708_s9  ;;  %s163_s28 = int_to_ptr.vmem [resolvable:$true] %s162_s28 }
  0xbc   :  { %p8712_p3 = scmp.lt.u32.totalorder %s8708_s9, %s10370_s18 }
  0xbe   :  { %p8714_p4 = pnand %p8712_p3, %p8709_p2 }
  0xc0   :  { %8717 = shalt.err (!%p8714_p4)
}
  0xc1   :  { %s8718_s25 = scalar_lea.vmem %s163_s28, 32  ;;  %p8723_p6 = scmp.lt.s32.totalorder %s163_s28, %s163_s28 }
  0xc2   :  { %p8719_p5 = scmp.ne.s32.totalorder %s163_s28, %s8718_s25  ;;  %p8724_p7 = scmp.lt.s32.totalorder %s8718_s25, %s8718_s25 }
  0xc4   :  { %p8725_p8 = por %p8724_p7, %p8723_p6 }
  0xc6   :  { %p8726_p9 = pnand %p8725_p8, %p8719_p5 }
  0xc8   :  { %8729 = shalt.err (!%p8726_p9)
}
  0xc9   :  { %165 = dma.hbm_to_vmem [thread:$0]  %s10370_s18, 32, %s163_s28, [#allocation21]  }
  0xca   :  { %8774 = dma.done.wait [#allocation6], 4800  }
  0xcb   :  { %8775 = vsyncadd [#allocation6], 4294962496 }
  0xcc   :  { %8776 = dma.done.wait [#allocation9], 45056  }
  0xcd   :  { %8777 = vsyncadd [#allocation9], 4294922240 }
  0xce   :  { %8778 = dma.done.wait [#allocation12], 1792  }
  0xcf   :  { %8779 = vsyncadd [#allocation12], 4294965504 }
  0xd0   :  { %8780 = dma.done.wait [#allocation15], 48  }
  0xd1   :  { %8781 = vsyncadd [#allocation15], 4294967248 }
  0xd2   :  { %8782 = dma.done.wait [#allocation18], 160  }
  0xd3   :  { %8783 = vsyncadd [#allocation18], 4294967136 }
  0xd4   :  { %8784 = dma.done.wait [#allocation21], 32  }
  0xd5   :  { %8785 = vsyncadd [#allocation21], 4294967264  ;;  %v8810_v1 = vmov 0   ;;  %v7908_v2 = vld [vmem:[#allocation5 + $0x4] ss:$12 sps:$4 sm:$0xff]   ;;  %s10393_s24 = sld [smem:[#allocation33_spill]] }
  0xd6   :  { %559 = vmatprep.subr.bf16.mxu1 %v8810_v1  ;;  %v7910_v3 = vld [vmem:[#allocation5 + $0x8] ss:$12 sps:$4 sm:$0xff]   ;;  %498 = vmatprep.subr.bf16.mxu0 %v7908_v2  ;;  %v7911_v4 = vld [vmem:[#allocation5] ss:$12 sps:$4 sm:$0xff]   ;;  %v7915_v7 = vld [vmem:[#allocation5 + $0x18] ss:$12 sps:$4 sm:$0xff]  }
  0xd7   :  { %560 = vmatpush1.bf16.msra.mxu1 %v7910_v3  ;;  %v7912_v5 = vld [vmem:[#allocation5 + $0x1c] ss:$12 sps:$4 sm:$0xff]   ;;  %499 = vmatpush1.bf16.msra.mxu0 %v7911_v4  ;;  %v7914_v6 = vld [vmem:[#allocation5 + $0x20] ss:$12 sps:$4 sm:$0xff]   ;;  %v7918_v9 = vld [vmem:[#allocation5 + $0x38] ss:$12 sps:$4 sm:$0xff]  }
  0xd8   :  { %561 = vmatprep.subr.bf16.mxu1 %v8810_v1  ;;  %500 = vmatprep.subr.bf16.mxu0 %v7912_v5  ;;  %v7916_v8 = vld [vmem:[#allocation5 + $0x34] ss:$12 sps:$4 sm:$0xff]   ;;  %v7919_v10 = vld [vmem:[#allocation5 + $0x30] ss:$12 sps:$4 sm:$0xff]   ;;  %v7920_v11 = vld [vmem:[#allocation5 + $0x4c] ss:$12 sps:$4 sm:$0xff]  }
  0xd9   :  { %v7922_v12 = vld [vmem:[#allocation5 + $0x50] ss:$12 sps:$4 sm:$0xff]   ;;  %v7923_v13 = vld [vmem:[#allocation5 + $0x48] ss:$12 sps:$4 sm:$0xff]   ;;  %v7927_v16 = vld [vmem:[#allocation5 + $0x60] ss:$12 sps:$4 sm:$0xff]  }
  0xda   :  { %v7924_v14 = vld [vmem:[#allocation5 + $0x64] ss:$12 sps:$4 sm:$0xff]   ;;  %v7926_v15 = vld [vmem:[#allocation5 + $0x68] ss:$12 sps:$4 sm:$0xff]   ;;  %v7930_v18 = vld [vmem:[#allocation5 + $0x80] ss:$12 sps:$4 sm:$0xff]  }
  0xdb   :  { %562 = vmatpush1.bf16.msra.mxu1 %v7914_v6  ;;  %501 = vmatpush1.bf16.msra.mxu0 %v7915_v7  ;;  %v7928_v17 = vld [vmem:[#allocation5 + $0x7c] ss:$12 sps:$4 sm:$0xff]   ;;  %v7931_v19 = vld [vmem:[#allocation5 + $0x78] ss:$12 sps:$4 sm:$0xff]   ;;  %v7932_v20 = vld [vmem:[#allocation5 + $0x94] ss:$12 sps:$4 sm:$0xff]  }
  0xdc   :  { %563 = vmatprep.subr.bf16.mxu1 %v8810_v1  ;;  %502 = vmatprep.subr.bf16.mxu0 %v7916_v8  ;;  %v7934_v21 = vld [vmem:[#allocation5 + $0x98] ss:$12 sps:$4 sm:$0xff]   ;;  %v7935_v22 = vld [vmem:[#allocation5 + $0x90] ss:$12 sps:$4 sm:$0xff]   ;;  %v7939_v25 = vld [vmem:[#allocation5 + $0xa8] ss:$12 sps:$4 sm:$0xff]  }
  0xdd   :  { %v7936_v23 = vld [vmem:[#allocation5 + $0xac] ss:$12 sps:$4 sm:$0xff]   ;;  %v7938_v24 = vld [vmem:[#allocation5 + $0xb0] ss:$12 sps:$4 sm:$0xff]   ;;  %vm478_vm0 = vcmask 588800   ;;  %v252_v37 = vld [vmem:[#allocation5 + $0x120] sm:$0xff] }
  0xde   :  { %v7940_v26 = vld [vmem:[#allocation5 + $0xc4] ss:$12 sps:$4 sm:$0xff]   ;;  %v7961_v27 = vld [vmem:[%s10393_s24 + $0x4] ss:$8 sps:$4 sm:$0xff]   ;;  %v7957_v40 = vld [vmem:[#allocation5 + $0x128] ss:$0 sps:$4 sm:$0xff]   ;;  %v6699_v41 = vcombine.high %v252_v37, %v252_v37  ;;  %v6698_v42 = vcombine.low %v252_v37, %v252_v37 }
  0xdf   :  { %564 = vmatpush1.bf16.msra.mxu1 %v7918_v9  ;;  %503 = vmatpush1.bf16.msra.mxu0 %v7919_v10  ;;  %v7942_v28 = vld [vmem:[#allocation5 + $0xc8] ss:$12 sps:$4 sm:$0xff]   ;;  %v7943_v29 = vld [vmem:[#allocation5 + $0xc0] ss:$12 sps:$4 sm:$0xff]   ;;  %v7947_v32 = vld [vmem:[#allocation5 + $0xd8] ss:$12 sps:$4 sm:$0xff]  }
  0xe0   :  { %565 = vmatprep.subr.bf16.mxu1 %v8810_v1  ;;  %504 = vmatprep.subr.bf16.mxu0 %v7920_v11  ;;  %v7944_v30 = vld [vmem:[#allocation5 + $0xdc] ss:$12 sps:$4 sm:$0xff]   ;;  %v7946_v31 = vld [vmem:[#allocation5 + $0xe0] ss:$12 sps:$4 sm:$0xff]   ;;  %v7950_v34 = vld [vmem:[#allocation5 + $0xf8] ss:$12 sps:$4 sm:$0xff]  }
  0xe1   :  { %6705 = vmatprep.mubr.msk.bf16.mxu1 %vm478_vm0, %v7961_v27  ;;  %6702 = vmatprep.mubr.msk.bf16.mxu0 %vm478_vm0, %v7961_v27  ;;  %v7948_v33 = vld [vmem:[#allocation5 + $0xf4] ss:$12 sps:$4 sm:$0xff]   ;;  %v7951_v35 = vld [vmem:[#allocation5 + $0xf0] ss:$12 sps:$4 sm:$0xff]   ;;  %v7952_v36 = vld [vmem:[#allocation5 + $0x10c] ss:$12 sps:$4 sm:$0xff]  }
  0xe2   :  { %v7954_v38 = vld [vmem:[#allocation5 + $0x110] ss:$12 sps:$4 sm:$0xff]   ;;  %v7955_v39 = vld [vmem:[#allocation5 + $0x108] ss:$12 sps:$4 sm:$0xff]   ;;  %vm488_vm1 = vcmask 1043456   ;;  %s10394_s0 = sld [smem:[#allocation37_spill]] }
  0xe3   :  { %566 = vmatpush1.bf16.msra.mxu1 %v7922_v12  ;;  %505 = vmatpush1.bf16.msra.mxu0 %v7923_v13  ;;  %v496_v43 = vsel %vm488_vm1, %v7957_v40, 0  ;;  %v7959_v44 = vld [vmem:[%s10393_s24] ss:$8 sps:$4 sm:$0xff]   ;;  %v490_v45 = vsel %vm488_vm1, %v6698_v42, 0  ;;  %v7962_v46 = vld [vmem:[%s10393_s24 + $0x14] ss:$8 sps:$4 sm:$0xff]  }
  0xe4   :  { %567 = vmatprep.subr.bf16.mxu1 %v8810_v1  ;;  %506 = vmatprep.subr.bf16.mxu0 %v7924_v14  ;;  %v203_v47 = vld [vmem:[%s10393_s24 + $0x20] sm:$0x33]  ;;  %v7964_v48 = vld [vmem:[%s10393_s24 + $0x10] ss:$8 sps:$4 sm:$0xff]   ;;  %v8811_v54 = vmov 0.0|0.0   ;;  %vm8812_vm2 = vmmov 0  }
  0xe5   :  { %v6661_v49 = vcombine.high %v203_v47, %v203_v47  ;;  %v6660_v50 = vcombine.low %v203_v47, %v203_v47  ;;  %vm751_vm3 = vcmask 1040384   ;;  %vm912_vm4 = vcmask 130048   ;;  %s10395_s17 = sld [smem:[#allocation39_spill]]  ;;  %s8816_s24 = smov [#allocation23]  }
  0xe6   :  { %vm1311_vm5 = vcmask 1045504   ;;  %vm3303_vm6 = vcmask 261120   ;;  %vm4706_vm7 = vcmask 1041408   ;;  %vm6149_vm8 = vcmask 31744   ;;  %s6636_s20 = sshll.u32 %s8816_s24, 4  ;;  %s6637_s20 = int_to_ptr.vmem [resolvable:$true] %s6636_s20 }
  0xe7   :  { %568 = vmatpush1.bf16.msra.mxu1 %v7926_v15  ;;  %507 = vmatpush1.bf16.msra.mxu0 %v7927_v16 }
  0xe8   :  { %569 = vmatprep.subr.bf16.mxu1 %v8810_v1  ;;  %508 = vmatprep.subr.bf16.mxu0 %v7928_v17  ;;  %v647_v51 = vld [vmem:[%s10394_s0 + $0x100] sm:$0xff]  ;;  %v648_v52 = vld [vmem:[%s10394_s0 + $0x108] sm:$0xff]  ;;  %v649_v61 = vld [vmem:[%s10394_s0 + $0x110] sm:$0xff] }
  0xe9   :  { %v7729_v53 = vpack.c.bf16 %v648_v52, %v647_v51  ;;  %v631_v55 = vld [vmem:[%s10394_s0 + $0x80] sm:$0xff]  ;;  %v632_v56 = vld [vmem:[%s10394_s0 + $0x88] sm:$0xff]  ;;  %v650_v62 = vld [vmem:[%s10394_s0 + $0x118] sm:$0xff] }
  0xea   :  { %v7696_v57 = vpack.c.bf16 %v632_v56, %v631_v55  ;;  %v615_v58 = vld [vmem:[%s10394_s0] sm:$0xff]  ;;  %v616_v59 = vld [vmem:[%s10394_s0 + $0x8] sm:$0xff]  ;;  %v7732_v63 = vpack.c.bf16 %v650_v62, %v649_v61  ;;  %v633_v0 = vld [vmem:[%s10394_s0 + $0x90] sm:$0xff] }
  0xeb   :  { %570 = vmatpush1.bf16.msra.mxu1 %v7930_v18  ;;  %509 = vmatpush1.bf16.msra.mxu0 %v7931_v19  ;;  %v7698_v60 = vpack.c.bf16 %v616_v59, %v615_v58  ;;  %v634_v2 = vld [vmem:[%s10394_s0 + $0x98] sm:$0xff]  ;;  %v617_v4 = vld [vmem:[%s10394_s0 + $0x10] sm:$0xff]  ;;  %v651_v7 = vld [vmem:[%s10394_s0 + $0x120] sm:$0xff] }
  0xec   :  { %571 = vmatprep.subr.bf16.mxu1 %v8810_v1  ;;  %510 = vmatprep.subr.bf16.mxu0 %v7932_v20  ;;  %v7700_v3 = vpack.c.bf16 %v634_v2, %v633_v0  ;;  %v618_v5 = vld [vmem:[%s10394_s0 + $0x18] sm:$0xff]  ;;  %v652_v8 = vld [vmem:[%s10394_s0 + $0x128] sm:$0xff]  ;;  %v635_v10 = vld [vmem:[%s10394_s0 + $0xa0] sm:$0xff] }
  0xed   :  { %v7702_v6 = vpack.c.bf16 %v618_v5, %v617_v4  ;;  %v7735_v9 = vpack.c.bf16 %v652_v8, %v651_v7  ;;  %v636_v11 = vld [vmem:[%s10394_s0 + $0xa8] sm:$0xff]  ;;  %v619_v13 = vld [vmem:[%s10394_s0 + $0x20] sm:$0xff]  ;;  %v653_v16 = vld [vmem:[%s10394_s0 + $0x130] sm:$0xff] }
  0xee   :  { %v7704_v12 = vpack.c.bf16 %v636_v11, %v635_v10  ;;  %v620_v14 = vld [vmem:[%s10394_s0 + $0x28] sm:$0xff]  ;;  %v654_v17 = vld [vmem:[%s10394_s0 + $0x138] sm:$0xff]  ;;  %v637_v19 = vld [vmem:[%s10394_s0 + $0xb0] sm:$0xff] }
  0xef   :  { %572 = vmatpush1.bf16.msra.mxu1 %v7934_v21  ;;  %511 = vmatpush1.bf16.msra.mxu0 %v7935_v22  ;;  %v7706_v15 = vpack.c.bf16 %v620_v14, %v619_v13  ;;  %v7738_v18 = vpack.c.bf16 %v654_v17, %v653_v16  ;;  %v638_v20 = vld [vmem:[%s10394_s0 + $0xb8] sm:$0xff]  ;;  %v621_v22 = vld [vmem:[%s10394_s0 + $0x30] sm:$0xff]  ;;  %v644_v47 = vld [vmem:[%s10394_s0 + $0xe8] sm:$0xff] }
  0xf0   :  { %573 = vmatprep.subr.bf16.mxu1 %v8810_v1  ;;  %512 = vmatprep.subr.bf16.mxu0 %v7936_v23  ;;  %v7708_v21 = vpack.c.bf16 %v638_v20, %v637_v19  ;;  %v622_v23 = vld [vmem:[%s10394_s0 + $0x38] sm:$0xff]  ;;  %v641_v37 = vld [vmem:[%s10394_s0 + $0xd0] sm:$0xff] }
  0xf1   :  { %v625_v40 = vld [vmem:[%s10394_s0 + $0x50] sm:$0xff]  ;;  %v646_v56 = vld [vmem:[%s10394_s0 + $0xf8] sm:$0xff] }
  0xf2   :  { %v661_v51 = vld [vmem:[%s10394_s0 + $0x170] sm:$0xff]  ;;  %v630_v61 = vld [vmem:[%s10394_s0 + $0x78] sm:$0xff] }
  0xf3   :  { %574 = vmatpush1.bf16.msra.mxu1 %v7938_v24  ;;  %513 = vmatpush1.bf16.msra.mxu0 %v7939_v25  ;;  %v7710_v24 = vpack.c.bf16 %v622_v23, %v621_v22  ;;  %v655_v25 = vld [vmem:[%s10394_s0 + $0x140] sm:$0xff]  ;;  %v645_v55 = vld [vmem:[%s10394_s0 + $0xf0] sm:$0xff] }
  0xf4   :  { %575 = vmatprep.subr.bf16.mxu1 %v8810_v1  ;;  %514 = vmatprep.subr.bf16.mxu0 %v7940_v26  ;;  %v656_v26 = vld [vmem:[%s10394_s0 + $0x148] sm:$0xff]  ;;  %v7724_v59 = vpack.c.bf16 %v646_v56, %v645_v55 }
  0xf5   :  { %v7741_v27 = vpack.c.bf16 %v656_v26, %v655_v25 }
  0xf7   :  { %576 = vmatpush1.bf16.msra.mxu1 %v7942_v28  ;;  %515 = vmatpush1.bf16.msra.mxu0 %v7943_v29  ;;  %v639_v28 = vld [vmem:[%s10394_s0 + $0xc0] sm:$0xff]  ;;  %v640_v29 = vld [vmem:[%s10394_s0 + $0xc8] sm:$0xff] }
  0xf8   :  { %577 = vmatprep.subr.bf16.mxu1 %v8810_v1  ;;  %516 = vmatprep.subr.bf16.mxu0 %v7944_v30  ;;  %v7712_v30 = vpack.c.bf16 %v640_v29, %v639_v28 }
  0xfb   :  { %578 = vmatpush1.bf16.msra.mxu1 %v7946_v31  ;;  %517 = vmatpush1.bf16.msra.mxu0 %v7947_v32  ;;  %v623_v31 = vld [vmem:[%s10394_s0 + $0x40] sm:$0xff]  ;;  %v624_v32 = vld [vmem:[%s10394_s0 + $0x48] sm:$0xff] }
  0xfc   :  { %579 = vmatprep.subr.bf16.mxu1 %v8810_v1  ;;  %518 = vmatprep.subr.bf16.mxu0 %v7948_v33  ;;  %v7714_v33 = vpack.c.bf16 %v624_v32, %v623_v31 }
  0xff   :  { %580 = vmatpush1.bf16.msra.mxu1 %v7950_v34  ;;  %519 = vmatpush1.bf16.msra.mxu0 %v7951_v35  ;;  %v657_v34 = vld [vmem:[%s10394_s0 + $0x150] sm:$0xff]  ;;  %v658_v35 = vld [vmem:[%s10394_s0 + $0x158] sm:$0xff] }
 0x100   :  { %581 = vmatprep.subr.bf16.mxu1 %v8810_v1  ;;  %520 = vmatprep.subr.bf16.mxu0 %v7952_v36  ;;  %v7744_v36 = vpack.c.bf16 %v658_v35, %v657_v34 }
 0x103   :  { %582 = vmatpush1.bf16.msra.mxu1 %v7954_v38  ;;  %521 = vmatpush1.bf16.msra.mxu0 %v7955_v39  ;;  %v642_v38 = vld [vmem:[%s10394_s0 + $0xd8] sm:$0xff] }
 0x104   :  { %583 = vmatprep.subr.bf16.mxu1 %v8810_v1  ;;  %6701 = vmatprep.subr.msk.bf16.mxu0 %vm488_vm1, %v6699_v41  ;;  %v7716_v39 = vpack.c.bf16 %v642_v38, %v641_v37  ;;  %v626_v41 = vld [vmem:[%s10394_s0 + $0x58] sm:$0xff] }
 0x105   :  { %v7718_v42 = vpack.c.bf16 %v626_v41, %v625_v40 }
 0x107   :  { %584 = vmatpush1.bf16.msra.mxu1 %v496_v43  ;;  %523 = vmatpush1.bf16.msra.mxu0 %v490_v45  ;;  %v659_v43 = vld [vmem:[%s10394_s0 + $0x160] sm:$0xff] }
 0x108   :  { %7728 = vmatprep.subr.bf16.mxu1 %v8811_v54  ;;  %7697 = vmatprep.subr.bf16.mxu0 %v7696_v57  ;;  %v8813_v57 = vmov 0.0  }
 0x10a   :  { %592 = vmatmul.mubr.bf16.vlgmr.msra.gmra.mrb[0].mxu1 %v7959_v44  ;;  %531 = vmatmul.mubr.bf16.vlgmr.msra.gmra.mrb[0].mxu0 %v7959_v44  ;;  %v660_v44 = vld [vmem:[%s10394_s0 + $0x168] sm:$0xff] }
 0x10b   :  { %6706 = vmatprep.mubr.msk.bf16.mxu1 %vm478_vm0, %v7962_v46  ;;  %6703 = vmatprep.mubr.msk.bf16.mxu0 %vm478_vm0, %v7962_v46  ;;  %v7747_v45 = vpack.c.bf16 %v660_v44, %v659_v43  ;;  %v643_v46 = vld [vmem:[%s10394_s0 + $0xe0] sm:$0xff] }
 0x10c   :  { %7730 = vmatpush3.bf16.msra.mxu1 %v7729_v53  ;;  %7699 = vmatpush3.bf16.msra.mxu0 %v7698_v60  ;;  %v662_v53 = vld [vmem:[%s10394_s0 + $0x178] sm:$0xff]  ;;  %v629_v60 = vld [vmem:[%s10394_s0 + $0x70] sm:$0xff] }
 0x10d   :  { %7731 = vmatprep.subr.bf16.mxu1 %v8811_v54  ;;  %7701 = vmatprep.subr.bf16.mxu0 %v7700_v3  ;;  %v7750_v58 = vpack.c.bf16 %v662_v53, %v661_v51  ;;  %v7726_v62 = vpack.c.bf16 %v630_v61, %v629_v60 }
 0x110   :  { %7733 = vmatpush3.bf16.msra.mxu1 %v7732_v63  ;;  %7703 = vmatpush3.bf16.msra.mxu0 %v7702_v6 }
 0x111   :  { %7734 = vmatprep.subr.bf16.mxu1 %v8811_v54  ;;  %7705 = vmatprep.subr.bf16.mxu0 %v7704_v12 }
 0x112   :  { %600 = vmatmul.mubr.bf16.gmra.mrb[4].mxu1 %v7964_v48  ;;  %541 = vmatmul.mubr.bf16.gmra.mrb[4].mxu0 %v7964_v48  ;;  %v7720_v48 = vpack.c.bf16 %v644_v47, %v643_v46 }
 0x113   :  { %6707 = vmatprep.mubr.msk.bf16.mxu1 %vm478_vm0, %v6661_v49  ;;  %6704 = vmatprep.mubr.msk.bf16.mxu0 %vm478_vm0, %v6661_v49  ;;  %v627_v49 = vld [vmem:[%s10394_s0 + $0x60] sm:$0xff] }
 0x114   :  { %7736 = vmatpush3.bf16.msra.mxu1 %v7735_v9  ;;  %7707 = vmatpush3.bf16.msra.mxu0 %v7706_v15 }
 0x115   :  { %7737 = vmatprep.subr.bf16.mxu1 %v8811_v54  ;;  %7709 = vmatprep.subr.bf16.mxu0 %v7708_v21 }
 0x118   :  { %7739 = vmatpush3.bf16.msra.mxu1 %v7738_v18  ;;  %7711 = vmatpush3.bf16.msra.mxu0 %v7710_v24 }
 0x119   :  { %7740 = vmatprep.subr.bf16.mxu1 %v8811_v54  ;;  %7713 = vmatprep.subr.bf16.mxu0 %v7712_v30 }
 0x11a   :  { %608 = vmatmul.mubr.bf16.gmra.mrb[8].mxu1 %v6660_v50  ;;  %551 = vmatmul.mubr.bf16.gmra.mrb[8].mxu0 %v6660_v50  ;;  %v628_v50 = vld [vmem:[%s10394_s0 + $0x68] sm:$0xff] }
 0x11b   :  { %v7722_v52 = vpack.c.bf16 %v628_v50, %v627_v49  ;;  %7640 = vmatprep.mubr.msk.f32.mxu1 %vm8812_vm2, %v8813_v57 }
 0x11c   :  { %7742 = vmatpush3.bf16.msra.mxu1 %v7741_v27  ;;  %7715 = vmatpush3.bf16.msra.mxu0 %v7714_v33 }
 0x11d   :  { %7743 = vmatprep.subr.bf16.mxu1 %v8811_v54  ;;  %7717 = vmatprep.subr.bf16.mxu0 %v7716_v39 }
 0x120   :  { %7745 = vmatpush3.bf16.msra.mxu1 %v7744_v36  ;;  %7719 = vmatpush3.bf16.msra.mxu0 %v7718_v42 }
 0x121   :  { %7746 = vmatprep.subr.bf16.mxu1 %v8811_v54  ;;  %7721 = vmatprep.subr.bf16.mxu0 %v7720_v48 }
 0x124   :  { %7748 = vmatpush3.bf16.msra.mxu1 %v7747_v45  ;;  %7723 = vmatpush3.bf16.msra.mxu0 %v7722_v52 }
 0x125   :  { %7749 = vmatprep.subr.bf16.mxu1 %v8811_v54  ;;  %7725 = vmatprep.subr.bf16.mxu0 %v7724_v59 }
 0x128   :  { %7751 = vmatpush3.bf16.msra.mxu1 %v7750_v58  ;;  %7727 = vmatpush3.bf16.msra.mxu0 %v7726_v62 }
 0x1dd   :  { %v9246_v63 = vpop.f32.mrb[0].mxu1  ;;  %v9248_v0 = vpop.f32.mrb[0].mxu0 }
 0x1de   :  { %v705_v2 = vmul.f32 %v9246_v63, %v9246_v63  ;;  %v595_v3 = vpop.f32.mrb[1].mxu1  ;;  %v9252_v4 = vpop.f32.mrb[1].mxu0  ;;  %v703_v10 = vmul.f32 %v9248_v0, %v9248_v0 }
 0x1df   :  { %v9254_v5 = vpop.f32.mrb[2].mxu1  ;;  %v9256_v6 = vpop.f32.mrb[2].mxu0  ;;  %v704_v14 = vmul.f32 %v9252_v4, %v9252_v4 }
 0x1e0   :  { %v692_v7 = vadd.f32 %v9254_v5, %v9246_v63  ;;  %v708_v8 = vmul.f32 %v9254_v5, %v9254_v5  ;;  %v598_v9 = vpop.f32.mrb[3].mxu1  ;;  %v670_v11 = vadd.f32 %v9256_v6, %v9248_v0  ;;  %v706_v12 = vmul.f32 %v9256_v6, %v9256_v6  ;;  %v9268_v13 = vpop.f32.mrb[3].mxu0 }
 0x1e1   :  { %v681_v15 = vadd.f32 %v9268_v13, %v9252_v4  ;;  %v707_v16 = vmul.f32 %v9268_v13, %v9268_v13 }
 0x1e2   :  { %v740_v17 = vadd.f32 %v708_v8, %v705_v2  ;;  %v718_v18 = vadd.f32 %v706_v12, %v703_v10 }
 0x1e3   :  { %v729_v19 = vadd.f32 %v707_v16, %v704_v14 }
 0x1e5   :  { %v9276_v20 = vpop.f32.mrb[4].mxu1  ;;  %v9281_v23 = vpop.f32.mrb[4].mxu0 }
 0x1e6   :  { %v693_v21 = vadd.f32 %v692_v7, %v9276_v20  ;;  %v711_v22 = vmul.f32 %v9276_v20, %v9276_v20  ;;  %v603_v24 = vpop.f32.mrb[5].mxu1  ;;  %v671_v25 = vadd.f32 %v670_v11, %v9281_v23  ;;  %v709_v26 = vmul.f32 %v9281_v23, %v9281_v23  ;;  %v9286_v27 = vpop.f32.mrb[5].mxu0 }
 0x1e7   :  { %v9288_v28 = vpop.f32.mrb[6].mxu1  ;;  %v682_v30 = vadd.f32 %v681_v15, %v9286_v27  ;;  %v710_v31 = vmul.f32 %v9286_v27, %v9286_v27  ;;  %v9294_v33 = vpop.f32.mrb[6].mxu0 }
 0x1e8   :  { %v741_v29 = vadd.f32 %v740_v17, %v711_v22  ;;  %v694_v32 = vadd.f32 %v693_v21, %v9288_v28  ;;  %v606_v34 = vpop.f32.mrb[7].mxu1  ;;  %v719_v35 = vadd.f32 %v718_v18, %v709_v26  ;;  %v714_v36 = vmul.f32 %v9288_v28, %v9288_v28  ;;  %v9301_v39 = vpop.f32.mrb[7].mxu0 }
 0x1e9   :  { %v672_v37 = vadd.f32 %v671_v25, %v9294_v33  ;;  %v712_v38 = vmul.f32 %v9294_v33, %v9294_v33  ;;  %v730_v40 = vadd.f32 %v729_v19, %v710_v31  ;;  %v683_v41 = vadd.f32 %v682_v30, %v9301_v39 }
 0x1ea   :  { %v713_v42 = vmul.f32 %v9301_v39, %v9301_v39  ;;  %v742_v43 = vadd.f32 %v741_v29, %v714_v36 }
 0x1eb   :  { %v720_v44 = vadd.f32 %v719_v35, %v712_v38 }
 0x1ec   :  { %v731_v45 = vadd.f32 %v730_v40, %v713_v42 }
 0x1ed   :  { %v9306_v46 = vpop.f32.mrb[8].mxu1  ;;  %v9312_v49 = vpop.f32.mrb[8].mxu0 }
 0x1ee   :  { %v695_v47 = vsel %vm488_vm1, %v9306_v46, 0.0  ;;  %v717_v48 = vmul.f32 %v9306_v46, %v9306_v46  ;;  %v611_v50 = vpop.f32.mrb[9].mxu1  ;;  %v673_v52 = vsel %vm488_vm1, %v9312_v49, 0.0  ;;  %v715_v53 = vmul.f32 %v9312_v49, %v9312_v49  ;;  %v9318_v55 = vpop.f32.mrb[9].mxu0 }
 0x1ef   :  { %v696_v51 = vadd.f32 %v695_v47, %v694_v32  ;;  %v612_v56 = vpop.f32.mrb[10].mxu1  ;;  %v674_v59 = vadd.f32 %v673_v52, %v672_v37  ;;  %v684_v60 = vsel %vm488_vm1, %v9318_v55, 0.0  ;;  %v716_v61 = vmul.f32 %v9318_v55, %v9318_v55  ;;  %v556_v62 = vpop.f32.mrb[10].mxu0 }
 0x1f0   :  { %v743_v58 = vsel %vm488_vm1, %v717_v48, 0.0  ;;  %v613_v2 = vpop.f32.mrb[11].mxu1  ;;  %v721_v8 = vsel %vm488_vm1, %v715_v53, 0.0  ;;  %v685_v9 = vadd.f32 %v684_v60, %v683_v41  ;;  %v557_v10 = vpop.f32.mrb[11].mxu0 }
 0x1f1   :  { %v697_v3 = vrot.slane %v696_v51, 4  ;;  %v744_v7 = vadd.f32 %v743_v58, %v742_v43  ;;  %v675_v11 = vrot.slane %v674_v59, 4  ;;  %v722_v12 = vadd.f32 %v721_v8, %v720_v44  ;;  %v666_v10 = vld [vmem:[#allocation11 + $0x18] sm:$0xff] }
 0x1f2   :  { %v732_v14 = vsel %vm488_vm1, %v716_v61, 0.0  ;;  %v686_v17 = vrot.slane %v685_v9, 4 }
 0x1f3   :  { %v698_v15 = vadd.f32 %v697_v3, %v696_v51  ;;  %v745_v16 = vrot.slane %v744_v7, 4  ;;  %v733_v18 = vadd.f32 %v732_v14, %v731_v45  ;;  %v676_v19 = vadd.f32 %v675_v11, %v674_v59  ;;  %v664_v3 = vld [vmem:[#allocation11 + $0x8] sm:$0xff] }
 0x1f4   :  { %v723_v21 = vrot.slane %v722_v12, 4  ;;  %v687_v25 = vadd.f32 %v686_v17, %v685_v9  ;;  %v663_v9 = vld [vmem:[#allocation11] sm:$0xff] }
 0x1f5   :  { %v699_v22 = vrot.slane %v698_v15, 2  ;;  %v746_v24 = vadd.f32 %v745_v16, %v744_v7  ;;  %v734_v26 = vrot.slane %v733_v18, 4  ;;  %v677_v29 = vrot.slane %v676_v19, 2  ;;  %v667_v7 = vld [vmem:[#allocation11 + $0x20] sm:$0xff] }
 0x1f6   :  { %v724_v30 = vadd.f32 %v723_v21, %v722_v12  ;;  %v688_v34 = vrot.slane %v687_v25, 2  ;;  %v7752_v8 = vpack.c.bf16 %v667_v7, %v664_v3  ;;  %v7754_v11 = vpack.c.bf16 %v666_v10, %v663_v9  ;;  %v7999_v3 = vld [vmem:[#allocation8 + $0xa4] ss:$8 sps:$4 sm:$0xff]   ;;  %v7997_v7 = vld [vmem:[#allocation8 + $0xa0] ss:$8 sps:$4 sm:$0xff]  }
 0x1f7   :  { %v700_v31 = vadd.f32 %v699_v22, %v698_v15  ;;  %v747_v32 = vrot.slane %v746_v24, 2  ;;  %v735_v35 = vadd.f32 %v734_v26, %v733_v18  ;;  %v678_v36 = vadd.f32 %v677_v29, %v676_v19  ;;  %v8000_v9 = vld [vmem:[#allocation8 + $0xb0] ss:$8 sps:$4 sm:$0xff]   ;;  %v8005_v10 = vld [vmem:[#allocation8 + $0xc4] ss:$8 sps:$4 sm:$0xff]  }
 0x1f8   :  { %v725_v37 = vrot.slane %v724_v30, 2  ;;  %v689_v41 = vadd.f32 %v688_v34, %v687_v25  ;;  %7753 = vmatprep.subr.bf16.mxu0 %v7752_v8  ;;  %v8002_v8 = vld [vmem:[#allocation8 + $0xb4] ss:$8 sps:$4 sm:$0xff]  }
 0x1f9   :  { %v701_v38 = vrot.slane %v700_v31, 1  ;;  %v748_v40 = vadd.f32 %v747_v32, %v746_v24  ;;  %v736_v42 = vrot.slane %v735_v35, 2  ;;  %v679_v43 = vrot.slane %v678_v36, 1  ;;  %v668_v32 = vld [vmem:[#allocation11 + $0x28] sm:$0xff] }
 0x1fa   :  { %v726_v44 = vadd.f32 %v725_v37, %v724_v30  ;;  %v690_v47 = vrot.slane %v689_v41, 1  ;;  %v7969_v37 = vld [vmem:[#allocation8 + $0x4] ss:$8 sps:$4 sm:$0xff]  }
 0x1fb   :  { %v749_v45 = vrot.slane %v748_v40, 1  ;;  %v737_v48 = vadd.f32 %v736_v42, %v735_v35  ;;  %v702_v51 = vadd.f32 %v701_v38, %v700_v31  ;;  %v680_v56 = vadd.f32 %v679_v43, %v678_v36  ;;  %v665_v31 = vld [vmem:[#allocation11 + $0x10] sm:$0xff]  ;;  %v7975_v43 = vld [vmem:[#allocation8 + $0x24] ss:$8 sps:$4 sm:$0xff]  }
 0x1fc   :  { %v727_v50 = vrot.slane %v726_v44, 1  ;;  %v691_v60 = vadd.f32 %v690_v47, %v689_v41  ;;  %v7757_v36 = vpack.c.bf16 %v668_v32, %v665_v31  ;;  %v7972_v41 = vld [vmem:[#allocation8 + $0x14] ss:$8 sps:$4 sm:$0xff]   ;;  %v7970_v42 = vld [vmem:[#allocation8 + $0x10] ss:$8 sps:$4 sm:$0xff]  }
 0x1fd   :  { %v750_v52 = vadd.f32 %v749_v45, %v748_v40  ;;  %v738_v53 = vrot.slane %v737_v48, 1  ;;  %v7967_v40 = vld [vmem:[#allocation8] ss:$8 sps:$4 sm:$0xff]   ;;  %v7978_v45 = vld [vmem:[#allocation8 + $0x34] ss:$8 sps:$4 sm:$0xff]  }
 0x1fe   :  { %v728_v58 = vadd.f32 %v727_v50, %v726_v44  ;;  %v7973_v44 = vld [vmem:[#allocation8 + $0x20] ss:$8 sps:$4 sm:$0xff]   ;;  %v7976_v47 = vld [vmem:[#allocation8 + $0x30] ss:$8 sps:$4 sm:$0xff]  }
 0x1ff   :  { %v754_v59 = vsel %vm751_vm3, %v702_v51, %v750_v52  ;;  %v739_v61 = vadd.f32 %v738_v53, %v737_v48  ;;  %v7981_v48 = vld [vmem:[#allocation8 + $0x44] ss:$8 sps:$4 sm:$0xff]   ;;  %v7979_v50 = vld [vmem:[#allocation8 + $0x40] ss:$8 sps:$4 sm:$0xff]   ;;  %v7984_v51 = vld [vmem:[#allocation8 + $0x54] ss:$8 sps:$4 sm:$0xff]  }
 0x200   :  { %7641 = vmatmul.mubr.f32.vlgmr.msra.gmra.mrb[12].mxu1 %v754_v59  ;;  %v752_v62 = vsel %vm751_vm3, %v680_v56, %v728_v58  ;;  %v7982_v52 = vld [vmem:[#allocation8 + $0x50] ss:$8 sps:$4 sm:$0xff]   ;;  %v7987_v53 = vld [vmem:[#allocation8 + $0x64] ss:$8 sps:$4 sm:$0xff]   ;;  %v7985_v56 = vld [vmem:[#allocation8 + $0x60] ss:$8 sps:$4 sm:$0xff]  }
 0x201   :  { %v753_v2 = vsel %vm751_vm3, %v691_v60, %v739_v61  ;;  %v7990_v58 = vld [vmem:[#allocation8 + $0x74] ss:$8 sps:$4 sm:$0xff]   ;;  %v7988_v59 = vld [vmem:[#allocation8 + $0x70] ss:$8 sps:$4 sm:$0xff]   ;;  %v7993_v60 = vld [vmem:[#allocation8 + $0x84] ss:$8 sps:$4 sm:$0xff]  }
 0x202   :  { %819 = vmatprep.mubr.f32.mxu0 %v753_v2  ;;  %v7991_v61 = vld [vmem:[#allocation8 + $0x80] ss:$8 sps:$4 sm:$0xff]   ;;  %v7994_v2 = vld [vmem:[#allocation8 + $0x90] ss:$8 sps:$4 sm:$0xff]  }
 0x203   :  { %820 = vmatmul.mubr.f32.vlgmr.msra.gmra.mrb[12].mxu0 %v752_v62  ;;  %v7996_v62 = vld [vmem:[#allocation8 + $0x94] ss:$8 sps:$4 sm:$0xff]  }
 0x204   :  { %980 = vmatprep.mubr.f32.mxu0 %v8813_v57  ;;  %7755 = vmatpush1.bf16.msra.mxu0 %v7754_v11  ;;  %v8003_v11 = vld [vmem:[#allocation8 + $0xc0] ss:$8 sps:$4 sm:$0xff]  }
 0x205   :  { %7756 = vmatprep.subr.bf16.mxu0 %v8811_v54 }
 0x2d3   :  { %v891_v12 = vpop.f32.mrb[12].mxu1 }
 0x2d4   :  { %v7642_v14 = vpop.f32.mrb[13].mxu1 }
 0x2d5   :  { %v8006_v14 = vld [vmem:[#allocation8 + $0xd0] ss:$8 sps:$4 sm:$0xff]  }
 0x2d6   :  { %v7374_v15 = vpop.f32.mrb[12].mxu0 }
 0x2d7   :  { %v7375_v16 = vpop.f32.mrb[13].mxu0 }
 0x2d8   :  { %v7376_v17 = vadd.f32 %v7375_v16, %v7374_v15  ;;  %v8009_v15 = vld [vmem:[#allocation8 + $0xe0] ss:$8 sps:$4 sm:$0xff]   ;;  %v8011_v16 = vld [vmem:[#allocation8 + $0xe4] ss:$8 sps:$4 sm:$0xff]  }
 0x2da   :  { %v892_v18 = vadd.f32 %v7376_v17, %v891_v12  ;;  %v8008_v12 = vld [vmem:[#allocation8 + $0xd4] ss:$8 sps:$4 sm:$0xff]  }
 0x2db   :  { %v8014_v17 = vld [vmem:[#allocation8 + $0xf4] ss:$8 sps:$4 sm:$0xff]  }
 0x2dc   :  { %v895_v19 = vmul.f32 0.0015432099, %v892_v18  ;;  %v8012_v18 = vld [vmem:[#allocation8 + $0xf0] ss:$8 sps:$4 sm:$0xff]  }
 0x2de   :  { %v896_v21 = vmul.f32 %v895_v19, %v895_v19 }
 0x2e0   :  { %v898_v22 = vrot.slane %v896_v21, 7  ;;  %v1057_v21 = vlaneseq }
 0x2e2   :  { %v900_v24 = vsub.f32 %v895_v19, %v898_v22  ;;  %v9335_v22 = vshrl.u32 %v1057_v21, 7 }
 0x2e4   :  { %v901_v25 = vmax.f32 %v900_v24, 0.0  ;;  %v8814_v24 = vmov 1966171168  }
 0x2e6   :  { %v902_v26 = vadd.f32 1e-05, %v901_v25  ;;  %v1089_v25 = vunpack.c.l.s4 %v8814_v24 }
 0x2e8   :  { %8472 = vrsqrt.f32 %v902_v26  ;;  %v9338_v26 = vsub.s32 0, %v9335_v22 }
 0x2f2   :  { %v8473_v29 = vpop.eup %8472 }
 0x2f3   :  { %v905_v30 = vrot.slane %v8473_v29, 1  ;;  %v1090_v29 = vunpack.c.0.s8 %v1089_v25 }
 0x2f5   :  { %v907_v34 = vmul.f32 %v905_v30, %v895_v19  ;;  %v8017_v19 = vld [vmem:[#allocation8 + $0x104] ss:$8 sps:$4 sm:$0xff]  }
 0x2f7   :  { %v909_v35 = vrot.slane %v907_v34, 7  ;;  %v9342_v34 = vsub.s32 %v1090_v29, %v9335_v22 }
 0x2f9   :  { %v911_v38 = vsel %vm751_vm3, %v905_v30, %v909_v35 }
 0x2fa   :  { %6708 = vmatmul.mubr.msk.f32.vlgmr.msra.gmra.mrb[14].mxu0 %vm912_vm4, %v911_v38 }
 0x2fb   :  { %7758 = vmatpush3.bf16.msra.mxu0 %v7757_v36  ;;  %7647 = vmatprep.mubr.msk.f32.mxu0 %vm8812_vm2, %v8813_v57 }
 0x2fc   :  { %2792 = vmatprep.subr.bf16.mxu0 %v7969_v37 }
 0x2fe   :  { %7648 = vmatmul.mubr.msk.f32.vlgmr.msra.gmra.mrb[16].mxu0 %vm912_vm4, %v911_v38 }
 0x2ff   :  { %2793 = vmatpush1.bf16.msra.mxu0 %v7967_v40 }
 0x300   :  { %2794 = vmatprep.subr.bf16.mxu0 %v7972_v41 }
 0x303   :  { %2795 = vmatpush1.bf16.msra.mxu0 %v7970_v42 }
 0x304   :  { %2796 = vmatprep.subr.bf16.mxu0 %v7975_v43 }
 0x307   :  { %2797 = vmatpush1.bf16.msra.mxu0 %v7973_v44 }
 0x308   :  { %2798 = vmatprep.subr.bf16.mxu0 %v7978_v45 }
 0x30b   :  { %2799 = vmatpush1.bf16.msra.mxu0 %v7976_v47 }
 0x30c   :  { %2800 = vmatprep.subr.bf16.mxu0 %v7981_v48 }
 0x30f   :  { %2801 = vmatpush1.bf16.msra.mxu0 %v7979_v50 }
 0x310   :  { %2802 = vmatprep.subr.bf16.mxu0 %v7984_v51 }
 0x313   :  { %2803 = vmatpush1.bf16.msra.mxu0 %v7982_v52 }
 0x314   :  { %2804 = vmatprep.subr.bf16.mxu0 %v7987_v53  ;;  %v9368_v53 = vsub.s32 1, %v9335_v22 }
 0x317   :  { %2805 = vmatpush1.bf16.msra.mxu0 %v7985_v56 }
 0x318   :  { %2806 = vmatprep.subr.bf16.mxu0 %v7990_v58 }
 0x31b   :  { %2807 = vmatpush1.bf16.msra.mxu0 %v7988_v59 }
 0x31c   :  { %2808 = vmatprep.subr.bf16.mxu0 %v7993_v60 }
 0x31f   :  { %2809 = vmatpush1.bf16.msra.mxu0 %v7991_v61 }
 0x320   :  { %2810 = vmatprep.subr.bf16.mxu0 %v7996_v62 }
 0x323   :  { %2811 = vmatpush1.bf16.msra.mxu0 %v7994_v2 }
 0x324   :  { %2812 = vmatprep.subr.bf16.mxu0 %v7999_v3 }
 0x327   :  { %2813 = vmatpush1.bf16.msra.mxu0 %v7997_v7 }
 0x328   :  { %2814 = vmatprep.subr.bf16.mxu0 %v8002_v8 }
 0x32b   :  { %2815 = vmatpush1.bf16.msra.mxu0 %v8000_v9 }
 0x32c   :  { %2816 = vmatprep.subr.bf16.mxu0 %v8005_v10 }
 0x32f   :  { %2817 = vmatpush1.bf16.msra.mxu0 %v8003_v11 }
 0x330   :  { %2818 = vmatprep.subr.bf16.mxu0 %v8008_v12 }
 0x333   :  { %2819 = vmatpush1.bf16.msra.mxu0 %v8006_v14 }
 0x334   :  { %2820 = vmatprep.subr.bf16.mxu0 %v8011_v16 }
 0x337   :  { %2821 = vmatpush1.bf16.msra.mxu0 %v8009_v15 }
 0x338   :  { %2822 = vmatprep.subr.bf16.mxu0 %v8014_v17 }
 0x33b   :  { %2823 = vmatpush1.bf16.msra.mxu0 %v8012_v18 }
 0x33c   :  { %2835 = vmatprep.subr.bf16.mxu0 %v8017_v19 }
 0x3cd   :  { %v982_v30 = vpop.f32.mrb[14].mxu0 }
 0x3ce   :  { %v1060_v31 = vrot.slane %v982_v30, %v9338_v26  ;;  %v984_v32 = vpop.f32.mrb[15].mxu0 }
 0x3cf   :  { %v1064_v35 = vrot.slane %v984_v32, %v9338_v26  ;;  %v1087_v36 = vcombine.low %v982_v30, %v984_v32 }
 0x3d0   :  { %v1069_v37 = vmul.f32 %v1060_v31, %v9248_v0  ;;  %v1072_v38 = vmul.f32 %v1060_v31, %v9256_v6  ;;  %v1075_v40 = vmul.f32 %v1060_v31, %v9281_v23  ;;  %v1078_v41 = vmul.f32 %v1060_v31, %v9294_v33 }
 0x3d1   :  { %v1081_v42 = vmul.f32 %v1060_v31, %v9312_v49  ;;  %v1070_v43 = vmul.f32 %v1064_v35, %v9252_v4  ;;  %v1073_v44 = vmul.f32 %v1064_v35, %v9268_v13  ;;  %v1076_v45 = vmul.f32 %v1064_v35, %v9286_v27  ;;  %v1053_v47 = vpop.f32.mrb[16].mxu0 }
 0x3d2   :  { %v1079_v48 = vmul.f32 %v1064_v35, %v9301_v39  ;;  %v1082_v50 = vmul.f32 %v1064_v35, %v9318_v55  ;;  %v1094_v0 = vrot.slane %v1087_v36, %v9342_v34  ;;  %v1068_v6 = vrot.slane %v1053_v47, %v9338_v26  ;;  %v7649_v23 = vpop.f32.mrb[17].mxu0  ;;  %v669_v55 = vld [vmem:[%s10395_s17] sm:$0x7] }
 0x3d3   :  { %v1101_v33 = vrot.slane %v1053_v47, %v9342_v34 }
 0x3d4   :  { %v1071_v49 = vmul.f32 %v1068_v6, %v9246_v63  ;;  %v1074_v4 = vmul.f32 %v1068_v6, %v9254_v5  ;;  %v1077_v13 = vmul.f32 %v1068_v6, %v9276_v20  ;;  %v1080_v27 = vmul.f32 %v1068_v6, %v9288_v28 }
 0x3d5   :  { %v1083_v51 = vmul.f32 %v1068_v6, %v9306_v46  ;;  %v1102_v39 = vcombine.high %v1094_v0, %v1101_v33  ;;  %v1123_v63 = vsub.s32 2, %v9335_v22 }
 0x3d7   :  { %v1109_v52 = vrot.slane %v1102_v39, %v9342_v34 }
 0x3d9   :  { %v1111_v56 = vsub.f32 %v669_v55, %v1109_v52 }
 0x3db   :  { %v1116_v5 = vrot.slane %v1111_v56, %v9338_v26  ;;  %v1120_v20 = vrot.slane %v1111_v56, %v9368_v53  ;;  %v1124_v28 = vrot.slane %v1111_v56, %v1123_v63  ;;  %v8018_v56 = vld [vmem:[#allocation8 + $0x110] ss:$8 sps:$4 sm:$0xff]  }
 0x3dd   :  { %v1128_v46 = vadd.f32 %v1116_v5, %v1069_v37  ;;  %v1129_v58 = vadd.f32 %v1120_v20, %v1070_v43  ;;  %v1130_v59 = vadd.f32 %v1124_v28, %v1071_v49  ;;  %v1131_v60 = vadd.f32 %v1116_v5, %v1072_v38  ;;  %v8015_v49 = vld [vmem:[#allocation8 + $0x100] ss:$8 sps:$4 sm:$0xff]  }
 0x3de   :  { %v1132_v61 = vadd.f32 %v1120_v20, %v1073_v44  ;;  %v1133_v62 = vadd.f32 %v1124_v28, %v1074_v4  ;;  %v1134_v2 = vadd.f32 %v1116_v5, %v1075_v40  ;;  %v1135_v3 = vadd.f32 %v1120_v20, %v1076_v45 }
 0x3df   :  { %v1136_v7 = vadd.f32 %v1124_v28, %v1077_v13  ;;  %v1137_v8 = vadd.f32 %v1116_v5, %v1078_v41  ;;  %v1138_v9 = vadd.f32 %v1120_v20, %v1079_v48  ;;  %v1139_v10 = vadd.f32 %v1124_v28, %v1080_v27  ;;  %v8020_v27 = vld [vmem:[#allocation8 + $0x114] ss:$8 sps:$4 sm:$0xff]  }
 0x3e0   :  { %v1140_v11 = vadd.f32 %v1116_v5, %v1081_v42  ;;  %v1141_v12 = vadd.f32 %v1120_v20, %v1082_v50  ;;  %v1142_v14 = vadd.f32 %v1124_v28, %v1083_v51  ;;  %v1143_v15 = vmax.f32 %v1128_v46, 0.0  ;;  %v8023_v5 = vld [vmem:[#allocation8 + $0x124] ss:$8 sps:$4 sm:$0xff]  }
 0x3e1   :  { %v1144_v16 = vmax.f32 %v1129_v58, 0.0  ;;  %v1145_v17 = vmax.f32 %v1130_v59, 0.0  ;;  %v1146_v18 = vmax.f32 %v1131_v60, 0.0  ;;  %v1147_v19 = vmax.f32 %v1132_v61, 0.0  ;;  %v8021_v58 = vld [vmem:[#allocation8 + $0x120] ss:$8 sps:$4 sm:$0xff]  }
 0x3e2   :  { %v1148_v21 = vmax.f32 %v1133_v62, 0.0  ;;  %v1149_v24 = vmax.f32 %v1134_v2, 0.0  ;;  %v1150_v25 = vmax.f32 %v1135_v3, 0.0  ;;  %v1151_v29 = vmax.f32 %v1136_v7, 0.0  ;;  %v8026_v59 = vld [vmem:[#allocation8 + $0x134] ss:$8 sps:$4 sm:$0xff]  }
 0x3e3   :  { %v1152_v30 = vmax.f32 %v1137_v8, 0.0  ;;  %v1153_v31 = vmax.f32 %v1138_v9, 0.0  ;;  %v1154_v32 = vmax.f32 %v1139_v10, 0.0  ;;  %v1155_v35 = vmax.f32 %v1140_v11, 0.0  ;;  %v8024_v61 = vld [vmem:[#allocation8 + $0x130] ss:$8 sps:$4 sm:$0xff]  }
 0x3e4   :  { %v1156_v36 = vmax.f32 %v1141_v12, 0.0  ;;  %v1157_v37 = vmax.f32 %v1142_v14, 0.0  ;;  %v7330_v38 = vpack.c.bf16 %v1144_v16, %v1143_v15  ;;  %v7331_v40 = vpack.c.bf16 %v1145_v17, %v1145_v17  ;;  %v8029_v62 = vld [vmem:[#allocation8 + $0x144] ss:$8 sps:$4 sm:$0xff]   ;;  %v8027_v2 = vld [vmem:[#allocation8 + $0x140] ss:$8 sps:$4 sm:$0xff]  }
 0x3e5   :  { %v9375_v41 = vpack.c.bf16 %v1147_v19, %v1146_v18  ;;  %v7333_v42 = vpack.c.bf16 %v1148_v21, %v1148_v21  ;;  %v7334_v43 = vpack.c.bf16 %v1150_v25, %v1149_v24  ;;  %v7335_v44 = vpack.c.bf16 %v1151_v29, %v1151_v29  ;;  %v8032_v3 = vld [vmem:[#allocation8 + $0x154] ss:$8 sps:$4 sm:$0xff]   ;;  %v8030_v7 = vld [vmem:[#allocation8 + $0x150] ss:$8 sps:$4 sm:$0xff]   ;;  %v8035_v8 = vld [vmem:[#allocation8 + $0x164] ss:$8 sps:$4 sm:$0xff]  }
 0x3e6   :  { %v9377_v45 = vpack.c.bf16 %v1153_v31, %v1152_v30  ;;  %v7337_v47 = vpack.c.bf16 %v1154_v32, %v1154_v32  ;;  %v7338_v48 = vpack.c.bf16 %v1156_v36, %v1155_v35  ;;  %v7339_v50 = vpack.c.bf16 %v1157_v37, %v1157_v37  ;;  %1211 = vst [vmem:[#allocation2] sm:$0xff] %v7330_v38  ;;  %v8033_v9 = vld [vmem:[#allocation8 + $0x160] ss:$8 sps:$4 sm:$0xff]   ;;  %v8038_v10 = vld [vmem:[#allocation8 + $0x174] ss:$8 sps:$4 sm:$0xff]  }
 0x3e7   :  { %1212 = vst [vmem:[#allocation2 + $0x8] sm:$0xf] %v7331_v40  ;;  %1213 = vst [vmem:[#allocation2 + $0xc] sm:$0xff] %v9375_v41  ;;  %v8036_v11 = vld [vmem:[#allocation8 + $0x170] ss:$8 sps:$4 sm:$0xff]  }
 0x3e8   :  { %1214 = vst [vmem:[#allocation2 + $0x14] sm:$0xf] %v7333_v42  ;;  %1215 = vst [vmem:[#allocation2 + $0x18] sm:$0xff] %v7334_v43  ;;  %v8041_v12 = vld [vmem:[#allocation8 + $0x184] ss:$8 sps:$4 sm:$0xff]  }
 0x3e9   :  { %1216 = vst [vmem:[#allocation2 + $0x20] sm:$0xf] %v7335_v44  ;;  %1218 = vst [vmem:[#allocation2 + $0x2c] sm:$0xf] %v7337_v47  ;;  %v8039_v14 = vld [vmem:[#allocation8 + $0x180] ss:$8 sps:$4 sm:$0xff]  }
 0x3ea   :  { %1219 = vst [vmem:[#allocation2 + $0x30] sm:$0x33] %v7338_v48  ;;  %1220 = vst [vmem:[#allocation2 + $0x38] sm:$0x3] %v7339_v50  ;;  %v8044_v15 = vld [vmem:[#allocation8 + $0x194] ss:$8 sps:$4 sm:$0xff]  }
 0x3eb   :  { %v8042_v16 = vld [vmem:[#allocation8 + $0x190] ss:$8 sps:$4 sm:$0xff]   ;;  %v8047_v17 = vld [vmem:[#allocation8 + $0x1a4] ss:$8 sps:$4 sm:$0xff]   ;;  %v8045_v18 = vld [vmem:[#allocation8 + $0x1a0] ss:$8 sps:$4 sm:$0xff]  }
 0x3ec   :  { %v8050_v19 = vld [vmem:[#allocation8 + $0x1b4] ss:$8 sps:$4 sm:$0xff]   ;;  %v8048_v21 = vld [vmem:[#allocation8 + $0x1b0] ss:$8 sps:$4 sm:$0xff]   ;;  %v8053_v24 = vld [vmem:[#allocation8 + $0x1c4] ss:$8 sps:$4 sm:$0xff]  }
 0x3ed   :  { %v8051_v25 = vld [vmem:[#allocation8 + $0x1c0] ss:$8 sps:$4 sm:$0xff]   ;;  %v8056_v29 = vld [vmem:[#allocation8 + $0x1d4] ss:$8 sps:$4 sm:$0xff]   ;;  %v8054_v30 = vld [vmem:[#allocation8 + $0x1d0] ss:$8 sps:$4 sm:$0xff]  }
 0x3ee   :  { %v1223_v0 = vld [vmem:[#allocation2 + $0xc] sm:$0x77]  ;;  %v8059_v31 = vld [vmem:[#allocation8 + $0x1e4] ss:$8 sps:$4 sm:$0xff]   ;;  %v8057_v32 = vld [vmem:[#allocation8 + $0x1e0] ss:$8 sps:$4 sm:$0xff]  }
 0x3ef   :  { %v9380_v6 = vld [vmem:[#allocation2 + $0x18] sm:$0xee]  ;;  %v6720_v23 = vcombine.low %v7330_v38, %v1223_v0  ;;  %v6721_v33 = vcombine.high %v7330_v38, %v1223_v0  ;;  %v8062_v35 = vld [vmem:[#allocation8 + $0x1f4] ss:$8 sps:$4 sm:$0xff]   ;;  %v8060_v38 = vld [vmem:[#allocation8 + $0x1f0] ss:$8 sps:$4 sm:$0xff]  }
 0x3f0   :  { %v6723_v4 = vcombine.low %v9380_v6, %v9377_v45  ;;  %v6724_v13 = vcombine.high %v9380_v6, %v9377_v45  ;;  %v9386_v39 = vld [vmem:[#allocation2 + $0x18] sm:$0xcc]  ;;  %v1226_v36 = vld [vmem:[#allocation2 + $0x20] sm:$0xe]  ;;  %v9397_v37 = vld [vmem:[#allocation2 + $0x2c] sm:$0xf] }
 0x3f1   :  { %2824 = vmatprep.mubr.bf16.mxu0 %v6721_v33  ;;  %v9388_v55 = vld [vmem:[#allocation2 + $0x30] sm:$0x11]  ;;  %v6730_v52 = vcombine.high %v9386_v39, %v9377_v45  ;;  %v8066_v40 = vld [vmem:[#allocation8 + $0x204] ss:$8 sps:$4 sm:$0xff]   ;;  %v6725_v42 = vcombine.low %v1226_v36, %v9397_v37  ;;  %v8064_v43 = vld [vmem:[#allocation8 + $0x200] ss:$8 sps:$4 sm:$0xff]  }
 0x3f2   :  { %v1270_v51 = vrot.slane %v6723_v4, 1  ;;  %2825 = vmatmul.mubr.bf16.vlgmr.msra.gmra.mrb[20].mxu0 %v6720_v23  ;;  %v6733_v20 = vcombine.high %v9388_v55, %v9388_v55  ;;  %v8063_v44 = vld [vmem:[#allocation2 + $0x8] ss:$12 sps:$4 sm:$0x7f]   ;;  %v8072_v23 = vld [vmem:[#allocation8 + $0x220] ss:$8 sps:$4 sm:$0xff]  }
 0x3f3   :  { %2836 = vmatpush1.bf16.msra.mxu0 %v8015_v49  ;;  %v1315_v28 = vrot.slane %v6730_v52, 2  ;;  %v8071_v47 = vld [vmem:[#allocation8 + $0x214] ss:$8 sps:$4 sm:$0xff]   ;;  %v1272_v48 = vrot.slane %v6725_v42, 1  ;;  %v8069_v50 = vld [vmem:[#allocation8 + $0x210] ss:$8 sps:$4 sm:$0xff]  }
 0x3f4   :  { %2867 = vmatprep.mubr.bf16.mxu0 %v1270_v51  ;;  %2837 = vmatprep.subr.bf16.mxu0 %v8020_v27  ;;  %v1316_v46 = vrot.slane %v6733_v20, 2  ;;  %v8074_v0 = vld [vmem:[#allocation8 + $0x224] ss:$8 sps:$4 sm:$0xff]   ;;  %v8077_v33 = vld [vmem:[#allocation8 + $0x234] ss:$8 sps:$4 sm:$0xff]  }
 0x3f5   :  { %v8075_v49 = vld [vmem:[#allocation8 + $0x230] ss:$8 sps:$4 sm:$0xff]   ;;  %v8080_v4 = vld [vmem:[#allocation8 + $0x244] ss:$8 sps:$4 sm:$0xff]   ;;  %v8078_v27 = vld [vmem:[#allocation8 + $0x240] ss:$8 sps:$4 sm:$0xff]  }
 0x3f6   :  { %v9395_v60 = vsel %vm1311_vm5, %v1315_v28, %v1316_v46  ;;  %v8083_v51 = vld [vmem:[#allocation8 + $0x254] ss:$8 sps:$4 sm:$0xff]   ;;  %v8081_v52 = vld [vmem:[#allocation8 + $0x250] ss:$8 sps:$4 sm:$0xff]   ;;  %v8092_v46 = vld [vmem:[#allocation8 + $0x284] ss:$8 sps:$4 sm:$0xff]  }
 0x3f7   :  { %2838 = vmatpush1.bf16.msra.mxu0 %v8018_v56  ;;  %v8086_v56 = vld [vmem:[#allocation8 + $0x264] ss:$8 sps:$4 sm:$0xff]   ;;  %v8089_v20 = vld [vmem:[#allocation8 + $0x274] ss:$8 sps:$4 sm:$0xff]   ;;  %v8087_v28 = vld [vmem:[#allocation8 + $0x270] ss:$8 sps:$4 sm:$0xff]  }
 0x3f8   :  { %2839 = vmatprep.subr.bf16.mxu0 %v8023_v5  ;;  %v8084_v5 = vld [vmem:[#allocation8 + $0x260] ss:$8 sps:$4 sm:$0xff]   ;;  %v8123_v36 = vld [vmem:[#allocation8 + $0x330] ss:$8 sps:$4 sm:$0xff]   ;;  %v8134_v42 = vld [vmem:[#allocation8 + $0x364] ss:$8 sps:$4 sm:$0xff]  }
 0x3f9   :  { %v8126_v6 = vld [vmem:[#allocation8 + $0x340] ss:$8 sps:$4 sm:$0xff]  }
 0x3fb   :  { %2840 = vmatpush1.bf16.msra.mxu0 %v8021_v58  ;;  %v8090_v58 = vld [vmem:[#allocation8 + $0x280] ss:$8 sps:$4 sm:$0xff]  }
 0x3fc   :  { %2841 = vmatprep.subr.bf16.mxu0 %v8026_v59  ;;  %v8095_v59 = vld [vmem:[#allocation8 + $0x294] ss:$8 sps:$4 sm:$0xff]  }
 0x3ff   :  { %2842 = vmatpush1.bf16.msra.mxu0 %v8024_v61  ;;  %v8093_v61 = vld [vmem:[#allocation8 + $0x290] ss:$8 sps:$4 sm:$0xff]  }
 0x400   :  { %2843 = vmatprep.subr.bf16.mxu0 %v8029_v62  ;;  %v8098_v62 = vld [vmem:[#allocation8 + $0x2a4] ss:$8 sps:$4 sm:$0xff]  }
 0x403   :  { %2844 = vmatpush1.bf16.msra.mxu0 %v8027_v2  ;;  %v8096_v2 = vld [vmem:[#allocation8 + $0x2a0] ss:$8 sps:$4 sm:$0xff]  }
 0x404   :  { %2845 = vmatprep.subr.bf16.mxu0 %v8032_v3  ;;  %v8101_v3 = vld [vmem:[#allocation8 + $0x2b4] ss:$8 sps:$4 sm:$0xff]  }
 0x407   :  { %2846 = vmatpush1.bf16.msra.mxu0 %v8030_v7  ;;  %v8099_v7 = vld [vmem:[#allocation8 + $0x2b0] ss:$8 sps:$4 sm:$0xff]  }
 0x408   :  { %2847 = vmatprep.subr.bf16.mxu0 %v8035_v8  ;;  %v8104_v8 = vld [vmem:[#allocation8 + $0x2c4] ss:$8 sps:$4 sm:$0xff]  }
 0x40b   :  { %2848 = vmatpush1.bf16.msra.mxu0 %v8033_v9  ;;  %v8102_v9 = vld [vmem:[#allocation8 + $0x2c0] ss:$8 sps:$4 sm:$0xff]  }
 0x40c   :  { %2849 = vmatprep.subr.bf16.mxu0 %v8038_v10  ;;  %v8107_v10 = vld [vmem:[#allocation8 + $0x2d4] ss:$8 sps:$4 sm:$0xff]  }
 0x40f   :  { %2850 = vmatpush1.bf16.msra.mxu0 %v8036_v11  ;;  %v8105_v11 = vld [vmem:[#allocation8 + $0x2d0] ss:$8 sps:$4 sm:$0xff]  }
 0x410   :  { %2851 = vmatprep.subr.bf16.mxu0 %v8041_v12  ;;  %v8110_v12 = vld [vmem:[#allocation8 + $0x2e4] ss:$8 sps:$4 sm:$0xff]  }
 0x413   :  { %2852 = vmatpush1.bf16.msra.mxu0 %v8039_v14  ;;  %v8108_v14 = vld [vmem:[#allocation8 + $0x2e0] ss:$8 sps:$4 sm:$0xff]  }
 0x414   :  { %2853 = vmatprep.subr.bf16.mxu0 %v8044_v15  ;;  %v8113_v15 = vld [vmem:[#allocation8 + $0x2f4] ss:$8 sps:$4 sm:$0xff]  }
 0x417   :  { %2854 = vmatpush1.bf16.msra.mxu0 %v8042_v16  ;;  %v9400_v16 = vld [vmem:[#allocation2] sm:$0xee] }
 0x418   :  { %2855 = vmatprep.subr.bf16.mxu0 %v8047_v17  ;;  %v8111_v17 = vld [vmem:[#allocation8 + $0x2f0] ss:$8 sps:$4 sm:$0xff]  }
 0x41b   :  { %2856 = vmatpush1.bf16.msra.mxu0 %v8045_v18  ;;  %v8116_v18 = vld [vmem:[#allocation8 + $0x304] ss:$8 sps:$4 sm:$0xff]  }
 0x41c   :  { %2857 = vmatprep.subr.bf16.mxu0 %v8050_v19  ;;  %v6727_v19 = vcombine.high %v9400_v16, %v9375_v41 }
 0x41f   :  { %2858 = vmatpush1.bf16.msra.mxu0 %v8048_v21  ;;  %v8114_v21 = vld [vmem:[#allocation8 + $0x300] ss:$8 sps:$4 sm:$0xff]  }
 0x420   :  { %2859 = vmatprep.subr.bf16.mxu0 %v8053_v24  ;;  %v1271_v24 = vrot.slane %v6724_v13, 1  ;;  %v8131_v13 = vld [vmem:[#allocation8 + $0x354] ss:$8 sps:$4 sm:$0xff]  }
 0x423   :  { %2860 = vmatpush1.bf16.msra.mxu0 %v8051_v25  ;;  %v8119_v25 = vld [vmem:[#allocation8 + $0x314] ss:$8 sps:$4 sm:$0xff]  }
 0x424   :  { %2861 = vmatprep.subr.bf16.mxu0 %v8056_v29  ;;  %v1290_v29 = vrot.slane %v6727_v19, 1  ;;  %v8183_v19 = vld [vmem:[#allocation8 + $0x464] ss:$8 sps:$4 sm:$0xff]  }
 0x427   :  { %2862 = vmatpush1.bf16.msra.mxu0 %v8054_v30  ;;  %v8117_v30 = vld [vmem:[#allocation8 + $0x310] ss:$8 sps:$4 sm:$0xff]  }
 0x428   :  { %2863 = vmatprep.subr.bf16.mxu0 %v8059_v31  ;;  %v8122_v31 = vld [vmem:[#allocation8 + $0x324] ss:$8 sps:$4 sm:$0xff]  }
 0x42b   :  { %2864 = vmatpush1.bf16.msra.mxu0 %v8057_v32  ;;  %v8120_v32 = vld [vmem:[#allocation8 + $0x320] ss:$8 sps:$4 sm:$0xff]  }
 0x42c   :  { %2865 = vmatprep.subr.bf16.mxu0 %v8062_v35  ;;  %v8125_v35 = vld [vmem:[#allocation8 + $0x334] ss:$8 sps:$4 sm:$0xff]  }
 0x42f   :  { %2866 = vmatpush1.bf16.msra.mxu0 %v8060_v38  ;;  %v8128_v38 = vld [vmem:[#allocation8 + $0x344] ss:$8 sps:$4 sm:$0xff]  }
 0x430   :  { %2878 = vmatprep.subr.bf16.mxu0 %v8066_v40  ;;  %v8129_v40 = vld [vmem:[#allocation8 + $0x350] ss:$8 sps:$4 sm:$0xff]  }
 0x432   :  { %2868 = vmatmul.mubr.bf16.vlgmr.msra.gmra.mrb[20].mxu0 %v8063_v44  ;;  %v8137_v44 = vld [vmem:[#allocation8 + $0x374] ss:$8 sps:$4 sm:$0xff]  }
 0x433   :  { %2879 = vmatpush1.bf16.msra.mxu0 %v8064_v43  ;;  %2910 = vmatprep.mubr.bf16.mxu0 %v1272_v48  ;;  %v8132_v43 = vld [vmem:[#allocation8 + $0x360] ss:$8 sps:$4 sm:$0xff]   ;;  %v8140_v48 = vld [vmem:[#allocation8 + $0x384] ss:$8 sps:$4 sm:$0xff]  }
 0x434   :  { %2880 = vmatprep.subr.bf16.mxu0 %v8071_v47  ;;  %v8135_v47 = vld [vmem:[#allocation8 + $0x370] ss:$8 sps:$4 sm:$0xff]  }
 0x437   :  { %2881 = vmatpush1.bf16.msra.mxu0 %v8069_v50  ;;  %v8138_v50 = vld [vmem:[#allocation8 + $0x380] ss:$8 sps:$4 sm:$0xff]  }
 0x438   :  { %2882 = vmatprep.subr.bf16.mxu0 %v8074_v0  ;;  %v8143_v0 = vld [vmem:[#allocation8 + $0x394] ss:$8 sps:$4 sm:$0xff]  }
 0x43b   :  { %2883 = vmatpush1.bf16.msra.mxu0 %v8072_v23  ;;  %v8141_v23 = vld [vmem:[#allocation8 + $0x390] ss:$8 sps:$4 sm:$0xff]  }
 0x43c   :  { %2884 = vmatprep.subr.bf16.mxu0 %v8077_v33  ;;  %v8146_v33 = vld [vmem:[#allocation8 + $0x3a4] ss:$8 sps:$4 sm:$0xff]  }
 0x43f   :  { %2885 = vmatpush1.bf16.msra.mxu0 %v8075_v49  ;;  %v8144_v49 = vld [vmem:[#allocation8 + $0x3a0] ss:$8 sps:$4 sm:$0xff]  }
 0x440   :  { %2886 = vmatprep.subr.bf16.mxu0 %v8080_v4  ;;  %v8149_v4 = vld [vmem:[#allocation8 + $0x3b4] ss:$8 sps:$4 sm:$0xff]  }
 0x443   :  { %2887 = vmatpush1.bf16.msra.mxu0 %v8078_v27  ;;  %v8147_v27 = vld [vmem:[#allocation8 + $0x3b0] ss:$8 sps:$4 sm:$0xff]  }
 0x444   :  { %2888 = vmatprep.subr.bf16.mxu0 %v8083_v51  ;;  %v8152_v51 = vld [vmem:[#allocation8 + $0x3c4] ss:$8 sps:$4 sm:$0xff]  }
 0x447   :  { %2889 = vmatpush1.bf16.msra.mxu0 %v8081_v52  ;;  %v8150_v52 = vld [vmem:[#allocation8 + $0x3c0] ss:$8 sps:$4 sm:$0xff]  }
 0x448   :  { %2890 = vmatprep.subr.bf16.mxu0 %v8086_v56  ;;  %v8155_v56 = vld [vmem:[#allocation8 + $0x3d4] ss:$8 sps:$4 sm:$0xff]  }
 0x44b   :  { %2891 = vmatpush1.bf16.msra.mxu0 %v8084_v5  ;;  %v8153_v5 = vld [vmem:[#allocation8 + $0x3d0] ss:$8 sps:$4 sm:$0xff]  }
 0x44c   :  { %2892 = vmatprep.subr.bf16.mxu0 %v8089_v20  ;;  %v8158_v20 = vld [vmem:[#allocation8 + $0x3e4] ss:$8 sps:$4 sm:$0xff]  }
 0x44f   :  { %2893 = vmatpush1.bf16.msra.mxu0 %v8087_v28  ;;  %v8156_v28 = vld [vmem:[#allocation8 + $0x3e0] ss:$8 sps:$4 sm:$0xff]  }
 0x450   :  { %2894 = vmatprep.subr.bf16.mxu0 %v8092_v46  ;;  %v8161_v46 = vld [vmem:[#allocation8 + $0x3f4] ss:$8 sps:$4 sm:$0xff]  }
 0x453   :  { %2895 = vmatpush1.bf16.msra.mxu0 %v8090_v58  ;;  %v6729_v58 = vcombine.low %v9386_v39, %v9377_v45  ;;  %v8166_v39 = vld [vmem:[#allocation8 + $0x410] ss:$8 sps:$4 sm:$0xff]  }
 0x454   :  { %2896 = vmatprep.subr.bf16.mxu0 %v8095_v59  ;;  %v6732_v59 = vcombine.low %v9388_v55, %v9388_v55  ;;  %v8171_v55 = vld [vmem:[#allocation8 + $0x424] ss:$8 sps:$4 sm:$0xff]  }
 0x457   :  { %2897 = vmatpush1.bf16.msra.mxu0 %v8093_v61  ;;  %v8159_v61 = vld [vmem:[#allocation8 + $0x3f0] ss:$8 sps:$4 sm:$0xff]  }
 0x458   :  { %2898 = vmatprep.subr.bf16.mxu0 %v8098_v62  ;;  %v6726_v62 = vcombine.low %v9400_v16, %v9375_v41  ;;  %v8175_v16 = vld [vmem:[#allocation8 + $0x440] ss:$8 sps:$4 sm:$0xff]  }
 0x45b   :  { %2899 = vmatpush1.bf16.msra.mxu0 %v8096_v2  ;;  %v8164_v2 = vld [vmem:[#allocation8 + $0x404] ss:$8 sps:$4 sm:$0xff]  }
 0x45c   :  { %2900 = vmatprep.subr.bf16.mxu0 %v8101_v3  ;;  %v1312_v3 = vrot.slane %v6729_v58, 2  ;;  %v8221_v58 = vld [vmem:[#allocation8 + $0x524] ss:$8 sps:$4 sm:$0xff]  }
 0x45f   :  { %2901 = vmatpush1.bf16.msra.mxu0 %v8099_v7  ;;  %v1313_v7 = vrot.slane %v6732_v59, 2  ;;  %v8219_v59 = vld [vmem:[#allocation8 + $0x520] ss:$8 sps:$4 sm:$0xff]  }
 0x460   :  { %2902 = vmatprep.subr.bf16.mxu0 %v8104_v8  ;;  %v8162_v8 = vld [vmem:[#allocation8 + $0x400] ss:$8 sps:$4 sm:$0xff]  }
 0x461   :  { %v1314_v45 = vsel %vm1311_vm5, %v1312_v3, %v1313_v7  ;;  %v8225_v3 = vld [vmem:[#allocation8 + $0x540] ss:$8 sps:$4 sm:$0xff]   ;;  %v8230_v7 = vld [vmem:[#allocation8 + $0x554] ss:$8 sps:$4 sm:$0xff]  }
 0x463   :  { %2903 = vmatpush1.bf16.msra.mxu0 %v8102_v9  ;;  %v1289_v9 = vrot.slane %v6726_v62, 1  ;;  %v8222_v62 = vld [vmem:[#allocation8 + $0x530] ss:$8 sps:$4 sm:$0xff]  }
 0x464   :  { %2904 = vmatprep.subr.bf16.mxu0 %v8107_v10  ;;  %v8168_v10 = vld [vmem:[#allocation8 + $0x414] ss:$8 sps:$4 sm:$0xff]  }
 0x467   :  { %2905 = vmatpush1.bf16.msra.mxu0 %v8105_v11  ;;  %v8169_v11 = vld [vmem:[#allocation8 + $0x420] ss:$8 sps:$4 sm:$0xff]  }
 0x468   :  { %2906 = vmatprep.subr.bf16.mxu0 %v8110_v12  ;;  %v8174_v12 = vld [vmem:[#allocation8 + $0x434] ss:$8 sps:$4 sm:$0xff]  }
 0x46b   :  { %2907 = vmatpush1.bf16.msra.mxu0 %v8108_v14  ;;  %v8172_v14 = vld [vmem:[#allocation8 + $0x430] ss:$8 sps:$4 sm:$0xff]  }
 0x46c   :  { %2908 = vmatprep.subr.bf16.mxu0 %v8113_v15  ;;  %v8177_v15 = vld [vmem:[#allocation8 + $0x444] ss:$8 sps:$4 sm:$0xff]  }
 0x46f   :  { %2909 = vmatpush1.bf16.msra.mxu0 %v8111_v17  ;;  %v8180_v17 = vld [vmem:[#allocation8 + $0x454] ss:$8 sps:$4 sm:$0xff]  }
 0x470   :  { %2921 = vmatprep.subr.bf16.mxu0 %v8116_v18  ;;  %v8178_v18 = vld [vmem:[#allocation8 + $0x450] ss:$8 sps:$4 sm:$0xff]  }
 0x472   :  { %2911 = vmatmul.mubr.bf16.vlgmr.msra.gmra.mrb[20].mxu0 %v1271_v24  ;;  %v8186_v24 = vld [vmem:[#allocation8 + $0x474] ss:$8 sps:$4 sm:$0xff]  }
 0x473   :  { %2922 = vmatpush1.bf16.msra.mxu0 %v8114_v21  ;;  %2953 = vmatprep.mubr.bf16.mxu0 %v1290_v29  ;;  %v8181_v21 = vld [vmem:[#allocation8 + $0x460] ss:$8 sps:$4 sm:$0xff]   ;;  %v8189_v29 = vld [vmem:[#allocation8 + $0x484] ss:$8 sps:$4 sm:$0xff]  }
 0x474   :  { %2923 = vmatprep.subr.bf16.mxu0 %v8119_v25  ;;  %v8184_v25 = vld [vmem:[#allocation8 + $0x470] ss:$8 sps:$4 sm:$0xff]  }
 0x477   :  { %2924 = vmatpush1.bf16.msra.mxu0 %v8117_v30  ;;  %v8187_v30 = vld [vmem:[#allocation8 + $0x480] ss:$8 sps:$4 sm:$0xff]  }
 0x478   :  { %2925 = vmatprep.subr.bf16.mxu0 %v8122_v31  ;;  %v8192_v31 = vld [vmem:[#allocation8 + $0x494] ss:$8 sps:$4 sm:$0xff]  }
 0x47b   :  { %2926 = vmatpush1.bf16.msra.mxu0 %v8120_v32  ;;  %v8190_v32 = vld [vmem:[#allocation8 + $0x490] ss:$8 sps:$4 sm:$0xff]  }
 0x47c   :  { %2927 = vmatprep.subr.bf16.mxu0 %v8125_v35  ;;  %v8195_v35 = vld [vmem:[#allocation8 + $0x4a4] ss:$8 sps:$4 sm:$0xff]  }
 0x47f   :  { %2928 = vmatpush1.bf16.msra.mxu0 %v8123_v36  ;;  %v8193_v36 = vld [vmem:[#allocation8 + $0x4a0] ss:$8 sps:$4 sm:$0xff]  }
 0x480   :  { %2929 = vmatprep.subr.bf16.mxu0 %v8128_v38  ;;  %v8198_v38 = vld [vmem:[#allocation8 + $0x4b4] ss:$8 sps:$4 sm:$0xff]  }
 0x483   :  { %2930 = vmatpush1.bf16.msra.mxu0 %v8126_v6  ;;  %v8196_v6 = vld [vmem:[#allocation8 + $0x4b0] ss:$8 sps:$4 sm:$0xff]  }
 0x484   :  { %2931 = vmatprep.subr.bf16.mxu0 %v8131_v13  ;;  %v8201_v13 = vld [vmem:[#allocation8 + $0x4c4] ss:$8 sps:$4 sm:$0xff]  }
 0x487   :  { %2932 = vmatpush1.bf16.msra.mxu0 %v8129_v40  ;;  %v8199_v40 = vld [vmem:[#allocation8 + $0x4c0] ss:$8 sps:$4 sm:$0xff]  }
 0x488   :  { %2933 = vmatprep.subr.bf16.mxu0 %v8134_v42  ;;  %v8204_v42 = vld [vmem:[#allocation8 + $0x4d4] ss:$8 sps:$4 sm:$0xff]  }
 0x48b   :  { %2934 = vmatpush1.bf16.msra.mxu0 %v8132_v43  ;;  %v8202_v43 = vld [vmem:[#allocation8 + $0x4d0] ss:$8 sps:$4 sm:$0xff]  }
 0x48c   :  { %2935 = vmatprep.subr.bf16.mxu0 %v8137_v44  ;;  %v8207_v44 = vld [vmem:[#allocation8 + $0x4e4] ss:$8 sps:$4 sm:$0xff]  }
 0x48f   :  { %2936 = vmatpush1.bf16.msra.mxu0 %v8135_v47  ;;  %v1234_v47 = vld [vmem:[#allocation2 + $0x20] sm:$0xc] }
 0x490   :  { %2937 = vmatprep.subr.bf16.mxu0 %v8140_v48  ;;  %v8205_v48 = vld [vmem:[#allocation8 + $0x4e0] ss:$8 sps:$4 sm:$0xff]  }
 0x493   :  { %2938 = vmatpush1.bf16.msra.mxu0 %v8138_v50  ;;  %v8210_v50 = vld [vmem:[#allocation8 + $0x4f4] ss:$8 sps:$4 sm:$0xff]  }
 0x494   :  { %2939 = vmatprep.subr.bf16.mxu0 %v8143_v0  ;;  %v1230_v0 = vld [vmem:[#allocation2 + $0x8] sm:$0xe] }
 0x497   :  { %2940 = vmatpush1.bf16.msra.mxu0 %v8141_v23  ;;  %v9414_v23 = vld [vmem:[#allocation2 + $0x14] sm:$0xf] }
 0x498   :  { %2941 = vmatprep.subr.bf16.mxu0 %v8146_v33  ;;  %v6731_v33 = vcombine.low %v1234_v47, %v9397_v37  ;;  %v8216_v37 = vld [vmem:[#allocation8 + $0x510] ss:$8 sps:$4 sm:$0xff]   ;;  %v8254_v47 = vld [vmem:[#allocation8 + $0x5d4] ss:$8 sps:$4 sm:$0xff]  }
 0x49b   :  { %2942 = vmatpush1.bf16.msra.mxu0 %v8144_v49  ;;  %v8215_v49 = vld [vmem:[#allocation2 + $0x38] ss:$0 sps:$4 sm:$0x11]  }
 0x49c   :  { %2943 = vmatprep.subr.bf16.mxu0 %v8149_v4  ;;  %v8208_v4 = vld [vmem:[#allocation8 + $0x4f0] ss:$8 sps:$4 sm:$0xff]  }
 0x49f   :  { %2944 = vmatpush1.bf16.msra.mxu0 %v8147_v27  ;;  %v6728_v27 = vcombine.low %v1230_v0, %v9414_v23  ;;  %v8255_v0 = vld [vmem:[#allocation8 + $0x5e0] ss:$8 sps:$4 sm:$0xff]  }
 0x4a0   :  { %2945 = vmatprep.subr.bf16.mxu0 %v8152_v51  ;;  %v8214_v51 = vld [vmem:[#allocation8 + $0x504] ss:$8 sps:$4 sm:$0xff]  }
 0x4a3   :  { %2946 = vmatpush1.bf16.msra.mxu0 %v8150_v52  ;;  %v1318_v52 = vrot.slane %v6731_v33, 2  ;;  %v9449_v33 = vld [vmem:[#allocation2] sm:$0xcc] }
 0x4a4   :  { %2947 = vmatprep.subr.bf16.mxu0 %v8155_v56  ;;  %v1319_v56 = vrot.slane %v8215_v49, 2  ;;  %v9451_v49 = vld [vmem:[#allocation2 + $0x18] sm:$0x11] }
 0x4a7   :  { %2948 = vmatpush1.bf16.msra.mxu0 %v8153_v5  ;;  %v8212_v5 = vld [vmem:[#allocation8 + $0x500] ss:$8 sps:$4 sm:$0xff]  }
 0x4a8   :  { %2949 = vmatprep.subr.bf16.mxu0 %v8158_v20  ;;  %v1291_v20 = vrot.slane %v6728_v27, 1  ;;  %v6736_v27 = vcombine.high %v9449_v33, %v9375_v41 }
 0x4ab   :  { %2950 = vmatpush1.bf16.msra.mxu0 %v8156_v28  ;;  %v8218_v28 = vld [vmem:[#allocation8 + $0x514] ss:$8 sps:$4 sm:$0xff]  }
 0x4ac   :  { %2951 = vmatprep.subr.bf16.mxu0 %v8161_v46  ;;  %v1320_v46 = vsel %vm1311_vm5, %v1318_v52, %v1319_v56  ;;  %v8258_v52 = vld [vmem:[#allocation8 + $0x5f0] ss:$8 sps:$4 sm:$0xff]   ;;  %v8264_v56 = vld [vmem:[#allocation8 + $0x604] ss:$8 sps:$4 sm:$0xff]  }
 0x4af   :  { %2952 = vmatpush1.bf16.msra.mxu0 %v8159_v61  ;;  %v8224_v61 = vld [vmem:[#allocation8 + $0x534] ss:$8 sps:$4 sm:$0xff]  }
 0x4b0   :  { %2964 = vmatprep.subr.bf16.mxu0 %v8164_v2  ;;  %v8227_v2 = vld [vmem:[#allocation8 + $0x544] ss:$8 sps:$4 sm:$0xff]  }
 0x4b2   :  { %2954 = vmatmul.mubr.bf16.vlgmr.msra.gmra.mrb[20].mxu0 %v1289_v9  ;;  %v8233_v9 = vld [vmem:[#allocation8 + $0x564] ss:$8 sps:$4 sm:$0xff]  }
 0x4b3   :  { %2965 = vmatpush1.bf16.msra.mxu0 %v8162_v8  ;;  %2996 = vmatprep.mubr.bf16.mxu0 %v1314_v45  ;;  %v8228_v8 = vld [vmem:[#allocation8 + $0x550] ss:$8 sps:$4 sm:$0xff]   ;;  %v8236_v45 = vld [vmem:[#allocation8 + $0x574] ss:$8 sps:$4 sm:$0xff]  }
 0x4b4   :  { %2966 = vmatprep.subr.bf16.mxu0 %v8168_v10  ;;  %v8231_v10 = vld [vmem:[#allocation8 + $0x560] ss:$8 sps:$4 sm:$0xff]  }
 0x4b7   :  { %2967 = vmatpush1.bf16.msra.mxu0 %v8166_v39  ;;  %v8234_v39 = vld [vmem:[#allocation8 + $0x570] ss:$8 sps:$4 sm:$0xff]  }
 0x4b8   :  { %2968 = vmatprep.subr.bf16.mxu0 %v8171_v55  ;;  %v8239_v55 = vld [vmem:[#allocation8 + $0x584] ss:$8 sps:$4 sm:$0xff]  }
 0x4bb   :  { %2969 = vmatpush1.bf16.msra.mxu0 %v8169_v11  ;;  %v8237_v11 = vld [vmem:[#allocation8 + $0x580] ss:$8 sps:$4 sm:$0xff]  }
 0x4bc   :  { %2970 = vmatprep.subr.bf16.mxu0 %v8174_v12  ;;  %v8242_v12 = vld [vmem:[#allocation8 + $0x594] ss:$8 sps:$4 sm:$0xff]  }
 0x4bf   :  { %2971 = vmatpush1.bf16.msra.mxu0 %v8172_v14  ;;  %v8240_v14 = vld [vmem:[#allocation8 + $0x590] ss:$8 sps:$4 sm:$0xff]  }
 0x4c0   :  { %2972 = vmatprep.subr.bf16.mxu0 %v8177_v15  ;;  %v8245_v15 = vld [vmem:[#allocation8 + $0x5a4] ss:$8 sps:$4 sm:$0xff]  }
 0x4c3   :  { %2973 = vmatpush1.bf16.msra.mxu0 %v8175_v16  ;;  %v3152_v16 = vld [vmem:[%s10359_s7 + $0x80] sm:$0xff] }
 0x4c4   :  { %2974 = vmatprep.subr.bf16.mxu0 %v8180_v17  ;;  %v3153_v17 = vld [vmem:[%s10359_s7 + $0x88] sm:$0xff] }
 0x4c7   :  { %2975 = vmatpush1.bf16.msra.mxu0 %v8178_v18  ;;  %v3136_v18 = vld [vmem:[%s10359_s7] sm:$0xff] }
 0x4c8   :  { %2976 = vmatprep.subr.bf16.mxu0 %v8183_v19  ;;  %v7759_v19 = vpack.c.bf16 %v3153_v17, %v3152_v16  ;;  %v8293_v16 = vld [vmem:[#allocation8 + $0x6a0] ss:$8 sps:$4 sm:$0xff]   ;;  %v8298_v17 = vld [vmem:[#allocation8 + $0x6b4] ss:$8 sps:$4 sm:$0xff]  }
 0x4ca   :  { %7760 = vmatprep.subr.bf16.mxu1 %v7759_v19  ;;  %v8301_v19 = vld [vmem:[#allocation8 + $0x6c4] ss:$8 sps:$4 sm:$0xff]  }
 0x4cb   :  { %2977 = vmatpush1.bf16.msra.mxu0 %v8181_v21  ;;  %v3137_v21 = vld [vmem:[%s10359_s7 + $0x8] sm:$0xff] }
 0x4cc   :  { %2978 = vmatprep.subr.bf16.mxu0 %v8186_v24  ;;  %v3154_v24 = vld [vmem:[%s10359_s7 + $0x90] sm:$0xff] }
 0x4cf   :  { %2979 = vmatpush1.bf16.msra.mxu0 %v8184_v25  ;;  %v3155_v25 = vld [vmem:[%s10359_s7 + $0x98] sm:$0xff] }
 0x4d0   :  { %2980 = vmatprep.subr.bf16.mxu0 %v8189_v29  ;;  %v7761_v29 = vpack.c.bf16 %v3137_v21, %v3136_v18  ;;  %v8296_v18 = vld [vmem:[#allocation8 + $0x6b0] ss:$8 sps:$4 sm:$0xff]   ;;  %v8299_v21 = vld [vmem:[#allocation8 + $0x6c0] ss:$8 sps:$4 sm:$0xff]  }
 0x4d2   :  { %7762 = vmatpush3.bf16.msra.mxu1 %v7761_v29  ;;  %v8307_v29 = vld [vmem:[#allocation8 + $0x6e4] ss:$8 sps:$4 sm:$0xff]  }
 0x4d3   :  { %2981 = vmatpush1.bf16.msra.mxu0 %v8187_v30  ;;  %v7763_v30 = vpack.c.bf16 %v3155_v25, %v3154_v24  ;;  %v8304_v24 = vld [vmem:[#allocation8 + $0x6d4] ss:$8 sps:$4 sm:$0xff]   ;;  %v8302_v25 = vld [vmem:[#allocation8 + $0x6d0] ss:$8 sps:$4 sm:$0xff]  }
 0x4d4   :  { %2982 = vmatprep.subr.bf16.mxu0 %v8192_v31  ;;  %v3138_v31 = vld [vmem:[%s10359_s7 + $0x10] sm:$0xff] }
 0x4d5   :  { %7764 = vmatprep.subr.bf16.mxu1 %v7763_v30  ;;  %v8305_v30 = vld [vmem:[#allocation8 + $0x6e0] ss:$8 sps:$4 sm:$0xff]  }
 0x4d7   :  { %2983 = vmatpush1.bf16.msra.mxu0 %v8190_v32  ;;  %v3139_v32 = vld [vmem:[%s10359_s7 + $0x18] sm:$0xff] }
 0x4d8   :  { %2984 = vmatprep.subr.bf16.mxu0 %v8195_v35  ;;  %v3156_v35 = vld [vmem:[%s10359_s7 + $0xa0] sm:$0xff] }
 0x4db   :  { %2985 = vmatpush1.bf16.msra.mxu0 %v8193_v36  ;;  %v3157_v36 = vld [vmem:[%s10359_s7 + $0xa8] sm:$0xff] }
 0x4dc   :  { %2986 = vmatprep.subr.bf16.mxu0 %v8198_v38  ;;  %v7765_v38 = vpack.c.bf16 %v3139_v32, %v3138_v31  ;;  %v8310_v31 = vld [vmem:[#allocation8 + $0x6f4] ss:$8 sps:$4 sm:$0xff]   ;;  %v6735_v32 = vcombine.low %v9449_v33, %v9375_v41  ;;  %v8320_v41 = vld [vmem:[#allocation8 + $0x724] ss:$8 sps:$4 sm:$0xff]   ;;  %v8324_v33 = vld [vmem:[#allocation8 + $0x740] ss:$8 sps:$4 sm:$0xff]  }
 0x4de   :  { %7766 = vmatpush3.bf16.msra.mxu1 %v7765_v38  ;;  %v8314_v38 = vld [vmem:[#allocation8 + $0x704] ss:$8 sps:$4 sm:$0xff]  }
 0x4df   :  { %2987 = vmatpush1.bf16.msra.mxu0 %v8196_v6  ;;  %v8243_v6 = vld [vmem:[#allocation8 + $0x5a0] ss:$8 sps:$4 sm:$0xff]  }
 0x4e0   :  { %2988 = vmatprep.subr.bf16.mxu0 %v8201_v13  ;;  %v7767_v13 = vpack.c.bf16 %v3157_v36, %v3156_v35  ;;  %v6738_v35 = vcombine.low %v9451_v49, %v9451_v49  ;;  %v8308_v36 = vld [vmem:[#allocation8 + $0x6f0] ss:$8 sps:$4 sm:$0xff]  }
 0x4e2   :  { %7768 = vmatprep.subr.bf16.mxu1 %v7767_v13  ;;  %v1341_v13 = vrot.slane %v6738_v35, 2  ;;  %v3150_v35 = vld [vmem:[%s10359_s7 + $0x70] sm:$0xff] }
 0x4e3   :  { %2989 = vmatpush1.bf16.msra.mxu0 %v8199_v40  ;;  %v8248_v40 = vld [vmem:[#allocation8 + $0x5b4] ss:$8 sps:$4 sm:$0xff]  }
 0x4e4   :  { %2990 = vmatprep.subr.bf16.mxu0 %v8204_v42  ;;  %v8246_v42 = vld [vmem:[#allocation8 + $0x5b0] ss:$8 sps:$4 sm:$0xff]  }
 0x4e7   :  { %2991 = vmatpush1.bf16.msra.mxu0 %v8202_v43  ;;  %v8251_v43 = vld [vmem:[#allocation8 + $0x5c4] ss:$8 sps:$4 sm:$0xff]  }
 0x4e8   :  { %2992 = vmatprep.subr.bf16.mxu0 %v8207_v44  ;;  %v8249_v44 = vld [vmem:[#allocation8 + $0x5c0] ss:$8 sps:$4 sm:$0xff]  }
 0x4eb   :  { %2993 = vmatpush1.bf16.msra.mxu0 %v8205_v48  ;;  %v8252_v48 = vld [vmem:[#allocation8 + $0x5d0] ss:$8 sps:$4 sm:$0xff]  }
 0x4ec   :  { %2994 = vmatprep.subr.bf16.mxu0 %v8210_v50  ;;  %v8257_v50 = vld [vmem:[#allocation8 + $0x5e4] ss:$8 sps:$4 sm:$0xff]  }
 0x4ef   :  { %2995 = vmatpush1.bf16.msra.mxu0 %v8208_v4  ;;  %v8260_v4 = vld [vmem:[#allocation8 + $0x5f4] ss:$8 sps:$4 sm:$0xff]  }
 0x4f0   :  { %3007 = vmatprep.subr.bf16.mxu0 %v8214_v51  ;;  %v6739_v51 = vcombine.high %v9451_v49, %v9451_v49  ;;  %v8329_v49 = vld [vmem:[#allocation8 + $0x754] ss:$8 sps:$4 sm:$0xff]  }
 0x4f2   :  { %2997 = vmatmul.mubr.bf16.vlgmr.msra.gmra.mrb[20].mxu0 %v1291_v20  ;;  %v1344_v20 = vrot.slane %v6739_v51, 2  ;;  %v1238_v51 = vld [vmem:[#allocation2 + $0x8] sm:$0xc] }
 0x4f3   :  { %3008 = vmatpush1.bf16.msra.mxu0 %v8212_v5  ;;  %3039 = vmatprep.mubr.bf16.mxu0 %v1320_v46  ;;  %v1343_v5 = vrot.slane %v6736_v27, 2  ;;  %v8268_v46 = vld [vmem:[#allocation8 + $0x614] ss:$8 sps:$4 sm:$0xff]   ;;  %v8332_v27 = vld [vmem:[#allocation8 + $0x764] ss:$8 sps:$4 sm:$0xff]  }
 0x4f4   :  { %3009 = vmatprep.subr.bf16.mxu0 %v8218_v28  ;;  %v8262_v28 = vld [vmem:[#allocation8 + $0x600] ss:$8 sps:$4 sm:$0xff]  }
 0x4f7   :  { %3010 = vmatpush1.bf16.msra.mxu0 %v8216_v37  ;;  %v1345_v37 = vsel %vm1311_vm5, %v1343_v5, %v1344_v20  ;;  %v8337_v5 = vld [vmem:[#allocation2 + $0x20] ss:$0 sps:$4 sm:$0x11]   ;;  %v8333_v20 = vld [vmem:[#allocation8 + $0x770] ss:$8 sps:$4 sm:$0xff]  }
 0x4f8   :  { %3011 = vmatprep.subr.bf16.mxu0 %v8221_v58  ;;  %v8266_v58 = vld [vmem:[#allocation8 + $0x610] ss:$8 sps:$4 sm:$0xff]  }
 0x4fb   :  { %3012 = vmatpush1.bf16.msra.mxu0 %v8219_v59  ;;  %v8271_v59 = vld [vmem:[#allocation8 + $0x624] ss:$8 sps:$4 sm:$0xff]  }
 0x4fc   :  { %3013 = vmatprep.subr.bf16.mxu0 %v8224_v61  ;;  %v8269_v61 = vld [vmem:[#allocation8 + $0x620] ss:$8 sps:$4 sm:$0xff]  }
 0x4ff   :  { %3014 = vmatpush1.bf16.msra.mxu0 %v8222_v62  ;;  %v8274_v62 = vld [vmem:[#allocation8 + $0x634] ss:$8 sps:$4 sm:$0xff]  }
 0x500   :  { %3015 = vmatprep.subr.bf16.mxu0 %v8227_v2  ;;  %v8272_v2 = vld [vmem:[#allocation8 + $0x630] ss:$8 sps:$4 sm:$0xff]  }
 0x503   :  { %3016 = vmatpush1.bf16.msra.mxu0 %v8225_v3  ;;  %v8277_v3 = vld [vmem:[#allocation8 + $0x644] ss:$8 sps:$4 sm:$0xff]  }
 0x504   :  { %3017 = vmatprep.subr.bf16.mxu0 %v8230_v7  ;;  %v8275_v7 = vld [vmem:[#allocation8 + $0x640] ss:$8 sps:$4 sm:$0xff]  }
 0x507   :  { %3018 = vmatpush1.bf16.msra.mxu0 %v8228_v8  ;;  %v8280_v8 = vld [vmem:[#allocation8 + $0x654] ss:$8 sps:$4 sm:$0xff]  }
 0x508   :  { %3019 = vmatprep.subr.bf16.mxu0 %v8233_v9  ;;  %v8283_v9 = vld [vmem:[#allocation8 + $0x664] ss:$8 sps:$4 sm:$0xff]  }
 0x50b   :  { %3020 = vmatpush1.bf16.msra.mxu0 %v8231_v10  ;;  %v8281_v10 = vld [vmem:[#allocation8 + $0x660] ss:$8 sps:$4 sm:$0xff]  }
 0x50c   :  { %3021 = vmatprep.subr.bf16.mxu0 %v8236_v45  ;;  %v8286_v45 = vld [vmem:[#allocation8 + $0x674] ss:$8 sps:$4 sm:$0xff]  }
 0x50f   :  { %3022 = vmatpush1.bf16.msra.mxu0 %v8234_v39  ;;  %v8284_v39 = vld [vmem:[#allocation8 + $0x670] ss:$8 sps:$4 sm:$0xff]  }
 0x510   :  { %3023 = vmatprep.subr.bf16.mxu0 %v8239_v55  ;;  %v8289_v55 = vld [vmem:[#allocation8 + $0x684] ss:$8 sps:$4 sm:$0xff]  }
 0x513   :  { %3024 = vmatpush1.bf16.msra.mxu0 %v8237_v11  ;;  %v8287_v11 = vld [vmem:[#allocation8 + $0x680] ss:$8 sps:$4 sm:$0xff]  }
 0x514   :  { %3025 = vmatprep.subr.bf16.mxu0 %v8242_v12  ;;  %v8292_v12 = vld [vmem:[#allocation8 + $0x694] ss:$8 sps:$4 sm:$0xff]  }
 0x517   :  { %3026 = vmatpush1.bf16.msra.mxu0 %v8240_v14  ;;  %v8290_v14 = vld [vmem:[#allocation8 + $0x690] ss:$8 sps:$4 sm:$0xff]  }
 0x518   :  { %3027 = vmatprep.subr.bf16.mxu0 %v8245_v15  ;;  %v8295_v15 = vld [vmem:[#allocation8 + $0x6a4] ss:$8 sps:$4 sm:$0xff]  }
 0x51b   :  { %3028 = vmatpush1.bf16.msra.mxu0 %v8243_v6  ;;  %v1340_v6 = vrot.slane %v6735_v32, 2 }
 0x51c   :  { %3029 = vmatprep.subr.bf16.mxu0 %v8248_v40  ;;  %v8312_v40 = vld [vmem:[#allocation8 + $0x700] ss:$8 sps:$4 sm:$0xff]  }
 0x51f   :  { %3030 = vmatpush1.bf16.msra.mxu0 %v8246_v42  ;;  %v8317_v42 = vld [vmem:[#allocation8 + $0x714] ss:$8 sps:$4 sm:$0xff]  }
 0x520   :  { %3031 = vmatprep.subr.bf16.mxu0 %v8251_v43  ;;  %v1342_v43 = vsel %vm1311_vm5, %v1340_v6, %v1341_v13 }
 0x523   :  { %3032 = vmatpush1.bf16.msra.mxu0 %v8249_v44  ;;  %v8315_v44 = vld [vmem:[#allocation8 + $0x710] ss:$8 sps:$4 sm:$0xff]  }
 0x524   :  { %3033 = vmatprep.subr.bf16.mxu0 %v8254_v47  ;;  %v8318_v47 = vld [vmem:[#allocation8 + $0x720] ss:$8 sps:$4 sm:$0xff]  }
 0x527   :  { %3034 = vmatpush1.bf16.msra.mxu0 %v8252_v48  ;;  %v8323_v48 = vld [vmem:[#allocation8 + $0x734] ss:$8 sps:$4 sm:$0xff]  }
 0x528   :  { %3035 = vmatprep.subr.bf16.mxu0 %v8257_v50  ;;  %v8321_v50 = vld [vmem:[#allocation8 + $0x730] ss:$8 sps:$4 sm:$0xff]  }
 0x52b   :  { %3036 = vmatpush1.bf16.msra.mxu0 %v8255_v0  ;;  %v8326_v0 = vld [vmem:[#allocation8 + $0x744] ss:$8 sps:$4 sm:$0xff]  }
 0x52c   :  { %3037 = vmatprep.subr.bf16.mxu0 %v8260_v4  ;;  %v8327_v4 = vld [vmem:[#allocation8 + $0x750] ss:$8 sps:$4 sm:$0xff]  }
 0x52f   :  { %3038 = vmatpush1.bf16.msra.mxu0 %v8258_v52  ;;  %v8335_v52 = vld [vmem:[#allocation8 + $0x774] ss:$8 sps:$4 sm:$0xff]  }
 0x530   :  { %3050 = vmatprep.subr.bf16.mxu0 %v8264_v56  ;;  %v6737_v56 = vcombine.low %v1238_v51, %v9414_v23  ;;  %v3141_v23 = vld [vmem:[%s10359_s7 + $0x28] sm:$0xff] }
 0x532   :  { %3040 = vmatmul.mubr.bf16.vlgmr.msra.gmra.mrb[20].mxu0 %v9395_v60  ;;  %v8278_v60 = vld [vmem:[#allocation8 + $0x650] ss:$8 sps:$4 sm:$0xff]  }
 0x533   :  { %3051 = vmatpush1.bf16.msra.mxu0 %v8262_v28  ;;  %3082 = vmatprep.mubr.bf16.mxu0 %v1345_v37  ;;  %v1346_v28 = vrot.slane %v6737_v56, 2 }
 0x534   :  { %3052 = vmatprep.subr.bf16.mxu0 %v8268_v46  ;;  %v1347_v46 = vrot.slane %v8337_v5, 2 }
 0x536   :  { %v1348_v37 = vsel %vm1311_vm5, %v1346_v28, %v1347_v46 }
 0x537   :  { %3053 = vmatpush1.bf16.msra.mxu0 %v8266_v58  ;;  %v3140_v58 = vld [vmem:[%s10359_s7 + $0x20] sm:$0xff] }
 0x538   :  { %3054 = vmatprep.subr.bf16.mxu0 %v8271_v59  ;;  %v7769_v59 = vpack.c.bf16 %v3141_v23, %v3140_v58 }
 0x53a   :  { %7770 = vmatpush3.bf16.msra.mxu1 %v7769_v59 }
 0x53b   :  { %3055 = vmatpush1.bf16.msra.mxu0 %v8269_v61  ;;  %v3158_v61 = vld [vmem:[%s10359_s7 + $0xb0] sm:$0xff] }
 0x53c   :  { %3056 = vmatprep.subr.bf16.mxu0 %v8274_v62  ;;  %v3159_v62 = vld [vmem:[%s10359_s7 + $0xb8] sm:$0xff] }
 0x53f   :  { %3057 = vmatpush1.bf16.msra.mxu0 %v8272_v2  ;;  %v7771_v2 = vpack.c.bf16 %v3159_v62, %v3158_v61 }
 0x540   :  { %3058 = vmatprep.subr.bf16.mxu0 %v8277_v3  ;;  %v3142_v3 = vld [vmem:[%s10359_s7 + $0x30] sm:$0xff] }
 0x541   :  { %7772 = vmatprep.subr.bf16.mxu1 %v7771_v2 }
 0x543   :  { %3059 = vmatpush1.bf16.msra.mxu0 %v8275_v7  ;;  %v3143_v7 = vld [vmem:[%s10359_s7 + $0x38] sm:$0xff] }
 0x544   :  { %3060 = vmatprep.subr.bf16.mxu0 %v8280_v8  ;;  %v7773_v8 = vpack.c.bf16 %v3143_v7, %v3142_v3 }
 0x546   :  { %7774 = vmatpush3.bf16.msra.mxu1 %v7773_v8 }
 0x547   :  { %3061 = vmatpush1.bf16.msra.mxu0 %v8278_v60  ;;  %v3160_v60 = vld [vmem:[%s10359_s7 + $0xc0] sm:$0xff] }
 0x548   :  { %3062 = vmatprep.subr.bf16.mxu0 %v8283_v9  ;;  %v3161_v9 = vld [vmem:[%s10359_s7 + $0xc8] sm:$0xff] }
 0x54b   :  { %3063 = vmatpush1.bf16.msra.mxu0 %v8281_v10  ;;  %v3144_v10 = vld [vmem:[%s10359_s7 + $0x40] sm:$0xff] }
 0x54c   :  { %3064 = vmatprep.subr.bf16.mxu0 %v8286_v45  ;;  %v7775_v45 = vpack.c.bf16 %v3161_v9, %v3160_v60 }
 0x54e   :  { %7776 = vmatprep.subr.bf16.mxu1 %v7775_v45 }
 0x54f   :  { %3065 = vmatpush1.bf16.msra.mxu0 %v8284_v39  ;;  %v3145_v39 = vld [vmem:[%s10359_s7 + $0x48] sm:$0xff] }
 0x550   :  { %3066 = vmatprep.subr.bf16.mxu0 %v8289_v55  ;;  %v3162_v55 = vld [vmem:[%s10359_s7 + $0xd0] sm:$0xff] }
 0x553   :  { %3067 = vmatpush1.bf16.msra.mxu0 %v8287_v11  ;;  %v3163_v11 = vld [vmem:[%s10359_s7 + $0xd8] sm:$0xff] }
 0x554   :  { %3068 = vmatprep.subr.bf16.mxu0 %v8292_v12  ;;  %v7777_v12 = vpack.c.bf16 %v3145_v39, %v3144_v10 }
 0x556   :  { %7778 = vmatpush3.bf16.msra.mxu1 %v7777_v12 }
 0x557   :  { %3069 = vmatpush1.bf16.msra.mxu0 %v8290_v14  ;;  %v7779_v14 = vpack.c.bf16 %v3163_v11, %v3162_v55 }
 0x558   :  { %3070 = vmatprep.subr.bf16.mxu0 %v8295_v15  ;;  %v3146_v15 = vld [vmem:[%s10359_s7 + $0x50] sm:$0xff] }
 0x559   :  { %7780 = vmatprep.subr.bf16.mxu1 %v7779_v14 }
 0x55b   :  { %3071 = vmatpush1.bf16.msra.mxu0 %v8293_v16  ;;  %v3147_v16 = vld [vmem:[%s10359_s7 + $0x58] sm:$0xff] }
 0x55c   :  { %3072 = vmatprep.subr.bf16.mxu0 %v8298_v17  ;;  %v3164_v17 = vld [vmem:[%s10359_s7 + $0xe0] sm:$0xff] }
 0x55f   :  { %3073 = vmatpush1.bf16.msra.mxu0 %v8296_v18  ;;  %v3165_v18 = vld [vmem:[%s10359_s7 + $0xe8] sm:$0xff] }
 0x560   :  { %3074 = vmatprep.subr.bf16.mxu0 %v8301_v19  ;;  %v7781_v19 = vpack.c.bf16 %v3147_v16, %v3146_v15  ;;  %v3169_v15 = vld [vmem:[#allocation13 + $0x8] sm:$0xff]  ;;  %v3171_v16 = vld [vmem:[#allocation13 + $0x18] sm:$0xff] }
 0x562   :  { %7782 = vmatpush3.bf16.msra.mxu1 %v7781_v19  ;;  %v3170_v19 = vld [vmem:[#allocation13 + $0x10] sm:$0xff] }
 0x563   :  { %3075 = vmatpush1.bf16.msra.mxu0 %v8299_v21  ;;  %v7783_v21 = vpack.c.bf16 %v3165_v18, %v3164_v17  ;;  %v3168_v17 = vld [vmem:[#allocation13] sm:$0xff]  ;;  %v7791_v18 = vpack.c.bf16 %v3171_v16, %v3169_v15 }
 0x564   :  { %3076 = vmatprep.subr.bf16.mxu0 %v8304_v24  ;;  %v3148_v24 = vld [vmem:[%s10359_s7 + $0x60] sm:$0xff]  ;;  %v3176_v16 = vld [vmem:[#allocation14] sm:$0x3] }
 0x565   :  { %7784 = vmatprep.subr.bf16.mxu1 %v7783_v21  ;;  %v3173_v21 = vld [vmem:[#allocation13 + $0x28] sm:$0xff] }
 0x567   :  { %3077 = vmatpush1.bf16.msra.mxu0 %v8302_v25  ;;  %v3149_v25 = vld [vmem:[%s10359_s7 + $0x68] sm:$0xff] }
 0x568   :  { %3078 = vmatprep.subr.bf16.mxu0 %v8307_v29  ;;  %v3166_v29 = vld [vmem:[%s10359_s7 + $0xf0] sm:$0xff] }
 0x56b   :  { %3079 = vmatpush1.bf16.msra.mxu0 %v8305_v30  ;;  %v3167_v30 = vld [vmem:[%s10359_s7 + $0xf8] sm:$0xff] }
 0x56c   :  { %3080 = vmatprep.subr.bf16.mxu0 %v8310_v31  ;;  %v7785_v31 = vpack.c.bf16 %v3149_v25, %v3148_v24  ;;  %v7787_v32 = vpack.c.bf16 %v3167_v30, %v3166_v29  ;;  %v3175_v24 = vld [vmem:[#allocation13 + $0x38] sm:$0xff]  ;;  %v7793_v25 = vpack.c.bf16 %v3170_v19, %v3168_v17  ;;  %v3172_v30 = vld [vmem:[#allocation13 + $0x20] sm:$0xff] }
 0x56d   :  { %v7795_v29 = vpack.c.bf16 %v3175_v24, %v3173_v21 }
 0x56e   :  { %7786 = vmatpush3.bf16.msra.mxu1 %v7785_v31  ;;  %v3174_v31 = vld [vmem:[#allocation13 + $0x30] sm:$0xff] }
 0x56f   :  { %3081 = vmatpush1.bf16.msra.mxu0 %v8308_v36  ;;  %v3151_v36 = vld [vmem:[%s10359_s7 + $0x78] sm:$0xff]  ;;  %7788 = vmatprep.subr.bf16.mxu1 %v7787_v32 }
 0x570   :  { %3093 = vmatprep.subr.bf16.mxu0 %v8314_v38  ;;  %v7789_v38 = vpack.c.bf16 %v3151_v36, %v3150_v35  ;;  %v8338_v32 = vld [vmem:[#allocation10 + $0x40] sm:$0xff]   ;;  %v7797_v36 = vpack.c.bf16 %v3174_v31, %v3172_v30 }
 0x571   :  { %v8339_v35 = vld [vmem:[#allocation10] sm:$0xff]  }
 0x572   :  { %3083 = vmatmul.mubr.bf16.vlgmr.msra.gmra.mrb[20].mxu0 %v1342_v43  ;;  %7790 = vmatpush3.bf16.msra.mxu1 %v7789_v38 }
 0x573   :  { %3094 = vmatpush1.bf16.msra.mxu0 %v8312_v40  ;;  %3125 = vmatprep.mubr.bf16.mxu0 %v8810_v1  ;;  %v8330_v1 = vld [vmem:[#allocation8 + $0x760] ss:$8 sps:$4 sm:$0xff]  }
 0x574   :  { %3095 = vmatprep.subr.bf16.mxu0 %v8317_v42  ;;  %7432 = vmatprep.subr.bf16.mxu1 %v8338_v32 }
 0x577   :  { %3096 = vmatpush1.bf16.msra.mxu0 %v8315_v44 }
 0x578   :  { %3097 = vmatprep.subr.bf16.mxu0 %v8320_v41 }
 0x57b   :  { %3098 = vmatpush1.bf16.msra.mxu0 %v8318_v47 }
 0x57c   :  { %3099 = vmatprep.subr.bf16.mxu0 %v8323_v48 }
 0x57f   :  { %3100 = vmatpush1.bf16.msra.mxu0 %v8321_v50 }
 0x580   :  { %3101 = vmatprep.subr.bf16.mxu0 %v8326_v0 }
 0x583   :  { %3102 = vmatpush1.bf16.msra.mxu0 %v8324_v33 }
 0x584   :  { %3103 = vmatprep.subr.bf16.mxu0 %v8329_v49 }
 0x587   :  { %3104 = vmatpush1.bf16.msra.mxu0 %v8327_v4 }
 0x588   :  { %3105 = vmatprep.subr.bf16.mxu0 %v8332_v27 }
 0x58b   :  { %3106 = vmatpush1.bf16.msra.mxu0 %v8330_v1 }
 0x58c   :  { %3107 = vmatprep.subr.bf16.mxu0 %v8335_v52 }
 0x58f   :  { %3108 = vmatpush1.bf16.msra.mxu0 %v8333_v20 }
 0x590   :  { %7792 = vmatprep.subr.bf16.mxu0 %v7791_v18 }
 0x592   :  { %3126 = vmatmul.mubr.bf16.vlgmr.msra.gmra.mrb[20].mxu0 %v1348_v37 }
 0x593   :  { %3371 = vmatprep.mubr.f32.mxu0 %v8813_v57  ;;  %7794 = vmatpush1.bf16.msra.mxu0 %v7793_v25 }
 0x594   :  { %7796 = vmatprep.subr.bf16.mxu0 %v7795_v29 }
 0x597   :  { %7798 = vmatpush1.bf16.msra.mxu0 %v7797_v36 }
 0x665   :  { %v9534_v6 = vpop.f32.mrb[20].mxu0 }
 0x666   :  { %v9536_v13 = vpop.f32.mrb[21].mxu0  ;;  %v3194_v41 = vmul.f32 %v9534_v6, %v9534_v6 }
 0x667   :  { %v9538_v40 = vpop.f32.mrb[22].mxu0  ;;  %v3195_v0 = vmul.f32 %v9536_v13, %v9536_v13 }
 0x668   :  { %v3178_v42 = vsel %vm1311_vm5, %v9538_v40, 0.0  ;;  %v3196_v43 = vmul.f32 %v9538_v40, %v9538_v40  ;;  %v9544_v44 = vpop.f32.mrb[23].mxu0 }
 0x669   :  { %v3179_v47 = vadd.f32 %v3178_v42, %v9534_v6  ;;  %v3186_v48 = vsel %vm1311_vm5, %v9544_v44, 0.0  ;;  %v3197_v50 = vmul.f32 %v9544_v44, %v9544_v44 }
 0x66a   :  { %v3198_v33 = vsel %vm1311_vm5, %v3196_v43, 0.0  ;;  %v3187_v49 = vadd.f32 %v3186_v48, %v9536_v13 }
 0x66b   :  { %v3180_v4 = vrot.slane %v3179_v47, 4  ;;  %v3199_v27 = vadd.f32 %v3198_v33, %v3194_v41  ;;  %v3206_v51 = vsel %vm1311_vm5, %v3197_v50, 0.0 }
 0x66c   :  { %v3188_v1 = vrot.slane %v3187_v49, 4  ;;  %v3207_v52 = vadd.f32 %v3206_v51, %v3195_v0 }
 0x66d   :  { %v3181_v56 = vadd.f32 %v3180_v4, %v3179_v47  ;;  %v3200_v5 = vrot.slane %v3199_v27, 4 }
 0x66e   :  { %v3189_v20 = vadd.f32 %v3188_v1, %v3187_v49  ;;  %v3208_v28 = vrot.slane %v3207_v52, 4 }
 0x66f   :  { %v3182_v46 = vrot.slane %v3181_v56, 2  ;;  %v3201_v37 = vadd.f32 %v3200_v5, %v3199_v27  ;;  %v8342_v5 = vld [vmem:[#allocation10 + $0x50] sm:$0xff]  }
 0x670   :  { %v3190_v58 = vrot.slane %v3189_v20, 2  ;;  %v3209_v23 = vadd.f32 %v3208_v28, %v3207_v52  ;;  %v8340_v52 = vld [vmem:[#allocation10 + $0x48] sm:$0xff]   ;;  %v8344_v28 = vld [vmem:[#allocation10 + $0x58] sm:$0xff]  }
 0x671   :  { %v3183_v59 = vadd.f32 %v3182_v46, %v3181_v56  ;;  %v3202_v61 = vrot.slane %v3201_v37, 2  ;;  %v8341_v56 = vld [vmem:[#allocation10 + $0x8] sm:$0xff]   ;;  %v8345_v46 = vld [vmem:[#allocation10 + $0x18] sm:$0xff]  }
 0x672   :  { %v3191_v62 = vadd.f32 %v3190_v58, %v3189_v20  ;;  %v3210_v2 = vrot.slane %v3209_v23, 2  ;;  %v8343_v20 = vld [vmem:[#allocation10 + $0x10] sm:$0xff]   ;;  %v8347_v58 = vld [vmem:[#allocation10 + $0x20] sm:$0xff]  }
 0x673   :  { %v3184_v3 = vrot.slane %v3183_v59, 1  ;;  %v3203_v7 = vadd.f32 %v3202_v61, %v3201_v37  ;;  %v8346_v37 = vld [vmem:[#allocation10 + $0x60] sm:$0xff]   ;;  %v8350_v61 = vld [vmem:[#allocation10 + $0x70] sm:$0xff]  }
 0x674   :  { %v3192_v8 = vrot.slane %v3191_v62, 1  ;;  %v3211_v60 = vadd.f32 %v3210_v2, %v3209_v23  ;;  %v8348_v23 = vld [vmem:[#allocation10 + $0x68] sm:$0xff]   ;;  %v8352_v2 = vld [vmem:[#allocation10 + $0x78] sm:$0xff]  }
 0x675   :  { %v3204_v9 = vrot.slane %v3203_v7, 1  ;;  %v3185_v45 = vadd.f32 %v3184_v3, %v3183_v59  ;;  %v8349_v59 = vld [vmem:[#allocation10 + $0x28] sm:$0xff]   ;;  %v8353_v3 = vld [vmem:[#allocation10 + $0x38] sm:$0xff]  }
 0x676   :  { %v3212_v10 = vrot.slane %v3211_v60, 1  ;;  %v3193_v55 = vadd.f32 %v3192_v8, %v3191_v62  ;;  %v8351_v62 = vld [vmem:[#allocation10 + $0x30] sm:$0xff]  }
 0x677   :  { %v3205_v39 = vadd.f32 %v3204_v9, %v3203_v7  ;;  %v8356_v7 = vld [vmem:[#allocation10 + $0xc0] sm:$0xff]  }
 0x678   :  { %v3213_v11 = vadd.f32 %v3212_v10, %v3211_v60 }
 0x679   :  { %v3214_v12 = vsel %vm751_vm3, %v3185_v45, %v3205_v39 }
 0x67a   :  { %v3215_v14 = vsel %vm751_vm3, %v3193_v55, %v3213_v11 }
 0x67b   :  { %3280 = vmatprep.mubr.f32.mxu1 %v3215_v14 }
 0x67c   :  { %3281 = vmatmul.mubr.f32.vlgmr.msra.gmra.mrb[14].mxu1 %v3214_v12 }
 0x67d   :  { %7433 = vmatpush3.bf16.msra.mxu1 %v8339_v35 }
 0x67e   :  { %7434 = vmatprep.subr.bf16.mxu1 %v8340_v52  ;;  %v8369_v52 = vld [vmem:[#allocation10 + $0xa8] sm:$0xff]  }
 0x681   :  { %7435 = vmatpush3.bf16.msra.mxu1 %v8341_v56  ;;  %v8370_v56 = vld [vmem:[#allocation10 + $0xf0] sm:$0xff]  }
 0x682   :  { %7436 = vmatprep.subr.bf16.mxu1 %v8342_v5  ;;  %v8371_v5 = vld [vmem:[#allocation10 + $0xb0] sm:$0xff]  }
 0x685   :  { %7437 = vmatpush3.bf16.msra.mxu1 %v8343_v20  ;;  %v8372_v20 = vld [vmem:[#allocation10 + $0xf8] sm:$0xff]  }
 0x686   :  { %7438 = vmatprep.subr.bf16.mxu1 %v8344_v28 }
 0x689   :  { %7439 = vmatpush3.bf16.msra.mxu1 %v8345_v46  ;;  %v8373_v46 = vld [vmem:[#allocation10 + $0xb8] sm:$0xff]  }
 0x68a   :  { %7440 = vmatprep.subr.bf16.mxu1 %v8346_v37 }
 0x68d   :  { %7441 = vmatpush3.bf16.msra.mxu1 %v8347_v58  ;;  %v8374_v58 = vld [vmem:[#allocation10 + $0x140] sm:$0xff]  }
 0x68e   :  { %7442 = vmatprep.subr.bf16.mxu1 %v8348_v23 }
 0x691   :  { %7443 = vmatpush3.bf16.msra.mxu1 %v8349_v59  ;;  %v8375_v59 = vld [vmem:[#allocation10 + $0x100] sm:$0xff]  }
 0x692   :  { %7444 = vmatprep.subr.bf16.mxu1 %v8350_v61 }
 0x695   :  { %7445 = vmatpush3.bf16.msra.mxu1 %v8351_v62  ;;  %v8378_v62 = vld [vmem:[#allocation10 + $0x148] sm:$0xff]  }
 0x696   :  { %7446 = vmatprep.subr.bf16.mxu1 %v8352_v2 }
 0x699   :  { %7447 = vmatpush3.bf16.msra.mxu1 %v8353_v3  ;;  %v8379_v3 = vld [vmem:[#allocation10 + $0x108] sm:$0xff]  }
 0x69a   :  { %7454 = vmatprep.subr.bf16.mxu1 %v8356_v7  ;;  %v8380_v7 = vld [vmem:[#allocation10 + $0x150] sm:$0xff]  }
 0x74f   :  { %v7429_v38 = vpop.f32.mrb[14].mxu1 }
 0x750   :  { %v7430_v42 = vpop.f32.mrb[15].mxu1 }
 0x751   :  { %v7431_v43 = vadd.f32 %v7430_v42, %v7429_v38 }
 0x753   :  { %v3286_v41 = vmul.f32 0.010204081, %v7431_v43  ;;  %v8357_v43 = vld [vmem:[#allocation10 + $0x80] sm:$0xff]  }
 0x755   :  { %v3287_v47 = vmul.f32 %v3286_v41, %v3286_v41 }
 0x757   :  { %v3289_v48 = vrot.slane %v3287_v47, 7  ;;  %v8360_v47 = vld [vmem:[#allocation10 + $0xc8] sm:$0xff]  }
 0x759   :  { %v3291_v50 = vsub.f32 %v3286_v41, %v3289_v48 }
 0x75b   :  { %v3292_v0 = vmax.f32 %v3291_v50, 0.0  ;;  %v8361_v50 = vld [vmem:[#allocation10 + $0x88] sm:$0xff]  }
 0x75d   :  { %v3293_v33 = vadd.f32 1e-05, %v3292_v0  ;;  %v8362_v0 = vld [vmem:[#allocation10 + $0xd0] sm:$0xff]  }
 0x75f   :  { %8474 = vrsqrt.f32 %v3293_v33  ;;  %v8363_v33 = vld [vmem:[#allocation10 + $0x90] sm:$0xff]  }
 0x769   :  { %v8475_v49 = vpop.eup %8474 }
 0x76a   :  { %v3296_v4 = vrot.slane %v8475_v49, 1  ;;  %v8364_v49 = vld [vmem:[#allocation10 + $0xd8] sm:$0xff]  }
 0x76c   :  { %v3298_v27 = vmul.f32 %v3296_v4, %v3286_v41 }
 0x76e   :  { %v3300_v51 = vrot.slane %v3298_v27, 7  ;;  %v8366_v27 = vld [vmem:[#allocation10 + $0xe0] sm:$0xff]  }
 0x770   :  { %v3302_v1 = vsel %vm751_vm3, %v3296_v4, %v3300_v51  ;;  %v8365_v4 = vld [vmem:[#allocation10 + $0x98] sm:$0xff]   ;;  %v8367_v51 = vld [vmem:[#allocation10 + $0xa0] sm:$0xff]  }
 0x771   :  { %6981 = vmatmul.mubr.msk.f32.vlgmr.msra.gmra.mrb[18].mxu0 %vm3303_vm6, %v3302_v1  ;;  %v8368_v1 = vld [vmem:[#allocation10 + $0xe8] sm:$0xff]  }
 0x844   :  { %v3373_v8 = vpop.f32.mrb[18].mxu0 }
 0x845   :  { %v3381_v60 = vrot.slane %v3373_v8, %v9338_v26  ;;  %v3375_v9 = vpop.f32.mrb[19].mxu0 }
 0x846   :  { %v3385_v10 = vrot.slane %v3375_v9, %v9338_v26  ;;  %v3392_v45 = vcombine.low %v3373_v8, %v3375_v9  ;;  %v8381_v8 = vld [vmem:[#allocation10 + $0x110] sm:$0xff]   ;;  %v8383_v9 = vld [vmem:[#allocation10 + $0x118] sm:$0xff]  }
 0x847   :  { %v3386_v39 = vmul.f32 %v3381_v60, %v9534_v6  ;;  %v3388_v55 = vmul.f32 %v3381_v60, %v9538_v40  ;;  %v8382_v60 = vld [vmem:[#allocation10 + $0x158] sm:$0xff]  }
 0x848   :  { %v3387_v11 = vmul.f32 %v3385_v10, %v9536_v13  ;;  %v3389_v12 = vmul.f32 %v3385_v10, %v9544_v44  ;;  %v3399_v14 = vrot.slane %v3392_v45, %v9342_v34  ;;  %v8384_v10 = vld [vmem:[#allocation10 + $0x160] sm:$0xff]  }
 0x849   :  { %v8385_v45 = vld [vmem:[#allocation10 + $0x120] sm:$0xff]  }
 0x84a   :  { %v3400_v15 = vcombine.high %v3399_v14, %v3399_v14  ;;  %v8390_v14 = vld [vmem:[#allocation10 + $0x178] sm:$0xff]  }
 0x84c   :  { %v3407_v17 = vrot.slane %v3400_v15, %v9342_v34 }
 0x84e   :  { %v3409_v18 = vsub.f32 %v3176_v16, %v3407_v17  ;;  %v8391_v16 = vld [vmem:[#allocation10 + $0x138] sm:$0xff]  }
 0x850   :  { %v3414_v19 = vrot.slane %v3409_v18, %v9338_v26  ;;  %v3418_v21 = vrot.slane %v3409_v18, %v9368_v53  ;;  %v8392_v18 = vld [vmem:[#allocation10 + $0x1c0] sm:$0xff]  }
 0x852   :  { %v3421_v24 = vadd.f32 %v3414_v19, %v3386_v39  ;;  %v3422_v25 = vadd.f32 %v3418_v21, %v3387_v11  ;;  %v3423_v6 = vadd.f32 %v3414_v19, %v3388_v55  ;;  %v3424_v29 = vadd.f32 %v3418_v21, %v3389_v12  ;;  %v8386_v39 = vld [vmem:[#allocation10 + $0x168] sm:$0xff]   ;;  %v8388_v11 = vld [vmem:[#allocation10 + $0x170] sm:$0xff]   ;;  %v8393_v21 = vld [vmem:[#allocation10 + $0x180] sm:$0xff]  }
 0x853   :  { %v8387_v55 = vld [vmem:[#allocation10 + $0x128] sm:$0xff]   ;;  %v8389_v12 = vld [vmem:[#allocation10 + $0x130] sm:$0xff]  }
 0x854   :  { %v3425_v40 = vmax.f32 %v3421_v24, 0.0  ;;  %v3426_v30 = vmax.f32 %v3422_v25, 0.0  ;;  %v3427_v13 = vmax.f32 %v3423_v6, 0.0  ;;  %v3428_v31 = vmax.f32 %v3424_v29, 0.0  ;;  %v8396_v25 = vld [vmem:[#allocation10 + $0x1c8] sm:$0xff]  }
 0x855   :  { %v8397_v29 = vld [vmem:[#allocation10 + $0x188] sm:$0xff]  }
 0x856   :  { %v7340_v44 = vpack.c.bf16 %v3426_v30, %v3425_v40  ;;  %v7341_v32 = vpack.c.bf16 %v3428_v31, %v3427_v13  ;;  %v8398_v40 = vld [vmem:[#allocation10 + $0x1d0] sm:$0xff]   ;;  %v8400_v13 = vld [vmem:[#allocation10 + $0x1d8] sm:$0xff]  }
 0x857   :  { %v8399_v30 = vld [vmem:[#allocation10 + $0x190] sm:$0xff]   ;;  %v8401_v31 = vld [vmem:[#allocation10 + $0x198] sm:$0xff]  }
 0x858   :  { %3441 = vst [vmem:[#allocation3] sm:$0xff] %v7340_v44  ;;  %3442 = vst [vmem:[#allocation3 + $0x8] sm:$0x77] %v7341_v32  ;;  %v8402_v44 = vld [vmem:[#allocation10 + $0x1e0] sm:$0xff]  }
 0x859   :  { %v8403_v32 = vld [vmem:[#allocation10 + $0x1a0] sm:$0xff]  }
 0x85f   :  { %v3443_v35 = vld [vmem:[#allocation3] sm:$0x11]  ;;  %v3444_v36 = vld [vmem:[#allocation3] sm:$0x22]  ;;  %v3445_v28 = vld [vmem:[#allocation3] sm:$0x44] }
 0x860   :  { %v6984_v38 = vcombine.low %v3443_v35, %v3443_v35  ;;  %v6985_v42 = vcombine.high %v3443_v35, %v3443_v35  ;;  %v6987_v41 = vcombine.high %v3444_v36, %v3444_v36  ;;  %v6986_v37 = vcombine.low %v3444_v36, %v3444_v36  ;;  %v3446_v15 = vld [vmem:[#allocation3] sm:$0x88] }
 0x861   :  { %v6989_v23 = vcombine.high %v3445_v28, %v3445_v28  ;;  %v6988_v17 = vcombine.low %v3445_v28, %v3445_v28  ;;  %v6991_v19 = vcombine.high %v3446_v15, %v3446_v15  ;;  %v8404_v35 = vld [vmem:[#allocation10 + $0x1e8] sm:$0xff]  }
 0x862   :  { %4437 = vmatprep.mubr.bf16.mxu1 %v6985_v42  ;;  %v3463_v48 = vrot.slane %v6987_v41, 1  ;;  %v3462_v61 = vrot.slane %v6986_v37, 1  ;;  %v8405_v36 = vld [vmem:[#allocation10 + $0x1a8] sm:$0xff]   ;;  %v8407_v42 = vld [vmem:[#allocation10 + $0x1b0] sm:$0xff]   ;;  %v8409_v41 = vld [vmem:[#allocation10 + $0x1b8] sm:$0xff]  }
 0x863   :  { %4438 = vmatmul.mubr.bf16.vlgmr.msra.gmra.mrb[16].mxu1 %v6984_v38  ;;  %v3472_v2 = vrot.slane %v6989_v23, 2  ;;  %v3471_v24 = vrot.slane %v6988_v17, 2  ;;  %v3481_v6 = vrot.slane %v6991_v19, 3  ;;  %v8406_v38 = vld [vmem:[#allocation10 + $0x1f0] sm:$0xff]   ;;  %v8422_v28 = vld [vmem:[#allocation10 + $0x268] sm:$0xff]   ;;  %v8426_v23 = vld [vmem:[#allocation10 + $0x278] sm:$0xff]  }
 0x864   :  { %7455 = vmatpush3.bf16.msra.mxu1 %v8357_v43  ;;  %4477 = vmatprep.mubr.bf16.mxu1 %v3463_v48  ;;  %v8408_v43 = vld [vmem:[#allocation10 + $0x1f8] sm:$0xff]   ;;  %v8410_v48 = vld [vmem:[#allocation10 + $0x240] sm:$0xff]   ;;  %v8424_v37 = vld [vmem:[#allocation10 + $0x270] sm:$0xff]  }
 0x865   :  { %7456 = vmatprep.subr.bf16.mxu1 %v8360_v47  ;;  %v6990_v47 = vcombine.low %v3446_v15, %v3446_v15  ;;  %v8441_v15 = vld [vmem:[#allocation10 + $0x2a8] sm:$0xff]   ;;  %v8443_v17 = vld [vmem:[#allocation10 + $0x2b0] sm:$0xff]  }
 0x866   :  { %v3449_v19 = vld [vmem:[#allocation3 + $0x8] sm:$0x44] }
 0x868   :  { %7457 = vmatpush3.bf16.msra.mxu1 %v8361_v50  ;;  %v3447_v50 = vld [vmem:[#allocation3 + $0x8] sm:$0x11] }
 0x869   :  { %7458 = vmatprep.subr.bf16.mxu1 %v8362_v0  ;;  %v8411_v0 = vld [vmem:[#allocation10 + $0x200] sm:$0xff]  }
 0x86c   :  { %7459 = vmatpush3.bf16.msra.mxu1 %v8363_v33  ;;  %v3480_v33 = vrot.slane %v6990_v47, 3  ;;  %v8460_v47 = vld [vmem:[#allocation10 + $0x370] sm:$0xff]  }
 0x86d   :  { %7460 = vmatprep.subr.bf16.mxu1 %v8364_v49  ;;  %v8414_v49 = vld [vmem:[#allocation10 + $0x248] sm:$0xff]  }
 0x870   :  { %7461 = vmatpush3.bf16.msra.mxu1 %v8365_v4  ;;  %v6993_v4 = vcombine.high %v3447_v50, %v3447_v50 }
 0x871   :  { %7462 = vmatprep.subr.bf16.mxu1 %v8366_v27  ;;  %v8415_v27 = vld [vmem:[#allocation10 + $0x208] sm:$0xff]  }
 0x874   :  { %7463 = vmatpush3.bf16.msra.mxu1 %v8367_v51  ;;  %v8416_v51 = vld [vmem:[#allocation10 + $0x250] sm:$0xff]  }
 0x875   :  { %7464 = vmatprep.subr.bf16.mxu1 %v8368_v1  ;;  %v8417_v1 = vld [vmem:[#allocation10 + $0x210] sm:$0xff]  }
 0x878   :  { %7465 = vmatpush3.bf16.msra.mxu1 %v8369_v52  ;;  %v8418_v52 = vld [vmem:[#allocation10 + $0x258] sm:$0xff]  }
 0x879   :  { %7466 = vmatprep.subr.bf16.mxu1 %v8370_v56  ;;  %v8419_v56 = vld [vmem:[#allocation10 + $0x218] sm:$0xff]  }
 0x87c   :  { %7467 = vmatpush3.bf16.msra.mxu1 %v8371_v5  ;;  %v8420_v5 = vld [vmem:[#allocation10 + $0x260] sm:$0xff]  }
 0x87d   :  { %7468 = vmatprep.subr.bf16.mxu1 %v8372_v20  ;;  %v8421_v20 = vld [vmem:[#allocation10 + $0x220] sm:$0xff]  }
 0x880   :  { %7469 = vmatpush3.bf16.msra.mxu1 %v8373_v46  ;;  %v8423_v46 = vld [vmem:[#allocation10 + $0x228] sm:$0xff]  }
 0x881   :  { %7476 = vmatprep.subr.bf16.mxu1 %v8374_v58  ;;  %v8425_v58 = vld [vmem:[#allocation10 + $0x230] sm:$0xff]  }
 0x883   :  { %4478 = vmatmul.mubr.bf16.vlgmr.msra.gmra.mrb[20].mxu1 %v3462_v61  ;;  %v8427_v61 = vld [vmem:[#allocation10 + $0x238] sm:$0xff]  }
 0x884   :  { %7477 = vmatpush3.bf16.msra.mxu1 %v8375_v59  ;;  %4517 = vmatprep.mubr.bf16.mxu1 %v3472_v2  ;;  %v3448_v59 = vld [vmem:[#allocation3 + $0x8] sm:$0x22] }
 0x885   :  { %7478 = vmatprep.subr.bf16.mxu1 %v8378_v62  ;;  %v8428_v62 = vld [vmem:[#allocation10 + $0x2c0] sm:$0xff]   ;;  %v6995_v2 = vcombine.high %v3448_v59, %v3448_v59 }
 0x888   :  { %7479 = vmatpush3.bf16.msra.mxu1 %v8379_v3  ;;  %v8429_v3 = vld [vmem:[#allocation10 + $0x280] sm:$0xff]  }
 0x889   :  { %7480 = vmatprep.subr.bf16.mxu1 %v8380_v7  ;;  %v6992_v7 = vcombine.low %v3447_v50, %v3447_v50  ;;  %v8462_v50 = vld [vmem:[#allocation10 + $0x378] sm:$0xff]  }
 0x88c   :  { %7481 = vmatpush3.bf16.msra.mxu1 %v8381_v8  ;;  %v8432_v8 = vld [vmem:[#allocation10 + $0x2c8] sm:$0xff]  }
 0x88d   :  { %7482 = vmatprep.subr.bf16.mxu1 %v8382_v60  ;;  %v3497_v60 = vrot.slane %v6995_v2, 1 }
 0x890   :  { %7483 = vmatpush3.bf16.msra.mxu1 %v8383_v9  ;;  %v8433_v9 = vld [vmem:[#allocation10 + $0x288] sm:$0xff]  }
 0x891   :  { %7484 = vmatprep.subr.bf16.mxu1 %v8384_v10  ;;  %v8434_v10 = vld [vmem:[#allocation10 + $0x2d0] sm:$0xff]  }
 0x894   :  { %7485 = vmatpush3.bf16.msra.mxu1 %v8385_v45  ;;  %v8435_v45 = vld [vmem:[#allocation10 + $0x290] sm:$0xff]  }
 0x895   :  { %7486 = vmatprep.subr.bf16.mxu1 %v8386_v39  ;;  %v8436_v39 = vld [vmem:[#allocation10 + $0x2d8] sm:$0xff]  }
 0x898   :  { %7487 = vmatpush3.bf16.msra.mxu1 %v8387_v55  ;;  %v8437_v55 = vld [vmem:[#allocation10 + $0x298] sm:$0xff]  }
 0x899   :  { %7488 = vmatprep.subr.bf16.mxu1 %v8388_v11  ;;  %v8438_v11 = vld [vmem:[#allocation10 + $0x2e0] sm:$0xff]  }
 0x89c   :  { %7489 = vmatpush3.bf16.msra.mxu1 %v8389_v12  ;;  %v8439_v12 = vld [vmem:[#allocation10 + $0x2a0] sm:$0xff]  }
 0x89d   :  { %7490 = vmatprep.subr.bf16.mxu1 %v8390_v14  ;;  %v8440_v14 = vld [vmem:[#allocation10 + $0x2e8] sm:$0xff]  }
 0x8a0   :  { %7491 = vmatpush3.bf16.msra.mxu1 %v8391_v16  ;;  %v8442_v16 = vld [vmem:[#allocation10 + $0x2f0] sm:$0xff]  }
 0x8a1   :  { %7498 = vmatprep.subr.bf16.mxu1 %v8392_v18  ;;  %v8444_v18 = vld [vmem:[#allocation10 + $0x2f8] sm:$0xff]  }
 0x8a3   :  { %4518 = vmatmul.mubr.bf16.vlgmr.msra.gmra.mrb[24].mxu1 %v3471_v24  ;;  %v6994_v24 = vcombine.low %v3448_v59, %v3448_v59  ;;  %v4687_v59 = vld [vmem:[%s10362_s10 + $0x10] sm:$0xff] }
 0x8a4   :  { %7499 = vmatpush3.bf16.msra.mxu1 %v8393_v21  ;;  %4557 = vmatprep.mubr.bf16.mxu1 %v3481_v6  ;;  %v8445_v21 = vld [vmem:[#allocation10 + $0x2b8] sm:$0xff]   ;;  %v6997_v6 = vcombine.high %v3449_v19, %v3449_v19 }
 0x8a5   :  { %7500 = vmatprep.subr.bf16.mxu1 %v8396_v25  ;;  %v8446_v25 = vld [vmem:[#allocation10 + $0x340] sm:$0xff]  }
 0x8a8   :  { %7501 = vmatpush3.bf16.msra.mxu1 %v8397_v29  ;;  %v8447_v29 = vld [vmem:[#allocation10 + $0x300] sm:$0xff]  }
 0x8a9   :  { %7502 = vmatprep.subr.bf16.mxu1 %v8398_v40  ;;  %v3496_v40 = vrot.slane %v6994_v24, 1  ;;  %v4697_v24 = vld [vmem:[%s10362_s10 + $0x60] sm:$0xff] }
 0x8ac   :  { %7503 = vmatpush3.bf16.msra.mxu1 %v8399_v30  ;;  %v8450_v30 = vld [vmem:[#allocation10 + $0x348] sm:$0xff]  }
 0x8ad   :  { %7504 = vmatprep.subr.bf16.mxu1 %v8400_v13  ;;  %v3506_v13 = vrot.slane %v6997_v6, 2 }
 0x8b0   :  { %7505 = vmatpush3.bf16.msra.mxu1 %v8401_v31  ;;  %v8451_v31 = vld [vmem:[#allocation10 + $0x308] sm:$0xff]  }
 0x8b1   :  { %7506 = vmatprep.subr.bf16.mxu1 %v8402_v44  ;;  %v8452_v44 = vld [vmem:[#allocation10 + $0x350] sm:$0xff]  }
 0x8b4   :  { %7507 = vmatpush3.bf16.msra.mxu1 %v8403_v32  ;;  %v8453_v32 = vld [vmem:[#allocation10 + $0x310] sm:$0xff]  }
 0x8b5   :  { %7508 = vmatprep.subr.bf16.mxu1 %v8404_v35  ;;  %v8454_v35 = vld [vmem:[#allocation10 + $0x358] sm:$0xff]  }
 0x8b8   :  { %7509 = vmatpush3.bf16.msra.mxu1 %v8405_v36  ;;  %v8455_v36 = vld [vmem:[#allocation10 + $0x318] sm:$0xff]  }
 0x8b9   :  { %7510 = vmatprep.subr.bf16.mxu1 %v8406_v38  ;;  %v8456_v38 = vld [vmem:[#allocation10 + $0x360] sm:$0xff]  }
 0x8bc   :  { %7511 = vmatpush3.bf16.msra.mxu1 %v8407_v42  ;;  %v8457_v42 = vld [vmem:[#allocation10 + $0x320] sm:$0xff]  }
 0x8bd   :  { %7512 = vmatprep.subr.bf16.mxu1 %v8408_v43  ;;  %v8458_v43 = vld [vmem:[#allocation10 + $0x368] sm:$0xff]  }
 0x8c0   :  { %7513 = vmatpush3.bf16.msra.mxu1 %v8409_v41  ;;  %v8459_v41 = vld [vmem:[#allocation10 + $0x328] sm:$0xff]  }
 0x8c1   :  { %7520 = vmatprep.subr.bf16.mxu1 %v8410_v48  ;;  %v8461_v48 = vld [vmem:[#allocation10 + $0x330] sm:$0xff]  }
 0x8c3   :  { %4558 = vmatmul.mubr.bf16.vlgmr.msra.gmra.mrb[28].mxu1 %v3480_v33  ;;  %v6996_v33 = vcombine.low %v3449_v19, %v3449_v19  ;;  %v4696_v19 = vld [vmem:[%s10362_s10 + $0x58] sm:$0xff] }
 0x8c4   :  { %7521 = vmatpush3.bf16.msra.mxu1 %v8411_v0  ;;  %4597 = vmatprep.mubr.bf16.mxu1 %v6993_v4  ;;  %v8463_v0 = vld [vmem:[#allocation10 + $0x338] sm:$0xff]  }
 0x8c5   :  { %7522 = vmatprep.subr.bf16.mxu1 %v8414_v49  ;;  %v3505_v49 = vrot.slane %v6996_v33, 2 }
 0x8c8   :  { %7523 = vmatpush3.bf16.msra.mxu1 %v8415_v27 }
 0x8c9   :  { %7524 = vmatprep.subr.bf16.mxu1 %v8416_v51 }
 0x8cc   :  { %7525 = vmatpush3.bf16.msra.mxu1 %v8417_v1 }
 0x8cd   :  { %7526 = vmatprep.subr.bf16.mxu1 %v8418_v52 }
 0x8d0   :  { %7527 = vmatpush3.bf16.msra.mxu1 %v8419_v56 }
 0x8d1   :  { %7528 = vmatprep.subr.bf16.mxu1 %v8420_v5 }
 0x8d4   :  { %7529 = vmatpush3.bf16.msra.mxu1 %v8421_v20 }
 0x8d5   :  { %7530 = vmatprep.subr.bf16.mxu1 %v8422_v28 }
 0x8d8   :  { %7531 = vmatpush3.bf16.msra.mxu1 %v8423_v46 }
 0x8d9   :  { %7532 = vmatprep.subr.bf16.mxu1 %v8424_v37 }
 0x8dc   :  { %7533 = vmatpush3.bf16.msra.mxu1 %v8425_v58  ;;  %v4685_v58 = vld [vmem:[%s10362_s10] sm:$0xff] }
 0x8dd   :  { %7534 = vmatprep.subr.bf16.mxu1 %v8426_v23  ;;  %v4686_v23 = vld [vmem:[%s10362_s10 + $0x8] sm:$0xff] }
 0x8e0   :  { %7535 = vmatpush3.bf16.msra.mxu1 %v8427_v61  ;;  %v7800_v61 = vpack.c.bf16 %v4686_v23, %v4685_v58 }
 0x8e1   :  { %7542 = vmatprep.subr.bf16.mxu1 %v8428_v62  ;;  %v4688_v62 = vld [vmem:[%s10362_s10 + $0x18] sm:$0xff] }
 0x8e2   :  { %v7803_v2 = vpack.c.bf16 %v4688_v62, %v4687_v59 }
 0x8e3   :  { %4598 = vmatmul.mubr.bf16.vlgmr.msra.gmra.mrb[32].mxu1 %v6992_v7  ;;  %v4690_v7 = vld [vmem:[%s10362_s10 + $0x28] sm:$0xff] }
 0x8e4   :  { %7543 = vmatpush3.bf16.msra.mxu1 %v8429_v3  ;;  %4637 = vmatprep.mubr.bf16.mxu1 %v3497_v60  ;;  %v4689_v3 = vld [vmem:[%s10362_s10 + $0x20] sm:$0xff] }
 0x8e5   :  { %7544 = vmatprep.subr.bf16.mxu1 %v8432_v8  ;;  %v7806_v8 = vpack.c.bf16 %v4690_v7, %v4689_v3 }
 0x8e8   :  { %7545 = vmatpush3.bf16.msra.mxu1 %v8433_v9 }
 0x8e9   :  { %7546 = vmatprep.subr.bf16.mxu1 %v8434_v10 }
 0x8ec   :  { %7547 = vmatpush3.bf16.msra.mxu1 %v8435_v45 }
 0x8ed   :  { %7548 = vmatprep.subr.bf16.mxu1 %v8436_v39 }
 0x8f0   :  { %7549 = vmatpush3.bf16.msra.mxu1 %v8437_v55 }
 0x8f1   :  { %7550 = vmatprep.subr.bf16.mxu1 %v8438_v11  ;;  %v4691_v11 = vld [vmem:[%s10362_s10 + $0x30] sm:$0xff] }
 0x8f4   :  { %7551 = vmatpush3.bf16.msra.mxu1 %v8439_v12  ;;  %v4692_v12 = vld [vmem:[%s10362_s10 + $0x38] sm:$0xff] }
 0x8f5   :  { %7552 = vmatprep.subr.bf16.mxu1 %v8440_v14  ;;  %v7809_v14 = vpack.c.bf16 %v4692_v12, %v4691_v11  ;;  %v4703_v11 = vld [vmem:[%s10363_s11 + $0x10] sm:$0xff] }
 0x8f8   :  { %7553 = vmatpush3.bf16.msra.mxu1 %v8441_v15  ;;  %v4693_v15 = vld [vmem:[%s10362_s10 + $0x40] sm:$0xff] }
 0x8f9   :  { %7554 = vmatprep.subr.bf16.mxu1 %v8442_v16  ;;  %v4694_v16 = vld [vmem:[%s10362_s10 + $0x48] sm:$0xff] }
 0x8fc   :  { %7555 = vmatpush3.bf16.msra.mxu1 %v8443_v17  ;;  %v7812_v17 = vpack.c.bf16 %v4694_v16, %v4693_v15  ;;  %v9661_v16 = vld [vmem:[%s10365_s13 + $0x20] sm:$0xff] }
 0x8fd   :  { %7556 = vmatprep.subr.bf16.mxu1 %v8444_v18  ;;  %v4695_v18 = vld [vmem:[%s10362_s10 + $0x50] sm:$0xff] }
 0x900   :  { %7557 = vmatpush3.bf16.msra.mxu1 %v8445_v21  ;;  %v7815_v21 = vpack.c.bf16 %v4696_v19, %v4695_v18  ;;  %v4933_v19 = vld [vmem:[%s10365_s13 + $0x10] sm:$0xff] }
 0x901   :  { %7564 = vmatprep.subr.bf16.mxu1 %v8446_v25  ;;  %v4698_v25 = vld [vmem:[%s10362_s10 + $0x68] sm:$0xff] }
 0x902   :  { %v7818_v6 = vpack.c.bf16 %v4698_v25, %v4697_v24 }
 0x903   :  { %4638 = vmatmul.mubr.bf16.vlgmr.msra.gmra.mrb[36].mxu1 %v3496_v40  ;;  %v4700_v40 = vld [vmem:[%s10362_s10 + $0x78] sm:$0xff] }
 0x904   :  { %7565 = vmatpush3.bf16.msra.mxu1 %v8447_v29  ;;  %4677 = vmatprep.mubr.bf16.mxu1 %v3506_v13  ;;  %v4699_v29 = vld [vmem:[%s10362_s10 + $0x70] sm:$0xff] }
 0x905   :  { %7566 = vmatprep.subr.bf16.mxu1 %v8450_v30  ;;  %v7821_v30 = vpack.c.bf16 %v4700_v40, %v4699_v29 }
 0x908   :  { %7567 = vmatpush3.bf16.msra.mxu1 %v8451_v31 }
 0x909   :  { %7568 = vmatprep.subr.bf16.mxu1 %v8452_v44 }
 0x90c   :  { %7569 = vmatpush3.bf16.msra.mxu1 %v8453_v32 }
 0x90d   :  { %7570 = vmatprep.subr.bf16.mxu1 %v8454_v35 }
 0x910   :  { %7571 = vmatpush3.bf16.msra.mxu1 %v8455_v36 }
 0x911   :  { %7572 = vmatprep.subr.bf16.mxu1 %v8456_v38 }
 0x914   :  { %7573 = vmatpush3.bf16.msra.mxu1 %v8457_v42 }
 0x915   :  { %7574 = vmatprep.subr.bf16.mxu1 %v8458_v43 }
 0x918   :  { %7575 = vmatpush3.bf16.msra.mxu1 %v8459_v41 }
 0x919   :  { %7576 = vmatprep.subr.bf16.mxu1 %v8460_v47 }
 0x91c   :  { %7577 = vmatpush3.bf16.msra.mxu1 %v8461_v48 }
 0x91d   :  { %7578 = vmatprep.subr.bf16.mxu1 %v8462_v50 }
 0x920   :  { %7579 = vmatpush3.bf16.msra.mxu1 %v8463_v0 }
 0x921   :  { %7799 = vmatprep.subr.bf16.mxu1 %v8811_v54 }
 0x923   :  { %4678 = vmatmul.mubr.bf16.vlgmr.msra.gmra.mrb[40].mxu1 %v3505_v49 }
 0x924   :  { %7682 = vmatprep.mubr.msk.f32.mxu1 %vm8812_vm2, %v8813_v57  ;;  %7801 = vmatpush3.bf16.msra.mxu1 %v7800_v61 }
 0x925   :  { %7802 = vmatprep.subr.bf16.mxu1 %v8811_v54 }
 0x928   :  { %7804 = vmatpush3.bf16.msra.mxu1 %v7803_v2 }
 0x929   :  { %7805 = vmatprep.subr.bf16.mxu1 %v8811_v54 }
 0x92c   :  { %7807 = vmatpush3.bf16.msra.mxu1 %v7806_v8 }
 0x92d   :  { %7808 = vmatprep.subr.bf16.mxu1 %v8811_v54 }
 0x930   :  { %7810 = vmatpush3.bf16.msra.mxu1 %v7809_v14  ;;  %v4704_v14 = vld [vmem:[%s10363_s11 + $0x18] sm:$0xff] }
 0x931   :  { %7811 = vmatprep.subr.bf16.mxu1 %v8811_v54  ;;  %v7827_v15 = vpack.c.bf16 %v4704_v14, %v4703_v11  ;;  %v5037_v14 = vld [vmem:[%s10365_s13 + $0x350] sm:$0xff] }
 0x934   :  { %7813 = vmatpush3.bf16.msra.mxu1 %v7812_v17 }
 0x935   :  { %7814 = vmatprep.subr.bf16.mxu1 %v8811_v54 }
 0x936   :  { %v7448_v4 = vpop.f32.mrb[16].mxu1 }
 0x937   :  { %v7449_v27 = vpop.f32.mrb[17].mxu1 }
 0x938   :  { %v7450_v51 = vadd.f32 %v7449_v27, %v7448_v4  ;;  %v7451_v1 = vpop.f32.mrb[18].mxu1  ;;  %7816 = vmatpush3.bf16.msra.mxu1 %v7815_v21  ;;  %v4937_v21 = vld [vmem:[%s10365_s13 + $0x30] sm:$0xff] }
 0x939   :  { %v7452_v52 = vpop.f32.mrb[19].mxu1  ;;  %7817 = vmatprep.subr.bf16.mxu1 %v8811_v54  ;;  %v7116_v24 = vcombine.low %v4933_v19, %v4937_v21  ;;  %v7117_v25 = vcombine.high %v4933_v19, %v4937_v21  ;;  %v5045_v21 = vld [vmem:[%s10365_s13 + $0x390] sm:$0xff] }
 0x93b   :  { %6341 = vmatprep.subr.bf16.mxu0 %v7117_v25 }
 0x93c   :  { %7819 = vmatpush3.bf16.msra.mxu1 %v7818_v6  ;;  %6342 = vmatpush1.bf16.msra.mxu0 %v7116_v24  ;;  %v4945_v6 = vld [vmem:[%s10365_s13 + $0x70] sm:$0xff] }
 0x93d   :  { %7820 = vmatprep.subr.bf16.mxu1 %v8811_v54  ;;  %v5049_v24 = vld [vmem:[%s10365_s13 + $0x3b0] sm:$0xff] }
 0x93e   :  { %v7228_v25 = vcombine.low %v5045_v21, %v5049_v24 }
 0x940   :  { %7822 = vmatpush3.bf16.msra.mxu1 %v7821_v30  ;;  %v4949_v30 = vld [vmem:[%s10365_s13 + $0x90] sm:$0xff] }
 0x941   :  { %7823 = vmatprep.subr.bf16.mxu1 %v8811_v54 }
 0x956   :  { %v7470_v56 = vpop.f32.mrb[20].mxu1 }
 0x957   :  { %v7471_v5 = vpop.f32.mrb[21].mxu1 }
 0x958   :  { %v7472_v20 = vadd.f32 %v7471_v5, %v7470_v56  ;;  %v7473_v28 = vpop.f32.mrb[22].mxu1 }
 0x959   :  { %v7474_v46 = vpop.f32.mrb[23].mxu1 }
 0x95a   :  { %v4480_v37 = vadd.f32 %v7472_v20, %v7450_v51 }
 0x976   :  { %v7492_v60 = vpop.f32.mrb[24].mxu1 }
 0x977   :  { %v7493_v9 = vpop.f32.mrb[25].mxu1 }
 0x978   :  { %v7494_v10 = vadd.f32 %v7493_v9, %v7492_v60  ;;  %v7495_v45 = vpop.f32.mrb[26].mxu1 }
 0x979   :  { %v7496_v39 = vpop.f32.mrb[27].mxu1 }
 0x97a   :  { %v4520_v55 = vadd.f32 %v7494_v10, %v4480_v37  ;;  %v4701_v39 = vld [vmem:[%s10363_s11] sm:$0xff] }
 0x996   :  { %v7514_v13 = vpop.f32.mrb[28].mxu1 }
 0x997   :  { %v7515_v31 = vpop.f32.mrb[29].mxu1 }
 0x998   :  { %v7516_v44 = vadd.f32 %v7515_v31, %v7514_v13  ;;  %v7517_v32 = vpop.f32.mrb[30].mxu1  ;;  %v4953_v13 = vld [vmem:[%s10365_s13 + $0xb0] sm:$0xff] }
 0x999   :  { %v7518_v35 = vpop.f32.mrb[31].mxu1  ;;  %v7132_v31 = vcombine.low %v4949_v30, %v4953_v13  ;;  %v4957_v32 = vld [vmem:[%s10365_s13 + $0xd0] sm:$0xff] }
 0x99a   :  { %v4560_v36 = vadd.f32 %v7516_v44, %v4520_v55  ;;  %v4702_v55 = vld [vmem:[%s10363_s11 + $0x8] sm:$0xff]  ;;  %v7133_v44 = vcombine.high %v4949_v30, %v4953_v13  ;;  %v4961_v35 = vld [vmem:[%s10365_s13 + $0xf0] sm:$0xff] }
 0x99b   :  { %v7824_v12 = vpack.c.bf16 %v4702_v55, %v4701_v39  ;;  %v5029_v39 = vld [vmem:[%s10365_s13 + $0x310] sm:$0xff] }
 0x99c   :  { %v5033_v55 = vld [vmem:[%s10365_s13 + $0x330] sm:$0xff] }
 0x99d   :  { %v7212_v11 = vcombine.low %v5029_v39, %v5033_v55 }
 0x9b6   :  { %v7536_v38 = vpop.f32.mrb[32].mxu1 }
 0x9b7   :  { %v7537_v42 = vpop.f32.mrb[33].mxu1 }
 0x9b8   :  { %v7538_v43 = vadd.f32 %v7537_v42, %v7536_v38  ;;  %v7539_v41 = vpop.f32.mrb[34].mxu1  ;;  %v7141_v38 = vcombine.high %v4957_v32, %v4961_v35  ;;  %v4965_v42 = vld [vmem:[%s10365_s13 + $0x110] sm:$0xff] }
 0x9b9   :  { %v7540_v47 = vpop.f32.mrb[35].mxu1 }
 0x9ba   :  { %v4600_v48 = vadd.f32 %v7538_v43, %v4560_v36  ;;  %v7140_v36 = vcombine.low %v4957_v32, %v4961_v35  ;;  %v4969_v43 = vld [vmem:[%s10365_s13 + $0x130] sm:$0xff] }
 0x9bb   :  { %v7148_v41 = vcombine.low %v4965_v42, %v4969_v43  ;;  %v7149_v47 = vcombine.high %v4965_v42, %v4969_v43  ;;  %v5061_v35 = vld [vmem:[%s10365_s13 + $0x410] sm:$0xff] }
 0x9bc   :  { %v5069_v43 = vld [vmem:[%s10365_s13 + $0x450] sm:$0xff] }
 0x9d6   :  { %v7558_v50 = vpop.f32.mrb[36].mxu1 }
 0x9d7   :  { %v7559_v0 = vpop.f32.mrb[37].mxu1 }
 0x9d8   :  { %v7560_v33 = vadd.f32 %v7559_v0, %v7558_v50  ;;  %v7561_v49 = vpop.f32.mrb[38].mxu1  ;;  %v4977_v50 = vld [vmem:[%s10365_s13 + $0x170] sm:$0xff] }
 0x9d9   :  { %v7562_v4 = vpop.f32.mrb[39].mxu1  ;;  %v4981_v49 = vld [vmem:[%s10365_s13 + $0x190] sm:$0xff] }
 0x9da   :  { %v4640_v27 = vadd.f32 %v7560_v33, %v4600_v48  ;;  %v4973_v48 = vld [vmem:[%s10365_s13 + $0x150] sm:$0xff] }
 0x9db   :  { %v7156_v0 = vcombine.low %v4973_v48, %v4977_v50  ;;  %v7157_v33 = vcombine.high %v4973_v48, %v4977_v50  ;;  %v4985_v4 = vld [vmem:[%s10365_s13 + $0x1b0] sm:$0xff] }
 0x9dc   :  { %v5077_v50 = vld [vmem:[%s10365_s13 + $0x490] sm:$0xff] }
 0x9f6   :  { %v7580_v51 = vpop.f32.mrb[40].mxu1 }
 0x9f7   :  { %v7581_v1 = vpop.f32.mrb[41].mxu1 }
 0x9f8   :  { %v7582_v52 = vadd.f32 %v7581_v1, %v7580_v51  ;;  %v7583_v56 = vpop.f32.mrb[42].mxu1  ;;  %v7165_v51 = vcombine.high %v4981_v49, %v4985_v4  ;;  %v4989_v1 = vld [vmem:[%s10365_s13 + $0x1d0] sm:$0xff] }
 0x9f9   :  { %v7584_v5 = vpop.f32.mrb[43].mxu1 }
 0x9fa   :  { %v9631_v20 = vadd.f32 %v7582_v52, %v4640_v27  ;;  %v7164_v27 = vcombine.low %v4981_v49, %v4985_v4  ;;  %v4993_v52 = vld [vmem:[%s10365_s13 + $0x1f0] sm:$0xff] }
 0x9fb   :  { %v7172_v56 = vcombine.low %v4989_v1, %v4993_v52  ;;  %v7173_v5 = vcombine.high %v4989_v1, %v4993_v52  ;;  %v5085_v4 = vld [vmem:[%s10365_s13 + $0x4d0] sm:$0xff] }
 0x9fc   :  { %v4707_v28 = vsel %vm4706_vm7, %v9631_v20, 0.0  ;;  %v4714_v46 = vmul.f32 %v9631_v20, %v9631_v20  ;;  %v5093_v52 = vld [vmem:[%s10365_s13 + $0x510] sm:$0xff] }
 0x9fd   :  { %v4708_v37 = vrot.slane %v4707_v28, 4 }
 0x9fe   :  { %v4715_v58 = vsel %vm4706_vm7, %v4714_v46, 0.0  ;;  %v5001_v46 = vld [vmem:[%s10365_s13 + $0x230] sm:$0xff] }
 0x9ff   :  { %v4709_v23 = vadd.f32 %v4708_v37, %v4707_v28  ;;  %v4716_v59 = vrot.slane %v4715_v58, 4  ;;  %v4997_v28 = vld [vmem:[%s10365_s13 + $0x210] sm:$0xff] }
 0xa00   :  { %v7180_v37 = vcombine.low %v4997_v28, %v5001_v46 }
 0xa01   :  { %v4710_v61 = vrot.slane %v4709_v23, 2  ;;  %v4717_v62 = vadd.f32 %v4716_v59, %v4715_v58  ;;  %v7181_v58 = vcombine.high %v4997_v28, %v5001_v46  ;;  %v5009_v59 = vld [vmem:[%s10365_s13 + $0x270] sm:$0xff] }
 0xa03   :  { %v4711_v2 = vadd.f32 %v4710_v61, %v4709_v23  ;;  %v4718_v3 = vrot.slane %v4717_v62, 2  ;;  %v5005_v23 = vld [vmem:[%s10365_s13 + $0x250] sm:$0xff] }
 0xa04   :  { %v7188_v61 = vcombine.low %v5005_v23, %v5009_v59 }
 0xa05   :  { %v4712_v7 = vrot.slane %v4711_v2, 1  ;;  %v4719_v8 = vadd.f32 %v4718_v3, %v4717_v62  ;;  %v7189_v62 = vcombine.high %v5005_v23, %v5009_v59  ;;  %v5017_v3 = vld [vmem:[%s10365_s13 + $0x2b0] sm:$0xff] }
 0xa07   :  { %v4720_v60 = vrot.slane %v4719_v8, 1  ;;  %v4713_v9 = vadd.f32 %v4712_v7, %v4711_v2  ;;  %v5013_v2 = vld [vmem:[%s10365_s13 + $0x290] sm:$0xff] }
 0xa08   :  { %v7196_v7 = vcombine.low %v5013_v2, %v5017_v3 }
 0xa09   :  { %v4721_v10 = vadd.f32 %v4720_v60, %v4719_v8  ;;  %v7197_v8 = vcombine.high %v5013_v2, %v5017_v3  ;;  %v5021_v60 = vld [vmem:[%s10365_s13 + $0x2d0] sm:$0xff] }
 0xa0b   :  { %v4722_v45 = vsel %vm751_vm3, %v4713_v9, %v4721_v10  ;;  %v5025_v9 = vld [vmem:[%s10365_s13 + $0x2f0] sm:$0xff] }
 0xa0c   :  { %7683 = vmatmul.mubr.f32.vlgmr.msra.gmra.mrb[44].mxu1 %v4722_v45  ;;  %v7204_v10 = vcombine.low %v5021_v60, %v5025_v9  ;;  %v7205_v45 = vcombine.high %v5021_v60, %v5025_v9  ;;  %v4939_v60 = vld [vmem:[%s10365_s13 + $0x40] sm:$0xff] }
 0xa0d   :  { %7693 = vmatprep.mubr.msk.f32.mxu1 %vm8812_vm2, %v8813_v57  ;;  %7825 = vmatpush3.bf16.msra.mxu1 %v7824_v12  ;;  %v9656_v57 = vld [vmem:[%s10365_s13] sm:$0xff]  ;;  %v7213_v12 = vcombine.high %v5029_v39, %v5033_v55 }
 0xa0e   :  { %7826 = vmatprep.subr.bf16.mxu1 %v8811_v54  ;;  %v7112_v17 = vcombine.low %v9656_v57, %v9661_v16  ;;  %v7113_v18 = vcombine.high %v9656_v57, %v9661_v16  ;;  %v4941_v54 = vld [vmem:[%s10365_s13 + $0x50] sm:$0xff]  ;;  %v4943_v9 = vld [vmem:[%s10365_s13 + $0x60] sm:$0xff] }
 0xa0f   :  { %v7124_v29 = vcombine.low %v4941_v54, %v4945_v6  ;;  %v7125_v40 = vcombine.high %v4941_v54, %v4945_v6  ;;  %v7229_v54 = vcombine.high %v5045_v21, %v5049_v24  ;;  %v5053_v6 = vld [vmem:[%s10365_s13 + $0x3d0] sm:$0xff]  ;;  %v4947_v55 = vld [vmem:[%s10365_s13 + $0x80] sm:$0xff] }
 0xa10   :  { %v4963_v57 = vld [vmem:[%s10365_s13 + $0x100] sm:$0xff] }
 0xa11   :  { %7828 = vmatpush3.bf16.msra.mxu1 %v7827_v15  ;;  %6343 = vmatprep.subr.bf16.mxu0 %v7125_v40  ;;  %v5041_v15 = vld [vmem:[%s10365_s13 + $0x370] sm:$0xff]  ;;  %v7111_v40 = vld.sshfl [vmem:[%s10367_s15] sm:$0x33 pattern:$0x76325410] }
 0xa12   :  { %6177 = vmatprep.subr.bf16.mxu1 %v7113_v18  ;;  %6344 = vmatpush1.bf16.msra.mxu0 %v7124_v29  ;;  %v7220_v18 = vcombine.low %v5037_v14, %v5041_v15  ;;  %v7221_v19 = vcombine.high %v5037_v14, %v5041_v15  ;;  %v5057_v29 = vld [vmem:[%s10365_s13 + $0x3f0] sm:$0xff]  ;;  %v9769_v32 = vpack.c.bf16 %v7111_v40, %v7111_v40  ;;  %v4955_v15 = vld [vmem:[%s10365_s13 + $0xc0] sm:$0xff] }
 0xa13   :  { %6345 = vmatprep.subr.bf16.mxu0 %v7133_v44  ;;  %v7236_v30 = vcombine.low %v5053_v6, %v5057_v29  ;;  %v7237_v13 = vcombine.high %v5053_v6, %v5057_v29  ;;  %v4967_v16 = vld [vmem:[%s10365_s13 + $0x120] sm:$0xff] }
 0xa14   :  { %v7145_v24 = vcombine.high %v4963_v57, %v4967_v16  ;;  %v7144_v6 = vcombine.low %v4963_v57, %v4967_v16  ;;  %v5075_v57 = vld [vmem:[%s10365_s13 + $0x480] sm:$0xff] }
 0xa15   :  { %v5079_v16 = vld [vmem:[%s10365_s13 + $0x4a0] sm:$0xff] }
 0xa16   :  { %6346 = vmatpush1.bf16.msra.mxu0 %v7132_v31  ;;  %v4923_v31 = vcombine.high %v7111_v40, %v7111_v40  ;;  %v4979_v40 = vld [vmem:[%s10365_s13 + $0x180] sm:$0xff] }
 0xa17   :  { %6347 = vmatprep.subr.bf16.mxu0 %v7141_v38 }
 0xa18   :  { %v9767_v44 = vpack.c.bf16 %v4923_v31, %v4923_v31 }
 0xa1a   :  { %6348 = vmatpush1.bf16.msra.mxu0 %v7140_v36  ;;  %v5065_v36 = vld [vmem:[%s10365_s13 + $0x430] sm:$0xff]  ;;  %6373 = vmatprep.mubr.bf16.mxu0 %v9767_v44 }
 0xa1b   :  { %6349 = vmatprep.subr.bf16.mxu0 %v7149_v47  ;;  %v7244_v38 = vcombine.low %v5061_v35, %v5065_v36  ;;  %v7245_v42 = vcombine.high %v5061_v35, %v5065_v36  ;;  %v4987_v35 = vld [vmem:[%s10365_s13 + $0x1c0] sm:$0xff] }
 0xa1c   :  { %v4991_v36 = vld [vmem:[%s10365_s13 + $0x1e0] sm:$0xff] }
 0xa1e   :  { %6350 = vmatpush1.bf16.msra.mxu0 %v7148_v41  ;;  %v5073_v41 = vld [vmem:[%s10365_s13 + $0x470] sm:$0xff] }
 0xa1f   :  { %6351 = vmatprep.subr.bf16.mxu0 %v7157_v33  ;;  %v7252_v47 = vcombine.low %v5069_v43, %v5073_v41  ;;  %v7253_v48 = vcombine.high %v5069_v43, %v5073_v41  ;;  %v4995_v43 = vld [vmem:[%s10365_s13 + $0x200] sm:$0xff] }
 0xa20   :  { %v4999_v41 = vld [vmem:[%s10365_s13 + $0x220] sm:$0xff] }
 0xa22   :  { %6352 = vmatpush1.bf16.msra.mxu0 %v7156_v0  ;;  %v5081_v0 = vld [vmem:[%s10365_s13 + $0x4b0] sm:$0xff] }
 0xa23   :  { %6353 = vmatprep.subr.bf16.mxu0 %v7165_v51  ;;  %v7260_v33 = vcombine.low %v5077_v50, %v5081_v0  ;;  %v7261_v49 = vcombine.high %v5077_v50, %v5081_v0  ;;  %v5003_v50 = vld [vmem:[%s10365_s13 + $0x240] sm:$0xff] }
 0xa24   :  { %v5007_v0 = vld [vmem:[%s10365_s13 + $0x260] sm:$0xff] }
 0xa26   :  { %6354 = vmatpush1.bf16.msra.mxu0 %v7164_v27  ;;  %v5089_v27 = vld [vmem:[%s10365_s13 + $0x4f0] sm:$0xff] }
 0xa27   :  { %6355 = vmatprep.subr.bf16.mxu0 %v7173_v5  ;;  %v7268_v51 = vcombine.low %v5085_v4, %v5089_v27  ;;  %v7269_v1 = vcombine.high %v5085_v4, %v5089_v27  ;;  %v5011_v4 = vld [vmem:[%s10365_s13 + $0x280] sm:$0xff] }
 0xa28   :  { %v5015_v27 = vld [vmem:[%s10365_s13 + $0x2a0] sm:$0xff] }
 0xa2a   :  { %6356 = vmatpush1.bf16.msra.mxu0 %v7172_v56  ;;  %v5097_v56 = vld [vmem:[%s10365_s13 + $0x530] sm:$0xff] }
 0xa2b   :  { %6357 = vmatprep.subr.bf16.mxu0 %v7181_v58  ;;  %v7276_v5 = vcombine.low %v5093_v52, %v5097_v56  ;;  %v7277_v28 = vcombine.high %v5093_v52, %v5097_v56  ;;  %v5019_v52 = vld [vmem:[%s10365_s13 + $0x2c0] sm:$0xff] }
 0xa2c   :  { %v5023_v56 = vld [vmem:[%s10365_s13 + $0x2e0] sm:$0xff] }
 0xa2e   :  { %6358 = vmatpush1.bf16.msra.mxu0 %v7180_v37 }
 0xa2f   :  { %6359 = vmatprep.subr.bf16.mxu0 %v7189_v62 }
 0xa32   :  { %6360 = vmatpush1.bf16.msra.mxu0 %v7188_v61 }
 0xa33   :  { %6361 = vmatprep.subr.bf16.mxu0 %v7197_v8 }
 0xa36   :  { %6362 = vmatpush1.bf16.msra.mxu0 %v7196_v7 }
 0xa37   :  { %6363 = vmatprep.subr.bf16.mxu0 %v7205_v45  ;;  %v7121_v45 = vcombine.high %v4939_v60, %v4943_v9 }
 0xa3a   :  { %6364 = vmatpush1.bf16.msra.mxu0 %v7204_v10 }
 0xa3b   :  { %6365 = vmatprep.subr.bf16.mxu0 %v7213_v12  ;;  %v7120_v12 = vcombine.low %v4939_v60, %v4943_v9  ;;  %v5051_v9 = vld [vmem:[%s10365_s13 + $0x3c0] sm:$0xff] }
 0xa3e   :  { %6366 = vmatpush1.bf16.msra.mxu0 %v7212_v11  ;;  %v4951_v11 = vld [vmem:[%s10365_s13 + $0xa0] sm:$0xff] }
 0xa3f   :  { %6367 = vmatprep.subr.bf16.mxu0 %v7221_v19  ;;  %v7129_v14 = vcombine.high %v4947_v55, %v4951_v11  ;;  %v7128_v19 = vcombine.low %v4947_v55, %v4951_v11  ;;  %v5059_v55 = vld [vmem:[%s10365_s13 + $0x400] sm:$0xff] }
 0xa40   :  { %v5063_v11 = vld [vmem:[%s10365_s13 + $0x420] sm:$0xff] }
 0xa42   :  { %6368 = vmatpush1.bf16.msra.mxu0 %v7220_v18  ;;  %v4959_v18 = vld [vmem:[%s10365_s13 + $0xe0] sm:$0xff] }
 0xa43   :  { %6369 = vmatprep.subr.bf16.mxu0 %v7229_v54  ;;  %v7137_v21 = vcombine.high %v4955_v15, %v4959_v18  ;;  %v4975_v54 = vld [vmem:[%s10365_s13 + $0x160] sm:$0xff] }
 0xa46   :  { %6370 = vmatpush1.bf16.msra.mxu0 %v7228_v25  ;;  %v4971_v25 = vld [vmem:[%s10365_s13 + $0x140] sm:$0xff] }
 0xa47   :  { %6371 = vmatprep.subr.bf16.mxu0 %v7237_v13  ;;  %v7153_v29 = vcombine.high %v4971_v25, %v4975_v54  ;;  %v7152_v13 = vcombine.low %v4971_v25, %v4975_v54  ;;  %v5083_v25 = vld [vmem:[%s10365_s13 + $0x4c0] sm:$0xff] }
 0xa48   :  { %v5087_v54 = vld [vmem:[%s10365_s13 + $0x4e0] sm:$0xff] }
 0xa4a   :  { %6372 = vmatpush1.bf16.msra.mxu0 %v7236_v30  ;;  %v4983_v30 = vld [vmem:[%s10365_s13 + $0x1a0] sm:$0xff] }
 0xa4b   :  { %6382 = vmatprep.subr.bf16.mxu0 %v7245_v42  ;;  %v7161_v31 = vcombine.high %v4979_v40, %v4983_v30  ;;  %v7169_v42 = vcombine.high %v4987_v35, %v4991_v36 }
 0xa4d   :  { %6374 = vmatmul.mubr.bf16.vlgmr.msra.gmra.mrb[24].mxu0 %v9769_v32 }
 0xa4e   :  { %6383 = vmatpush1.bf16.msra.mxu0 %v7244_v38  ;;  %v7160_v38 = vcombine.low %v4979_v40, %v4983_v30  ;;  %v5091_v40 = vld [vmem:[%s10365_s13 + $0x500] sm:$0xff] }
 0xa4f   :  { %6384 = vmatprep.subr.bf16.mxu0 %v7253_v48  ;;  %v7177_v48 = vcombine.high %v4995_v43, %v4999_v41  ;;  %v5095_v30 = vld [vmem:[%s10365_s13 + $0x520] sm:$0xff] }
 0xa52   :  { %6385 = vmatpush1.bf16.msra.mxu0 %v7252_v47  ;;  %v7168_v47 = vcombine.low %v4987_v35, %v4991_v36  ;;  %v7272_v35 = vcombine.low %v5091_v40, %v5095_v30  ;;  %v5099_v36 = vld [vmem:[%s10365_s13 + $0x540] sm:$0xff] }
 0xa53   :  { %6386 = vmatprep.subr.bf16.mxu0 %v7261_v49  ;;  %v7185_v49 = vcombine.high %v5003_v50, %v5007_v0 }
 0xa56   :  { %6387 = vmatpush1.bf16.msra.mxu0 %v7260_v33  ;;  %v7176_v33 = vcombine.low %v4995_v43, %v4999_v41  ;;  %v5101_v43 = vld [vmem:[%s10365_s13 + $0x550] sm:$0xff] }
 0xa57   :  { %6388 = vmatprep.subr.bf16.mxu0 %v7269_v1  ;;  %v7193_v1 = vcombine.high %v5011_v4, %v5015_v27  ;;  %v5105_v41 = vld [vmem:[%s10365_s13 + $0x570] sm:$0xff] }
 0xa5a   :  { %6389 = vmatpush1.bf16.msra.mxu0 %v7268_v51  ;;  %v7184_v51 = vcombine.low %v5003_v50, %v5007_v0  ;;  %v7284_v50 = vcombine.low %v5101_v43, %v5105_v41  ;;  %v5107_v0 = vld [vmem:[%s10365_s13 + $0x580] sm:$0xff] }
 0xa5b   :  { %6390 = vmatprep.subr.bf16.mxu0 %v7277_v28  ;;  %v7201_v28 = vcombine.high %v5019_v52, %v5023_v56 }
 0xa5e   :  { %6391 = vmatpush1.bf16.msra.mxu0 %v7276_v5  ;;  %v7192_v5 = vcombine.low %v5011_v4, %v5015_v27  ;;  %v5109_v4 = vld [vmem:[%s10365_s13 + $0x590] sm:$0xff] }
 0xa5f   :  { %v5113_v27 = vld [vmem:[%s10365_s13 + $0x5b0] sm:$0xff] }
 0xadf   :  { %v4789_v46 = vpop.f32.mrb[44].mxu1 }
 0xae0   :  { %v4793_v37 = vmul.f32 0.125, %v4789_v46  ;;  %v7684_v58 = vpop.f32.mrb[45].mxu1  ;;  %v5027_v46 = vld [vmem:[%s10365_s13 + $0x300] sm:$0xff] }
 0xae1   :  { %v7200_v58 = vcombine.low %v5019_v52, %v5023_v56  ;;  %v7292_v52 = vcombine.low %v5109_v4, %v5113_v27  ;;  %v5115_v56 = vld [vmem:[%s10365_s13 + $0x5c0] sm:$0xff] }
 0xae2   :  { %v4794_v23 = vmul.f32 %v4793_v37, %v4793_v37 }
 0xae4   :  { %v4796_v59 = vrot.slane %v4794_v23, 7 }
 0xae6   :  { %v4798_v61 = vsub.f32 %v4793_v37, %v4796_v59  ;;  %v5035_v59 = vld [vmem:[%s10365_s13 + $0x340] sm:$0xff] }
 0xae8   :  { %v4799_v62 = vmax.f32 %v4798_v61, 0.0  ;;  %v5039_v61 = vld [vmem:[%s10365_s13 + $0x360] sm:$0xff] }
 0xaea   :  { %v4800_v2 = vadd.f32 1e-05, %v4799_v62 }
 0xaec   :  { %8476 = vrsqrt.f32 %v4800_v2  ;;  %v7217_v2 = vcombine.high %v5035_v59, %v5039_v61 }
 0xaf6   :  { %v8477_v3 = vpop.eup %8476 }
 0xaf7   :  { %v4803_v7 = vrot.slane %v8477_v3, 1  ;;  %v5043_v3 = vld [vmem:[%s10365_s13 + $0x380] sm:$0xff] }
 0xaf9   :  { %v4805_v8 = vmul.f32 %v4803_v7, %v4793_v37  ;;  %v5031_v37 = vld [vmem:[%s10365_s13 + $0x320] sm:$0xff] }
 0xafa   :  { %v7209_v23 = vcombine.high %v5027_v46, %v5031_v37  ;;  %v7208_v62 = vcombine.low %v5027_v46, %v5031_v37  ;;  %v5117_v46 = vld [vmem:[%s10365_s13 + $0x5d0] sm:$0xff] }
 0xafb   :  { %v4807_v10 = vrot.slane %v4805_v8, 7  ;;  %v7216_v8 = vcombine.low %v5035_v59, %v5039_v61  ;;  %v5121_v37 = vld [vmem:[%s10365_s13 + $0x5f0] sm:$0xff]  ;;  %v5123_v61 = vld [vmem:[%s10365_s13 + $0x600] sm:$0x33] }
 0xafc   :  { %v7301_v59 = vcombine.high %v5117_v46, %v5121_v37 }
 0xafd   :  { %v4809_v39 = vsel %vm751_vm3, %v4803_v7, %v4807_v10  ;;  %v5047_v7 = vld [vmem:[%s10365_s13 + $0x3a0] sm:$0xff] }
 0xafe   :  { %7694 = vmatmul.mubr.msk.f32.vlgmr.msra.gmra.mrb[46].mxu1 %vm3303_vm6, %v4809_v39  ;;  %v7225_v60 = vcombine.high %v5043_v3, %v5047_v7  ;;  %v5055_v10 = vld [vmem:[%s10365_s13 + $0x3e0] sm:$0xff] }
 0xaff   :  { %6178 = vmatpush1.bf16.msra.mxu1 %v7112_v17  ;;  %6209 = vmatprep.mubr.bf16.mxu1 %v9767_v44  ;;  %v7136_v17 = vcombine.low %v4955_v15, %v4959_v18  ;;  %v7233_v39 = vcombine.high %v5051_v9, %v5055_v10  ;;  %v5067_v15 = vld [vmem:[%s10365_s13 + $0x440] sm:$0xff] }
 0xb00   :  { %6179 = vmatprep.subr.bf16.mxu1 %v7121_v45  ;;  %v7224_v45 = vcombine.low %v5043_v3, %v5047_v7  ;;  %v5071_v18 = vld [vmem:[%s10365_s13 + $0x460] sm:$0xff]  ;;  %v7305_v3 = vcombine.high %v5123_v61, %v5123_v61  ;;  %v7304_v7 = vcombine.low %v5123_v61, %v5123_v61  ;;  %v5004_v61 = vld [vmem:[%s10365_s13 + $0x248] sm:$0xff] }
 0xb03   :  { %6180 = vmatpush1.bf16.msra.mxu1 %v7120_v12  ;;  %v7232_v12 = vcombine.low %v5051_v9, %v5055_v10  ;;  %v4932_v9 = vld [vmem:[%s10365_s13 + $0x8] sm:$0xff] }
 0xb04   :  { %6181 = vmatprep.subr.bf16.mxu1 %v7129_v14  ;;  %v7241_v14 = vcombine.high %v5059_v55, %v5063_v11  ;;  %v4936_v10 = vld [vmem:[%s10365_s13 + $0x28] sm:$0xff] }
 0xb07   :  { %6182 = vmatpush1.bf16.msra.mxu1 %v7128_v19  ;;  %v7240_v19 = vcombine.low %v5059_v55, %v5063_v11  ;;  %v6154_v55 = vsel %vm4706_vm7, %v7304_v7, 0  ;;  %v7115_v11 = vcombine.high %v4932_v9, %v4936_v10  ;;  %v5012_v7 = vld [vmem:[%s10365_s13 + $0x288] sm:$0xff] }
 0xb08   :  { %6183 = vmatprep.subr.bf16.mxu1 %v7137_v21  ;;  %v7249_v21 = vcombine.high %v5067_v15, %v5071_v18 }
 0xb0b   :  { %6184 = vmatpush1.bf16.msra.mxu1 %v7136_v17  ;;  %v7248_v17 = vcombine.low %v5067_v15, %v5071_v18 }
 0xb0c   :  { %6185 = vmatprep.subr.bf16.mxu1 %v7145_v24  ;;  %v7257_v24 = vcombine.high %v5075_v57, %v5079_v16 }
 0xb0f   :  { %6186 = vmatpush1.bf16.msra.mxu1 %v7144_v6  ;;  %v7256_v6 = vcombine.low %v5075_v57, %v5079_v16 }
 0xb10   :  { %6187 = vmatprep.subr.bf16.mxu1 %v7153_v29  ;;  %v7265_v29 = vcombine.high %v5083_v25, %v5087_v54 }
 0xb13   :  { %6188 = vmatpush1.bf16.msra.mxu1 %v7152_v13  ;;  %v7264_v13 = vcombine.low %v5083_v25, %v5087_v54 }
 0xb14   :  { %6189 = vmatprep.subr.bf16.mxu1 %v7161_v31  ;;  %v7273_v31 = vcombine.high %v5091_v40, %v5095_v30 }
 0xb17   :  { %6190 = vmatpush1.bf16.msra.mxu1 %v7160_v38  ;;  %v5103_v38 = vld [vmem:[%s10365_s13 + $0x560] sm:$0xff] }
 0xb18   :  { %6191 = vmatprep.subr.bf16.mxu1 %v7169_v42  ;;  %v7281_v42 = vcombine.high %v5099_v36, %v5103_v38 }
 0xb1b   :  { %6192 = vmatpush1.bf16.msra.mxu1 %v7168_v47  ;;  %v7280_v47 = vcombine.low %v5099_v36, %v5103_v38  ;;  %v4956_v36 = vld [vmem:[%s10365_s13 + $0xc8] sm:$0xff] }
 0xb1c   :  { %6193 = vmatprep.subr.bf16.mxu1 %v7177_v48  ;;  %v7285_v48 = vcombine.high %v5101_v43, %v5105_v41  ;;  %v4960_v38 = vld [vmem:[%s10365_s13 + $0xe8] sm:$0xff] }
 0xb1d   :  { %v7139_v43 = vcombine.high %v4956_v36, %v4960_v38  ;;  %v4964_v41 = vld [vmem:[%s10365_s13 + $0x108] sm:$0xff] }
 0xb1e   :  { %6392 = vmatprep.subr.bf16.mxu0 %v7285_v48  ;;  %v7138_v48 = vcombine.low %v4956_v36, %v4960_v38  ;;  %v5068_v36 = vld [vmem:[%s10365_s13 + $0x448] sm:$0xff] }
 0xb1f   :  { %6194 = vmatpush1.bf16.msra.mxu1 %v7176_v33  ;;  %v5111_v33 = vld [vmem:[%s10365_s13 + $0x5a0] sm:$0xff]  ;;  %6393 = vmatpush1.bf16.msra.mxu0 %v7284_v50  ;;  %v5072_v38 = vld [vmem:[%s10365_s13 + $0x468] sm:$0xff] }
 0xb20   :  { %6195 = vmatprep.subr.bf16.mxu1 %v7185_v49  ;;  %v7289_v49 = vcombine.high %v5107_v0, %v5111_v33 }
 0xb23   :  { %6196 = vmatpush1.bf16.msra.mxu1 %v7184_v51  ;;  %v7288_v51 = vcombine.low %v5107_v0, %v5111_v33  ;;  %v4972_v0 = vld [vmem:[%s10365_s13 + $0x148] sm:$0xff] }
 0xb24   :  { %6197 = vmatprep.subr.bf16.mxu1 %v7193_v1  ;;  %v7293_v1 = vcombine.high %v5109_v4, %v5113_v27  ;;  %v4976_v33 = vld [vmem:[%s10365_s13 + $0x168] sm:$0xff] }
 0xb25   :  { %v7155_v4 = vcombine.high %v4972_v0, %v4976_v33  ;;  %v4980_v27 = vld [vmem:[%s10365_s13 + $0x188] sm:$0xff] }
 0xb26   :  { %6394 = vmatprep.subr.bf16.mxu0 %v7293_v1  ;;  %v7154_v1 = vcombine.low %v4972_v0, %v4976_v33  ;;  %v5084_v0 = vld [vmem:[%s10365_s13 + $0x4c8] sm:$0xff] }
 0xb27   :  { %6198 = vmatpush1.bf16.msra.mxu1 %v7192_v5  ;;  %v5119_v5 = vld [vmem:[%s10365_s13 + $0x5e0] sm:$0xff]  ;;  %6395 = vmatpush1.bf16.msra.mxu0 %v7292_v52  ;;  %v5088_v33 = vld [vmem:[%s10365_s13 + $0x4e8] sm:$0xff] }
 0xb28   :  { %6199 = vmatprep.subr.bf16.mxu1 %v7201_v28  ;;  %v7297_v28 = vcombine.high %v5115_v56, %v5119_v5  ;;  %6396 = vmatprep.subr.bf16.mxu0 %v7301_v59 }
 0xb2b   :  { %6200 = vmatpush1.bf16.msra.mxu1 %v7200_v58  ;;  %v7296_v58 = vcombine.low %v5115_v56, %v5119_v5  ;;  %v4988_v56 = vld [vmem:[%s10365_s13 + $0x1c8] sm:$0xff] }
 0xb2c   :  { %6201 = vmatprep.subr.bf16.mxu1 %v7209_v23  ;;  %v7300_v23 = vcombine.low %v5117_v46, %v5121_v37  ;;  %v4992_v5 = vld [vmem:[%s10365_s13 + $0x1e8] sm:$0xff] }
 0xb2d   :  { %v7171_v46 = vcombine.high %v4988_v56, %v4992_v5  ;;  %v4996_v37 = vld [vmem:[%s10365_s13 + $0x208] sm:$0xff] }
 0xb2e   :  { %6397 = vmatpush1.bf16.msra.mxu0 %v7300_v23  ;;  %v7170_v23 = vcombine.low %v4988_v56, %v4992_v5  ;;  %v5100_v56 = vld [vmem:[%s10365_s13 + $0x548] sm:$0xff] }
 0xb2f   :  { %6202 = vmatpush1.bf16.msra.mxu1 %v7208_v62  ;;  %v5125_v62 = vld [vmem:[%s10365_s13 + $0x610] sm:$0x33]  ;;  %v5104_v5 = vld [vmem:[%s10365_s13 + $0x568] sm:$0xff] }
 0xb30   :  { %6203 = vmatprep.subr.bf16.mxu1 %v7217_v2  ;;  %v4929_v2 = vld [vmem:[#allocation19] sm:$0x3] }
 0xb33   :  { %6204 = vmatpush1.bf16.msra.mxu1 %v7216_v8  ;;  %v7309_v8 = vcombine.high %v5125_v62, %v5125_v62 }
 0xb34   :  { %6205 = vmatprep.subr.bf16.mxu1 %v7225_v60  ;;  %v7308_v60 = vcombine.low %v5125_v62, %v5125_v62  ;;  %v5008_v62 = vld [vmem:[%s10365_s13 + $0x268] sm:$0xff] }
 0xb35   :  { %7316 = vmatprep.subr.msk.bf16.mxu0 %vm4706_vm7, %v7309_v8  ;;  %v5016_v8 = vld [vmem:[%s10365_s13 + $0x2a8] sm:$0xff] }
 0xb37   :  { %6206 = vmatpush1.bf16.msra.mxu1 %v7224_v45  ;;  %v9978_v45 = vpack.c.bf16 %v4929_v2, %v4929_v2 }
 0xb38   :  { %6207 = vmatprep.subr.bf16.mxu1 %v7233_v39  ;;  %v7114_v39 = vcombine.low %v4932_v9, %v4936_v10  ;;  %v7195_v9 = vcombine.high %v5012_v7, %v5016_v8  ;;  %v5020_v10 = vld [vmem:[%s10365_s13 + $0x2c8] sm:$0xff] }
 0xb39   :  { %7317 = vmatprep.mubr.msk.bf16.mxu0 %vm6149_vm8, %v9978_v45 }
 0xb3b   :  { %6208 = vmatpush1.bf16.msra.mxu1 %v7232_v12  ;;  %v6166_v12 = vsel %vm4706_vm7, %v7308_v60, 0  ;;  %v7186_v60 = vcombine.low %v5004_v61, %v5008_v62 }
 0xb3c   :  { %6218 = vmatprep.subr.bf16.mxu1 %v7241_v14  ;;  %6399 = vmatpush1.bf16.msra.mxu0 %v6166_v12  ;;  %v5028_v12 = vld [vmem:[%s10365_s13 + $0x308] sm:$0xff] }
 0xb3e   :  { %6210 = vmatmul.mubr.bf16.vlgmr.msra.gmra.mrb[48].mxu1 %v9769_v32 }
 0xb3f   :  { %6219 = vmatpush1.bf16.msra.mxu1 %v7240_v19  ;;  %7313 = vmatprep.mubr.msk.bf16.mxu1 %vm6149_vm8, %v9978_v45 }
 0xb40   :  { %6220 = vmatprep.subr.bf16.mxu1 %v7249_v21  ;;  %v4705_v21 = vld [vmem:[#allocation16] sm:$0x1] }
 0xb43   :  { %6221 = vmatpush1.bf16.msra.mxu1 %v7248_v17 }
 0xb44   :  { %6222 = vmatprep.subr.bf16.mxu1 %v7257_v24 }
 0xb47   :  { %6223 = vmatpush1.bf16.msra.mxu1 %v7256_v6  ;;  %v4940_v6 = vld [vmem:[%s10365_s13 + $0x48] sm:$0xff] }
 0xb48   :  { %6224 = vmatprep.subr.bf16.mxu1 %v7265_v29  ;;  %v4944_v29 = vld [vmem:[%s10365_s13 + $0x68] sm:$0xff] }
 0xb4b   :  { %6225 = vmatpush1.bf16.msra.mxu1 %v7264_v13  ;;  %v7123_v13 = vcombine.high %v4940_v6, %v4944_v29 }
 0xb4c   :  { %6226 = vmatprep.subr.bf16.mxu1 %v7273_v31  ;;  %v7122_v31 = vcombine.low %v4940_v6, %v4944_v29  ;;  %v5052_v6 = vld [vmem:[%s10365_s13 + $0x3c8] sm:$0xff] }
 0xb4d   :  { %v5056_v29 = vld [vmem:[%s10365_s13 + $0x3e8] sm:$0xff] }
 0xb4f   :  { %6227 = vmatpush1.bf16.msra.mxu1 %v7272_v35 }
 0xb50   :  { %6228 = vmatprep.subr.bf16.mxu1 %v7281_v42 }
 0xb53   :  { %6229 = vmatpush1.bf16.msra.mxu1 %v7280_v47  ;;  %v4968_v47 = vld [vmem:[%s10365_s13 + $0x128] sm:$0xff] }
 0xb54   :  { %6230 = vmatprep.subr.bf16.mxu1 %v7289_v49  ;;  %v7147_v50 = vcombine.high %v4964_v41, %v4968_v47  ;;  %v7146_v49 = vcombine.low %v4964_v41, %v4968_v47  ;;  %v5076_v41 = vld [vmem:[%s10365_s13 + $0x488] sm:$0xff] }
 0xb55   :  { %v5080_v47 = vld [vmem:[%s10365_s13 + $0x4a8] sm:$0xff] }
 0xb57   :  { %6231 = vmatpush1.bf16.msra.mxu1 %v7288_v51  ;;  %v4984_v51 = vld [vmem:[%s10365_s13 + $0x1a8] sm:$0xff] }
 0xb58   :  { %6232 = vmatprep.subr.bf16.mxu1 %v7297_v28  ;;  %v7163_v52 = vcombine.high %v4980_v27, %v4984_v51  ;;  %v7162_v28 = vcombine.low %v4980_v27, %v4984_v51  ;;  %v5092_v27 = vld [vmem:[%s10365_s13 + $0x508] sm:$0xff] }
 0xb59   :  { %v5096_v51 = vld [vmem:[%s10365_s13 + $0x528] sm:$0xff] }
 0xb5b   :  { %6233 = vmatpush1.bf16.msra.mxu1 %v7296_v58  ;;  %v5000_v58 = vld [vmem:[%s10365_s13 + $0x228] sm:$0xff] }
 0xb5c   :  { %7312 = vmatprep.subr.msk.bf16.mxu1 %vm4706_vm7, %v7305_v3  ;;  %v7179_v59 = vcombine.high %v4996_v37, %v5000_v58  ;;  %v7178_v2 = vcombine.low %v4996_v37, %v5000_v58  ;;  %v7187_v3 = vcombine.high %v5004_v61, %v5008_v62  ;;  %v5108_v37 = vld [vmem:[%s10365_s13 + $0x588] sm:$0xff] }
 0xb5d   :  { %v5112_v58 = vld [vmem:[%s10365_s13 + $0x5a8] sm:$0xff] }
 0xb5e   :  { %v5116_v61 = vld [vmem:[%s10365_s13 + $0x5c8] sm:$0xff] }
 0xb5f   :  { %6235 = vmatpush1.bf16.msra.mxu1 %v6154_v55  ;;  %v7194_v55 = vcombine.low %v5012_v7, %v5016_v8  ;;  %v5120_v62 = vld [vmem:[%s10365_s13 + $0x5e8] sm:$0xff] }
 0xb60   :  { %6259 = vmatprep.subr.bf16.mxu1 %v7115_v11  ;;  %v5124_v7 = vld [vmem:[%s10365_s13 + $0x608] sm:$0x33]  ;;  %v7298_v8 = vcombine.low %v5116_v61, %v5120_v62 }
 0xbd1   :  { %v4879_v14 = vpop.f32.mrb[46].mxu1 }
 0xbd2   :  { %v4895_v15 = vrot.slane %v4879_v14, %v9342_v34  ;;  %v7695_v18 = vpop.f32.mrb[47].mxu1  ;;  %v4886_v57 = vrot.slane %v4879_v14, %v9338_v26  ;;  %v5032_v14 = vld [vmem:[%s10365_s13 + $0x328] sm:$0xff] }
 0xbd3   :  { %v7211_v18 = vcombine.high %v5028_v12, %v5032_v14 }
 0xbd4   :  { %v4896_v19 = vcombine.high %v4895_v15, %v4895_v15  ;;  %v4887_v24 = vmul.f32 %v4886_v57, %v9631_v20  ;;  %v4952_v20 = vld [vmem:[%s10365_s13 + $0xa8] sm:$0xff]  ;;  %v7210_v57 = vcombine.low %v5028_v12, %v5032_v14  ;;  %v4942_v12 = vld [vmem:[%s10365_s13 + $0x58] sm:$0xff] }
 0xbd5   :  { %v4946_v14 = vld [vmem:[%s10365_s13 + $0x78] sm:$0xff] }
 0xbd6   :  { %v4903_v16 = vrot.slane %v4896_v19, %v9342_v34  ;;  %v4948_v34 = vld [vmem:[%s10365_s13 + $0x88] sm:$0xff] }
 0xbd7   :  { %v7131_v35 = vcombine.high %v4948_v34, %v4952_v20  ;;  %v7130_v42 = vcombine.low %v4948_v34, %v4952_v20  ;;  %v5036_v19 = vld [vmem:[%s10365_s13 + $0x348] sm:$0xff] }
 0xbd8   :  { %v4905_v17 = vsub.f32 %v4705_v21, %v4903_v16  ;;  %v5040_v21 = vld [vmem:[%s10365_s13 + $0x368] sm:$0xff] }
 0xbd9   :  { %v7219_v16 = vcombine.high %v5036_v19, %v5040_v21  ;;  %v5060_v34 = vld [vmem:[%s10365_s13 + $0x408] sm:$0xff] }
 0xbda   :  { %v4910_v25 = vrot.slane %v4905_v17, %v9338_v26  ;;  %v5044_v17 = vld [vmem:[%s10365_s13 + $0x388] sm:$0xff] }
 0xbdb   :  { %v5064_v20 = vld [vmem:[%s10365_s13 + $0x428] sm:$0xff] }
 0xbdc   :  { %v4912_v54 = vadd.f32 %v4910_v25, %v4887_v24  ;;  %v5048_v24 = vld [vmem:[%s10365_s13 + $0x3a8] sm:$0xff]  ;;  %v7218_v25 = vcombine.low %v5036_v19, %v5040_v21  ;;  %v4950_v19 = vld [vmem:[%s10365_s13 + $0x98] sm:$0xff] }
 0xbdd   :  { %v4954_v21 = vld [vmem:[%s10365_s13 + $0xb8] sm:$0xff] }
 0xbde   :  { %v4913_v40 = vmax.f32 %v4912_v54, 0.0  ;;  %v7227_v54 = vcombine.high %v5044_v17, %v5048_v24 }
 0xbe0   :  { %v9999_v30 = vpack.c.bf16 %v4913_v40, %v4913_v40  ;;  %v7226_v40 = vcombine.low %v5044_v17, %v5048_v24  ;;  %v4958_v17 = vld [vmem:[%s10365_s13 + $0xd8] sm:$0xff] }
 0xbe1   :  { %v4962_v24 = vld [vmem:[%s10365_s13 + $0xf8] sm:$0xff] }
 0xbe2   :  { %6251 = vmatmul.mubr.bf16.vlgmr.msra.gmra.mrb[48].mxu1 %v9999_v30  ;;  %6415 = vmatmul.mubr.bf16.vlgmr.msra.gmra.mrb[24].mxu0 %v9999_v30 }
 0xbe3   :  { %6260 = vmatpush1.bf16.msra.mxu1 %v7114_v39  ;;  %6291 = vmatprep.mubr.bf16.mxu1 %v9767_v44  ;;  %v5024_v39 = vld [vmem:[%s10365_s13 + $0x2e8] sm:$0xff] }
 0xbe4   :  { %6261 = vmatprep.subr.bf16.mxu1 %v7123_v13  ;;  %v7203_v11 = vcombine.high %v5020_v10, %v5024_v39  ;;  %v7202_v15 = vcombine.low %v5020_v10, %v5024_v39  ;;  %v7235_v13 = vcombine.high %v5052_v6, %v5056_v29  ;;  %v4934_v10 = vld [vmem:[%s10365_s13 + $0x18] sm:$0xff] }
 0xbe5   :  { %v4938_v39 = vld [vmem:[%s10365_s13 + $0x38] sm:$0xff] }
 0xbe7   :  { %6262 = vmatpush1.bf16.msra.mxu1 %v7122_v31  ;;  %v7234_v31 = vcombine.low %v5052_v6, %v5056_v29  ;;  %v4966_v6 = vld [vmem:[%s10365_s13 + $0x118] sm:$0xff]  ;;  %v7142_v29 = vcombine.low %v4958_v17, %v4962_v24 }
 0xbe8   :  { %6263 = vmatprep.subr.bf16.mxu1 %v7131_v35  ;;  %v7243_v35 = vcombine.high %v5060_v34, %v5064_v20 }
 0xbeb   :  { %6264 = vmatpush1.bf16.msra.mxu1 %v7130_v42  ;;  %v7242_v42 = vcombine.low %v5060_v34, %v5064_v20  ;;  %v4978_v34 = vld [vmem:[%s10365_s13 + $0x178] sm:$0xff] }
 0xbec   :  { %6265 = vmatprep.subr.bf16.mxu1 %v7139_v43  ;;  %v7251_v43 = vcombine.high %v5068_v36, %v5072_v38 }
 0xbef   :  { %6266 = vmatpush1.bf16.msra.mxu1 %v7138_v48  ;;  %v7250_v48 = vcombine.low %v5068_v36, %v5072_v38  ;;  %v4986_v36 = vld [vmem:[%s10365_s13 + $0x1b8] sm:$0xff] }
 0xbf0   :  { %6267 = vmatprep.subr.bf16.mxu1 %v7147_v50  ;;  %v7259_v50 = vcombine.high %v5076_v41, %v5080_v47 }
 0xbf3   :  { %6268 = vmatpush1.bf16.msra.mxu1 %v7146_v49  ;;  %v7258_v49 = vcombine.low %v5076_v41, %v5080_v47  ;;  %v4994_v41 = vld [vmem:[%s10365_s13 + $0x1f8] sm:$0xff] }
 0xbf4   :  { %6269 = vmatprep.subr.bf16.mxu1 %v7155_v4  ;;  %v7267_v4 = vcombine.high %v5084_v0, %v5088_v33 }
 0xbf7   :  { %6270 = vmatpush1.bf16.msra.mxu1 %v7154_v1  ;;  %v7266_v1 = vcombine.low %v5084_v0, %v5088_v33  ;;  %v5002_v0 = vld [vmem:[%s10365_s13 + $0x238] sm:$0xff] }
 0xbf8   :  { %6271 = vmatprep.subr.bf16.mxu1 %v7163_v52  ;;  %v7275_v52 = vcombine.high %v5092_v27, %v5096_v51 }
 0xbfb   :  { %6272 = vmatpush1.bf16.msra.mxu1 %v7162_v28  ;;  %v7274_v28 = vcombine.low %v5092_v27, %v5096_v51  ;;  %v5010_v27 = vld [vmem:[%s10365_s13 + $0x278] sm:$0xff] }
 0xbfc   :  { %6273 = vmatprep.subr.bf16.mxu1 %v7171_v46  ;;  %v7283_v46 = vcombine.high %v5100_v56, %v5104_v5 }
 0xbff   :  { %6274 = vmatpush1.bf16.msra.mxu1 %v7170_v23  ;;  %v7282_v23 = vcombine.low %v5100_v56, %v5104_v5  ;;  %v5018_v56 = vld [vmem:[%s10365_s13 + $0x2b8] sm:$0xff] }
 0xc00   :  { %6275 = vmatprep.subr.bf16.mxu1 %v7179_v59  ;;  %v7291_v59 = vcombine.high %v5108_v37, %v5112_v58 }
 0xc03   :  { %6276 = vmatpush1.bf16.msra.mxu1 %v7178_v2  ;;  %v7290_v2 = vcombine.low %v5108_v37, %v5112_v58  ;;  %v5026_v37 = vld [vmem:[%s10365_s13 + $0x2f8] sm:$0xff] }
 0xc04   :  { %6277 = vmatprep.subr.bf16.mxu1 %v7187_v3  ;;  %v7299_v3 = vcombine.high %v5116_v61, %v5120_v62  ;;  %v5034_v61 = vld [vmem:[%s10365_s13 + $0x338] sm:$0xff] }
 0xc07   :  { %6278 = vmatpush1.bf16.msra.mxu1 %v7186_v60  ;;  %v7307_v60 = vcombine.high %v5124_v7, %v5124_v7 }
 0xc08   :  { %6279 = vmatprep.subr.bf16.mxu1 %v7195_v9  ;;  %v7306_v9 = vcombine.low %v5124_v7, %v5124_v7  ;;  %v5042_v7 = vld [vmem:[%s10365_s13 + $0x378] sm:$0xff] }
 0xc0b   :  { %6280 = vmatpush1.bf16.msra.mxu1 %v7194_v55  ;;  %v6160_v55 = vsel %vm4706_vm7, %v7306_v9, 0  ;;  %v5046_v9 = vld [vmem:[%s10365_s13 + $0x398] sm:$0xff] }
 0xc0c   :  { %6281 = vmatprep.subr.bf16.mxu1 %v7203_v11  ;;  %v7119_v11 = vcombine.high %v4934_v10, %v4938_v39 }
 0xc0f   :  { %6282 = vmatpush1.bf16.msra.mxu1 %v7202_v15  ;;  %v7118_v15 = vcombine.low %v4934_v10, %v4938_v39  ;;  %v5050_v10 = vld [vmem:[%s10365_s13 + $0x3b8] sm:$0xff] }
 0xc10   :  { %6283 = vmatprep.subr.bf16.mxu1 %v7211_v18  ;;  %v7127_v18 = vcombine.high %v4942_v12, %v4946_v14 }
 0xc13   :  { %6284 = vmatpush1.bf16.msra.mxu1 %v7210_v57  ;;  %v7126_v57 = vcombine.low %v4942_v12, %v4946_v14  ;;  %v5058_v12 = vld [vmem:[%s10365_s13 + $0x3f8] sm:$0xff]  ;;  %v7230_v14 = vcombine.low %v5046_v9, %v5050_v10 }
 0xc14   :  { %6285 = vmatprep.subr.bf16.mxu1 %v7219_v16  ;;  %v7135_v16 = vcombine.high %v4950_v19, %v4954_v21 }
 0xc17   :  { %6286 = vmatpush1.bf16.msra.mxu1 %v7218_v25  ;;  %v7134_v25 = vcombine.low %v4950_v19, %v4954_v21  ;;  %v5066_v19 = vld [vmem:[%s10365_s13 + $0x438] sm:$0xff] }
 0xc18   :  { %6287 = vmatprep.subr.bf16.mxu1 %v7227_v54  ;;  %v7143_v54 = vcombine.high %v4958_v17, %v4962_v24  ;;  %v5074_v17 = vld [vmem:[%s10365_s13 + $0x478] sm:$0xff] }
 0xc1b   :  { %6288 = vmatpush1.bf16.msra.mxu1 %v7226_v40 }
 0xc1c   :  { %6289 = vmatprep.subr.bf16.mxu1 %v7235_v13  ;;  %v4974_v13 = vld [vmem:[%s10365_s13 + $0x158] sm:$0xff] }
 0xc1d   :  { %v7158_v38 = vcombine.low %v4974_v13, %v4978_v34 }
 0xc1f   :  { %6290 = vmatpush1.bf16.msra.mxu1 %v7234_v31  ;;  %v7159_v31 = vcombine.high %v4974_v13, %v4978_v34  ;;  %v5090_v13 = vld [vmem:[%s10365_s13 + $0x4f8] sm:$0xff] }
 0xc20   :  { %6300 = vmatprep.subr.bf16.mxu1 %v7243_v35  ;;  %v4982_v35 = vld [vmem:[%s10365_s13 + $0x198] sm:$0xff] }
 0xc21   :  { %v7166_v47 = vcombine.low %v4982_v35, %v4986_v36 }
 0xc22   :  { %6292 = vmatmul.mubr.bf16.vlgmr.msra.gmra.mrb[52].mxu1 %v9769_v32 }
 0xc23   :  { %6301 = vmatpush1.bf16.msra.mxu1 %v7242_v42  ;;  %7315 = vmatprep.mubr.msk.bf16.mxu1 %vm6149_vm8, %v9978_v45  ;;  %v7167_v42 = vcombine.high %v4982_v35, %v4986_v36  ;;  %v5102_v36 = vld [vmem:[%s10365_s13 + $0x558] sm:$0xff] }
 0xc24   :  { %6302 = vmatprep.subr.bf16.mxu1 %v7251_v43  ;;  %v4990_v43 = vld [vmem:[%s10365_s13 + $0x1d8] sm:$0xff] }
 0xc25   :  { %v7174_v33 = vcombine.low %v4990_v43, %v4994_v41 }
 0xc27   :  { %6303 = vmatpush1.bf16.msra.mxu1 %v7250_v48  ;;  %v7175_v48 = vcombine.high %v4990_v43, %v4994_v41  ;;  %v5110_v41 = vld [vmem:[%s10365_s13 + $0x598] sm:$0xff] }
 0xc28   :  { %6304 = vmatprep.subr.bf16.mxu1 %v7259_v50  ;;  %v4998_v50 = vld [vmem:[%s10365_s13 + $0x218] sm:$0xff] }
 0xc29   :  { %v7182_v51 = vcombine.low %v4998_v50, %v5002_v0 }
 0xc2b   :  { %6305 = vmatpush1.bf16.msra.mxu1 %v7258_v49  ;;  %v7183_v49 = vcombine.high %v4998_v50, %v5002_v0  ;;  %v5118_v0 = vld [vmem:[%s10365_s13 + $0x5d8] sm:$0xff] }
 0xc2c   :  { %6306 = vmatprep.subr.bf16.mxu1 %v7267_v4  ;;  %v5006_v4 = vld [vmem:[%s10365_s13 + $0x258] sm:$0xff] }
 0xc2d   :  { %v7190_v5 = vcombine.low %v5006_v4, %v5010_v27 }
 0xc2f   :  { %6307 = vmatpush1.bf16.msra.mxu1 %v7266_v1  ;;  %v7191_v1 = vcombine.high %v5006_v4, %v5010_v27  ;;  %v5126_v27 = vld [vmem:[%s10365_s13 + $0x618] sm:$0x33] }
 0xc30   :  { %6308 = vmatprep.subr.bf16.mxu1 %v7275_v52  ;;  %v5014_v52 = vld [vmem:[%s10365_s13 + $0x298] sm:$0xff] }
 0xc31   :  { %v7198_v58 = vcombine.low %v5014_v52, %v5018_v56 }
 0xc33   :  { %6309 = vmatpush1.bf16.msra.mxu1 %v7274_v28  ;;  %v7199_v28 = vcombine.high %v5014_v52, %v5018_v56  ;;  %v7310_v52 = vcombine.low %v5126_v27, %v5126_v27 }
 0xc34   :  { %6310 = vmatprep.subr.bf16.mxu1 %v7283_v46  ;;  %v5022_v46 = vld [vmem:[%s10365_s13 + $0x2d8] sm:$0xff] }
 0xc35   :  { %v7206_v62 = vcombine.low %v5022_v46, %v5026_v37  ;;  %v6172_v56 = vsel %vm4706_vm7, %v7310_v52, 0 }
 0xc37   :  { %6311 = vmatpush1.bf16.msra.mxu1 %v7282_v23  ;;  %v7207_v23 = vcombine.high %v5022_v46, %v5026_v37 }
 0xc38   :  { %6312 = vmatprep.subr.bf16.mxu1 %v7291_v59  ;;  %v5030_v59 = vld [vmem:[%s10365_s13 + $0x318] sm:$0xff] }
 0xc3b   :  { %6313 = vmatpush1.bf16.msra.mxu1 %v7290_v2  ;;  %v7215_v2 = vcombine.high %v5030_v59, %v5034_v61 }
 0xc3c   :  { %6314 = vmatprep.subr.bf16.mxu1 %v7299_v3  ;;  %v5038_v3 = vld [vmem:[%s10365_s13 + $0x358] sm:$0xff] }
 0xc3d   :  { %v7222_v39 = vcombine.low %v5038_v3, %v5042_v7 }
 0xc3f   :  { %6315 = vmatpush1.bf16.msra.mxu1 %v7298_v8  ;;  %v7214_v8 = vcombine.low %v5030_v59, %v5034_v61 }
 0xc40   :  { %7314 = vmatprep.subr.msk.bf16.mxu1 %vm4706_vm7, %v7307_v60  ;;  %v7223_v60 = vcombine.high %v5038_v3, %v5042_v7 }
 0xc43   :  { %6317 = vmatpush1.bf16.msra.mxu1 %v6160_v55  ;;  %v7231_v55 = vcombine.high %v5046_v9, %v5050_v10  ;;  %v5151_v10 = vsub.s32 5, %v9335_v22 }
 0xc44   :  { %6423 = vmatprep.subr.bf16.mxu1 %v7119_v11  ;;  %v5054_v11 = vld [vmem:[%s10365_s13 + $0x3d8] sm:$0xff] }
 0xc45   :  { %v7238_v21 = vcombine.low %v5054_v11, %v5058_v12 }
 0xc46   :  { %6333 = vmatmul.mubr.bf16.vlgmr.msra.gmra.mrb[52].mxu1 %v9999_v30 }
 0xc47   :  { %6424 = vmatpush1.bf16.msra.mxu1 %v7118_v15  ;;  %6455 = vmatprep.mubr.bf16.mxu1 %v9767_v44  ;;  %v4970_v44 = vld [vmem:[%s10365_s13 + $0x138] sm:$0xff]  ;;  %v7239_v15 = vcombine.high %v5054_v11, %v5058_v12 }
 0xc48   :  { %6425 = vmatprep.subr.bf16.mxu1 %v7127_v18  ;;  %v7151_v40 = vcombine.high %v4966_v6, %v4970_v44  ;;  %v7150_v20 = vcombine.low %v4966_v6, %v4970_v44  ;;  %v5062_v18 = vld [vmem:[%s10365_s13 + $0x418] sm:$0xff] }
 0xc49   :  { %v7246_v24 = vcombine.low %v5062_v18, %v5066_v19  ;;  %v5082_v6 = vld [vmem:[%s10365_s13 + $0x4b8] sm:$0xff] }
 0xc4b   :  { %6426 = vmatpush1.bf16.msra.mxu1 %v7126_v57  ;;  %v7247_v57 = vcombine.high %v5062_v18, %v5066_v19 }
 0xc4c   :  { %6427 = vmatprep.subr.bf16.mxu1 %v7135_v16  ;;  %v5070_v16 = vld [vmem:[%s10365_s13 + $0x458] sm:$0xff] }
 0xc4d   :  { %v7254_v44 = vcombine.low %v5070_v16, %v5074_v17 }
 0xc4f   :  { %6428 = vmatpush1.bf16.msra.mxu1 %v7134_v25  ;;  %v7255_v25 = vcombine.high %v5070_v16, %v5074_v17 }
 0xc50   :  { %6429 = vmatprep.subr.bf16.mxu1 %v7143_v54  ;;  %v5078_v54 = vld [vmem:[%s10365_s13 + $0x498] sm:$0xff] }
 0xc51   :  { %v7262_v34 = vcombine.low %v5078_v54, %v5082_v6 }
 0xc53   :  { %6430 = vmatpush1.bf16.msra.mxu1 %v7142_v29  ;;  %v7263_v29 = vcombine.high %v5078_v54, %v5082_v6  ;;  %v5143_v54 = vsub.s32 3, %v9335_v22 }
 0xc54   :  { %6431 = vmatprep.subr.bf16.mxu1 %v7151_v40  ;;  %v5086_v40 = vld [vmem:[%s10365_s13 + $0x4d8] sm:$0xff] }
 0xc57   :  { %6432 = vmatpush1.bf16.msra.mxu1 %v7150_v20  ;;  %v7271_v20 = vcombine.high %v5086_v40, %v5090_v13 }
 0xc58   :  { %6433 = vmatprep.subr.bf16.mxu1 %v7159_v31  ;;  %v7270_v31 = vcombine.low %v5086_v40, %v5090_v13 }
 0xc5b   :  { %6434 = vmatpush1.bf16.msra.mxu1 %v7158_v38  ;;  %v5106_v38 = vld [vmem:[%s10365_s13 + $0x578] sm:$0xff] }
 0xc5c   :  { %6435 = vmatprep.subr.bf16.mxu1 %v7167_v42  ;;  %v7287_v43 = vcombine.high %v5102_v36, %v5106_v38 }
 0xc5f   :  { %6436 = vmatpush1.bf16.msra.mxu1 %v7166_v47  ;;  %v5114_v47 = vld [vmem:[%s10365_s13 + $0x5b8] sm:$0xff] }
 0xc60   :  { %6437 = vmatprep.subr.bf16.mxu1 %v7175_v48  ;;  %v7286_v48 = vcombine.low %v5102_v36, %v5106_v38  ;;  %v7295_v50 = vcombine.high %v5110_v41, %v5114_v47 }
 0xc63   :  { %6438 = vmatpush1.bf16.msra.mxu1 %v7174_v33  ;;  %v5122_v33 = vld [vmem:[%s10365_s13 + $0x5f8] sm:$0xff] }
 0xc64   :  { %6439 = vmatprep.subr.bf16.mxu1 %v7183_v49  ;;  %v7294_v49 = vcombine.low %v5110_v41, %v5114_v47  ;;  %v7303_v4 = vcombine.high %v5118_v0, %v5122_v33 }
 0xc67   :  { %6440 = vmatpush1.bf16.msra.mxu1 %v7182_v51  ;;  %v7302_v51 = vcombine.low %v5118_v0, %v5122_v33 }
 0xc68   :  { %6441 = vmatprep.subr.bf16.mxu1 %v7191_v1  ;;  %v7311_v1 = vcombine.high %v5126_v27, %v5126_v27  ;;  %v5159_v27 = vsub.s32 7, %v9335_v22 }
 0xc6b   :  { %6442 = vmatpush1.bf16.msra.mxu1 %v7190_v5  ;;  %v10299_v5 = vld [vmem:[#allocation17] sm:$0xff] }
 0xc6c   :  { %6443 = vmatprep.subr.bf16.mxu1 %v7199_v28  ;;  %v5132_v28 = vrot.slane %v10299_v5, %v9338_v26  ;;  %v5136_v46 = vrot.slane %v10299_v5, %v9368_v53  ;;  %v5140_v6 = vrot.slane %v10299_v5, %v1123_v63  ;;  %v7326_v63 = vld.sshfl [vmem:[%s10368_s16] sm:$0x33 pattern:$0x76325410]  ;;  %s8815_s16 = smov [#allocation22]  }
 0xc6d   :  { %s6626_s1 = sshll.u32 %s8815_s16, 4  ;;  %s6627_s1 = int_to_ptr.vmem [resolvable:$true] %s6626_s1 }
 0xc6e   :  { %s8730_s15 = scalar_lea.vmem %s6627_s1, 64  ;;  %p8735_p11 = scmp.lt.s32.totalorder %s6627_s1, %s6627_s1 }
 0xc6f   :  { %6444 = vmatpush1.bf16.msra.mxu1 %v7198_v58  ;;  %p8731_p10 = scmp.ne.s32.totalorder %s6627_s1, %s8730_s15  ;;  %p8736_p12 = scmp.lt.s32.totalorder %s8730_s15, %s8730_s15 }
 0xc70   :  { %6445 = vmatprep.subr.bf16.mxu1 %v7207_v23 }
 0xc71   :  { %p8737_p13 = por %p8736_p12, %p8735_p11 }
 0xc73   :  { %6446 = vmatpush1.bf16.msra.mxu1 %v7206_v62  ;;  %p8738_p0 = pnand %p8737_p13, %p8731_p10 }
 0xc74   :  { %6447 = vmatprep.subr.bf16.mxu1 %v7215_v2 }
 0xc77   :  { %6448 = vmatpush1.bf16.msra.mxu1 %v7214_v8 }
 0xc78   :  { %6449 = vmatprep.subr.bf16.mxu1 %v7223_v60 }
 0xc7b   :  { %6450 = vmatpush1.bf16.msra.mxu1 %v7222_v39 }
 0xc7c   :  { %6451 = vmatprep.subr.bf16.mxu1 %v7231_v55  ;;  %v5152_v55 = vrot.slane %v10299_v5, %v5151_v10 }
 0xc7f   :  { %6452 = vmatpush1.bf16.msra.mxu1 %v7230_v14 }
 0xc80   :  { %6453 = vmatprep.subr.bf16.mxu1 %v7239_v15 }
 0xc83   :  { %6454 = vmatpush1.bf16.msra.mxu1 %v7238_v21 }
 0xc84   :  { %6464 = vmatprep.subr.bf16.mxu1 %v7247_v57 }
 0xc86   :  { %6456 = vmatmul.mubr.bf16.vlgmr.msra.gmra.mrb[56].mxu1 %v9769_v32  ;;  %v5094_v32 = vld [vmem:[%s10365_s13 + $0x518] sm:$0xff] }
 0xc87   :  { %6465 = vmatpush1.bf16.msra.mxu1 %v7246_v24  ;;  %7319 = vmatprep.mubr.msk.bf16.mxu1 %vm6149_vm8, %v9978_v45  ;;  %v5098_v45 = vld [vmem:[%s10365_s13 + $0x538] sm:$0xff] }
 0xc88   :  { %6466 = vmatprep.subr.bf16.mxu1 %v7255_v25  ;;  %v7279_v35 = vcombine.high %v5094_v32, %v5098_v45  ;;  %v7278_v42 = vcombine.low %v5094_v32, %v5098_v45 }
 0xc8b   :  { %6467 = vmatpush1.bf16.msra.mxu1 %v7254_v44  ;;  %v5144_v44 = vrot.slane %v10299_v5, %v5143_v54 }
 0xc8c   :  { %6468 = vmatprep.subr.bf16.mxu1 %v7263_v29 }
 0xc8f   :  { %6469 = vmatpush1.bf16.msra.mxu1 %v7262_v34 }
 0xc90   :  { %6470 = vmatprep.subr.bf16.mxu1 %v7271_v20 }
 0xc93   :  { %6471 = vmatpush1.bf16.msra.mxu1 %v7270_v31 }
 0xc94   :  { %6472 = vmatprep.subr.bf16.mxu1 %v7279_v35 }
 0xc97   :  { %6473 = vmatpush1.bf16.msra.mxu1 %v7278_v42 }
 0xc98   :  { %6474 = vmatprep.subr.bf16.mxu1 %v7287_v43  ;;  %v6552_v43 = vcombine.high %v7326_v63, %v7326_v63 }
 0xc9b   :  { %6475 = vmatpush1.bf16.msra.mxu1 %v7286_v48 }
 0xc9c   :  { %6476 = vmatprep.subr.bf16.mxu1 %v7295_v50 }
 0xc9f   :  { %6477 = vmatpush1.bf16.msra.mxu1 %v7294_v49 }
 0xca0   :  { %6478 = vmatprep.subr.bf16.mxu1 %v7303_v4  ;;  %v5155_v4 = vsub.s32 6, %v9335_v22 }
 0xca3   :  { %6479 = vmatpush1.bf16.msra.mxu1 %v7302_v51  ;;  %v5156_v51 = vrot.slane %v10299_v5, %v5155_v4 }
 0xca4   :  { %7318 = vmatprep.subr.msk.bf16.mxu1 %vm4706_vm7, %v7311_v1  ;;  %v5160_v1 = vrot.slane %v10299_v5, %v5159_v27 }
 0xca7   :  { %6481 = vmatpush1.bf16.msra.mxu1 %v6172_v56 }
 0xcaa   :  { %6497 = vmatmul.mubr.bf16.vlgmr.msra.gmra.mrb[56].mxu1 %v9999_v30  ;;  %v5147_v30 = vsub.s32 4, %v9335_v22  ;;  %v6589_v22 = vld [vmem:[#allocation20] sm:$0x3] }
 0xcac   :  { %v5148_v39 = vrot.slane %v10299_v5, %v5147_v30  ;;  %v6598_v30 = vrot.slane %v6589_v22, %v9368_v53 }
 0xcb5   :  { %v6252_v37 = vpop.f32.mrb[48].mxu1  ;;  %v6416_v58 = vpop.f32.mrb[24].mxu0 }
 0xcb6   :  { %v7829_v23 = vadd.f32 %v6252_v37, %v5132_v28  ;;  %v6254_v59 = vpop.f32.mrb[49].mxu1  ;;  %v6418_v61 = vpop.f32.mrb[25].mxu0  ;;  %v7833_v11 = vadd.f32 %v6416_v58, %v5148_v39 }
 0xcb7   :  { %v7830_v62 = vadd.f32 %v6254_v59, %v5136_v46  ;;  %v6256_v2 = vpop.f32.mrb[50].mxu1  ;;  %v6420_v3 = vpop.f32.mrb[26].mxu0  ;;  %v7834_v12 = vadd.f32 %v6418_v61, %v5152_v55 }
 0xcb8   :  { %v7320_v7 = vmul.f32 -1.442695, %v7829_v23  ;;  %v6257_v8 = vpop.f32.mrb[51].mxu1  ;;  %v6421_v60 = vpop.f32.mrb[27].mxu0 }
 0xcb9   :  { %v7321_v9 = vmul.f32 -1.442695, %v7830_v62  ;;  %v6594_v8 = vrot.slane %v6589_v22, %v9338_v26 }
 0xcba   :  { %8478 = vpow2.f32 %v7320_v7 }
 0xcbb   :  { %8480 = vpow2.f32 %v7321_v9 }
 0xcbc   :  { %8482 = vtanh.f32 %v7833_v11 }
 0xcbd   :  { %8484 = vtanh.f32 %v7834_v12 }
 0xcc4   :  { %v8479_v14 = vpop.eup %8478 }
 0xcc5   :  { %v8481_v15 = vpop.eup %8480  ;;  %v6511_v18 = vadd.f32 1.0, %v8479_v14 }
 0xcc6   :  { %v6512_v19 = vadd.f32 1.0, %v8481_v15  ;;  %v8483_v21 = vpop.eup %8482 }
 0xcc7   :  { %8486 = vrcp.f32 %v6511_v18  ;;  %v8485_v57 = vpop.eup %8484 }
 0xcc8   :  { %8488 = vrcp.f32 %v6512_v19 }
 0xcd1   :  { %v8487_v16 = vpop.eup %8486 }
 0xcd2   :  { %v8489_v17 = vpop.eup %8488  ;;  %v6557_v24 = vmul.f32 %v8487_v16, %v8483_v21 }
 0xcd3   :  { %v6558_v25 = vmul.f32 %v8489_v17, %v8485_v57 }
 0xd19   :  { %v6334_v29 = vpop.f32.mrb[52].mxu1 }
 0xd1a   :  { %v7831_v40 = vadd.f32 %v6334_v29, %v5140_v6  ;;  %v6336_v13 = vpop.f32.mrb[53].mxu1 }
 0xd1b   :  { %v7832_v34 = vadd.f32 %v6336_v13, %v5144_v44  ;;  %v6338_v20 = vpop.f32.mrb[54].mxu1 }
 0xd1c   :  { %v7322_v32 = vmul.f32 -1.442695, %v7831_v40  ;;  %v6339_v45 = vpop.f32.mrb[55].mxu1 }
 0xd1d   :  { %v7323_v31 = vmul.f32 -1.442695, %v7832_v34 }
 0xd1e   :  { %8490 = vpow2.f32 %v7322_v32 }
 0xd1f   :  { %8492 = vpow2.f32 %v7323_v31 }
 0xd28   :  { %v8491_v35 = vpop.eup %8490 }
 0xd29   :  { %v8493_v36 = vpop.eup %8492  ;;  %v6523_v38 = vadd.f32 1.0, %v8491_v35 }
 0xd2a   :  { %v6524_v42 = vadd.f32 1.0, %v8493_v36 }
 0xd2b   :  { %8494 = vrcp.f32 %v6523_v38 }
 0xd2c   :  { %8496 = vrcp.f32 %v6524_v42 }
 0xd35   :  { %v8495_v41 = vpop.eup %8494 }
 0xd36   :  { %v8497_v47 = vpop.eup %8496  ;;  %v6555_v48 = vmul.f32 %v8495_v41, %v7326_v63 }
 0xd37   :  { %v6556_v50 = vmul.f32 %v8497_v47, %v6552_v43 }
 0xd38   :  { %v6559_v0 = vadd.f32 %v6557_v24, %v6555_v48 }
 0xd39   :  { %v6560_v33 = vadd.f32 %v6558_v25, %v6556_v50 }
 0xd3b   :  { %v6567_v49 = vcombine.low %v6559_v0, %v6560_v33 }
 0xd3d   :  { %7327 = vst.sshfl [vmem:[#allocation23] sm:$0x33 pattern:$0x76325410] %v6567_v49 }
 0xd7d   :  { %v6498_v52 = vpop.f32.mrb[56].mxu1 }
 0xd7e   :  { %v7835_v56 = vadd.f32 %v6498_v52, %v5156_v51  ;;  %v6500_v28 = vpop.f32.mrb[57].mxu1 }
 0xd7f   :  { %v7836_v46 = vadd.f32 %v6500_v28, %v5160_v1  ;;  %v6502_v37 = vpop.f32.mrb[58].mxu1 }
 0xd80   :  { %v7324_v58 = vmul.f32 -1.442695, %v7835_v56  ;;  %v6503_v23 = vpop.f32.mrb[59].mxu1 }
 0xd81   :  { %v7325_v59 = vmul.f32 -1.442695, %v7836_v46 }
 0xd82   :  { %8498 = vpow2.f32 %v7324_v58 }
 0xd83   :  { %8500 = vpow2.f32 %v7325_v59 }
 0xd84   :  { %8502 = vtanh.f32 %v6559_v0 }
 0xd85   :  { %8504 = vtanh.f32 %v6560_v33 }
 0xd8c   :  { %v8499_v61 = vpop.eup %8498 }
 0xd8d   :  { %v8501_v62 = vpop.eup %8500  ;;  %v6537_v2 = vadd.f32 1.0, %v8499_v61 }
 0xd8e   :  { %v6538_v3 = vadd.f32 1.0, %v8501_v62  ;;  %v8503_v5 = vpop.eup %8502 }
 0xd8f   :  { %8506 = vrcp.f32 %v6537_v2  ;;  %v8505_v7 = vpop.eup %8504 }
 0xd90   :  { %8508 = vrcp.f32 %v6538_v3 }
 0xd99   :  { %v8507_v60 = vpop.eup %8506 }
 0xd9a   :  { %v8509_v9 = vpop.eup %8508  ;;  %v6563_v10 = vmul.f32 %v8507_v60, %v8503_v5 }
 0xd9b   :  { %v6564_v39 = vmul.f32 %v8509_v9, %v8505_v7 }
 0xd9c   :  { %v6601_v55 = vmul.f32 %v6594_v8, %v6563_v10 }
 0xd9d   :  { %v6602_v11 = vmul.f32 %v6598_v30, %v6564_v39  ;;  %v6579_v12 = vcombine.low %v6563_v10, %v6564_v39 }
 0xd9e   :  { %v6603_v14 = vsel %vm4706_vm7, %v6601_v55, 0.0 }
 0xd9f   :  { %v6604_v15 = vsel %vm4706_vm7, %v6602_v11, 0.0  ;;  %7328 = vst.sshfl [vmem:[#allocation22] sm:$0x33 pattern:$0x76325410] %v6579_v12 }
 0xda0   :  { %v6605_v18 = vadd.f32 %v6604_v15, %v6603_v14 }
 0xda2   :  { %6606 = vadd.xlane.f32.xlu0 %v6605_v18 }
 0xda3   :  { %8741 = shalt.err (!%p8738_p0)
}
 0xda4   :  { %s8742_s26 = scalar_lea.hbm %s10373_s21, 64 }
 0xda5   :  { %p8743_p1 = scmp.ne.s32.totalorder %s10373_s21, %s8742_s26  ;;  %p8746_p2 = scmp.lt.u32.totalorder %s8742_s26, %s10373_s21 }
 0xda7   :  { %p8748_p3 = pnand %p8746_p2, %p8743_p1 }
 0xda9   :  { %8751 = shalt.err (!%p8748_p3)
}
 0xdaa   :  { %6629 = dma.vmem_to_hbm [thread:$0]  %s6627_s1, 64, %s10373_s21, [#allocation7]  }
 0xdab   :  { %s8752_s28 = scalar_lea.vmem %s6637_s20, 64  ;;  %p8757_p5 = scmp.lt.s32.totalorder %s6637_s20, %s6637_s20 }
 0xdac   :  { %p8753_p4 = scmp.ne.s32.totalorder %s6637_s20, %s8752_s28  ;;  %p8758_p6 = scmp.lt.s32.totalorder %s8752_s28, %s8752_s28 }
 0xdae   :  { %p8759_p7 = por %p8758_p6, %p8757_p5 }
 0xdb0   :  { %p8760_p8 = pnand %p8759_p7, %p8753_p4 }
 0xdb2   :  { %8763 = shalt.err (!%p8760_p8)
}
 0xdb3   :  { %s8764_s3 = scalar_lea.hbm %s10374_s22, 64 }
 0xdb4   :  { %p8765_p9 = scmp.ne.s32.totalorder %s10374_s22, %s8764_s3  ;;  %p8768_p10 = scmp.lt.u32.totalorder %s8764_s3, %s10374_s22 }
 0xdb6   :  { %p8770_p11 = pnand %p8768_p10, %p8765_p9 }
 0xdb8   :  { %8773 = shalt.err (!%p8770_p11)
}
 0xdb9   :  { %6639 = dma.vmem_to_hbm [thread:$0]  %s6637_s20, 64, %s10374_s22, [#allocation24]   ;;  %v7329_v26 = vld [vmem:[#allocation4] ss:$0 sm:$0xff]  ;;  %vm6616_vm9 = vcmask 1024  }
 0xdba   :  { %s10396_s2 = sld [smem:[#allocation40_spill]] }
 0xe2f   :  { %v6607_v53 = vpop.xlane.xlu0 %6606 }
 0xe30   :  { %v6615_v19 = vadd.f32 %v7329_v26, %v6607_v53 }
 0xe32   :  { %6617 = vst.msk [vmem:[%s10396_s2] sm:$0x3] %vm6616_vm9, %v6615_v19 }
 0xe33   :  { %8786 = dma.done.wait [#allocation7], 64  }
 0xe34   :  { %8787 = vsyncadd [#allocation7], 4294967232 }
 0xe35   :  { %8788 = dma.done.wait [#allocation24], 64  }
 0xe36   :  { %8789 = vsyncadd [#allocation24], 4294967232 }
 0xe37   :  { %6648 = vsyncpa [#allocation6], 1 }
 0xe38   :  { %6649 = vsyncpa [#allocation9], 1 }
 0xe39   :  { %6650 = vsyncpa [#allocation12], 1 }
 0xe3a   :  { %6651 = vsyncpa [#allocation15], 1 }
 0xe3b   :  { %6652 = vsyncpa [#allocation18], 1 }
 0xe3c   :  { %6653 = vsyncpa [#allocation21], 1 }
 0xe3d   :  { %6654 = vsyncpa [#allocation7], 1 }
 0xe3e   :  { %6655 = vsyncpa [#allocation24], 1 }

</bundles_post_ra>
